<compile_context>
chip_gen: v7x
topology: tpu7x:2x2x1
jax: 0.10.0
libtpu: 0.0.40
codegen_flags: <defaults>
</compile_context>

<pallas_src>
import functools

import jax
import jax.numpy as jnp
from jax import lax
from jax.experimental import pallas as pl
from jax.experimental.pallas import tpu as pltpu

BN_EPS = 1e-5
LEAKY_SLOPE = 0.01  # torch.nn.LeakyReLU default


# ----------------------------------------------------------------------------
# Small helpers
# ----------------------------------------------------------------------------
def _round_up(x, m):
    return (x + m - 1) // m * m


def _pick_tile(padded_dim, cap):
    """Largest multiple of 128 that divides padded_dim and is <= cap."""
    cap = max(128, cap // 128 * 128)
    t = min(padded_dim, cap)
    while padded_dim % t:
        t -= 128
    return t


@functools.lru_cache(maxsize=None)
def _hw_caps():
    """(tn_cap, tk_cap, vmem_limit_bytes), re-derived per TPU generation."""
    vmem_cap = 64 * 1024 * 1024              # conservative default (v7x: 64 MiB)
    try:
        vmem_cap = int(pltpu.get_tpu_info().vmem_capacity_bytes)
    except Exception:
        pass
    if vmem_cap >= 100 * 1024 * 1024:        # v5e / v6e: 128 MiB physical VMEM
        return 1024, 1024, 64 * 1024 * 1024
    return 512, 512, 48 * 1024 * 1024        # v7x-safe budget (64 MiB physical)


def pad_cols(x, cols):
    pad = cols - x.shape[1]
    return x if pad == 0 else jnp.pad(x, ((0, 0), (0, pad)))


def prep_linear(w, b=None, gamma=None, beta=None):
    """Pad K,N to multiples of 128 and pre-cast ONCE at init (no per-call pad/cast).

    Padded gamma columns are 1.0 and padded beta/bias columns are 0.0 so that
    padded output columns stay exactly zero through BN / residual / LeakyReLU.
    """
    K, N = w.shape
    Kp, Np = _round_up(K, 128), _round_up(N, 128)
    p = {'K': K, 'N': N, 'Kp': Kp, 'Np': Np,
         'w': jnp.pad(w, ((0, Kp - K), (0, Np - N))).astype(jnp.bfloat16)}
    if b is not None:
        p['b'] = jnp.pad(b, (0, Np - N)).reshape(1, Np).astype(jnp.float32)
    if gamma is not None:
        p['g'] = jnp.pad(gamma, (0, Np - N), constant_values=1.0).reshape(1, Np).astype(jnp.float32)
        p['be'] = jnp.pad(beta, (0, Np - N)).reshape(1, Np).astype(jnp.float32)
    return p


# ----------------------------------------------------------------------------
# Fused tiled matmul kernel:  y = x @ w [+ b] [-> BatchNorm] [+ res] [-> LReLU]
# Grid = (N tiles, K tiles); K is the reduction axis (last, "arbitrary").
# M stays whole so per-column training-mode BatchNorm statistics are exact.
# Accumulation happens directly in the k-invariant output block (no scratch).
# ----------------------------------------------------------------------------
def _fused_linear_kernel(*refs, use_bn, use_act, has_bias, has_res, single_k):
    it = iter(refs)
    x_ref = next(it)
    w_ref = next(it)
    b_ref = next(it) if has_bias else None
    if use_bn:
        g_ref = next(it)
        be_ref = next(it)
    res_ref = next(it) if has_res else None
    o_ref = next(it)

    def epilogue(y):
        if has_bias:
            y = y + b_ref[...]
        if use_bn:
            # Training-mode BatchNorm; one-pass biased variance.
            mean = jnp.mean(y, axis=0, keepdims=True)
            var = jnp.maximum(jnp.mean(y * y, axis=0, keepdims=True) - mean * mean, 0.0)
            y = (y - mean) * lax.rsqrt(var + BN_EPS) * g_ref[...] + be_ref[...]
        if has_res:
            y = y + res_ref[...].astype(jnp.float32)
        if use_act:
            y = jnp.where(y >= 0.0, y, LEAKY_SLOPE * y)
        return y

    if single_k:
        y = jnp.dot(x_ref[...].astype(jnp.bfloat16), w_ref[...],
                    preferred_element_type=jnp.float32)
        o_ref[...] = epilogue(y).astype(o_ref.dtype)
    else:
        k = pl.program_id(1)

        @pl.when(k == 0)
        def _init():
            o_ref[...] = jnp.zeros_like(o_ref)

        o_ref[...] += jnp.dot(x_ref[...].astype(jnp.bfloat16), w_ref[...],
                              preferred_element_type=jnp.float32)

        @pl.when(k == pl.num_programs(1) - 1)
        def _finalize():
            o_ref[...] = epilogue(o_ref[...]).astype(o_ref.dtype)


def fused_linear(x, lp, *, use_bn, use_act, res=None, out_dtype=jnp.float32):
    """(M,Kp)@(Kp,Np) [+bias] [+BN] [+residual] [+LeakyReLU]; returns padded (M, Np)."""
    M = x.shape[0]
    Kp, Np = lp['Kp'], lp['Np']
    x = pad_cols(x, Kp)

    has_bias = ('b' in lp) and (not use_bn)
    has_res = res is not None

    cap_n, cap_k, vmem_limit = _hw_caps()
    tk = _pick_tile(Kp, cap_k)
    # >= 2 N tiles whenever Np >= 256 so the "parallel" axis can shard across
    # v7x's two TensorCores (costs nothing on v5e/v6e).
    tn_cap = min(cap_n, max(128, Np // 2)) if Np >= 256 else cap_n
    tn = _pick_tile(Np, tn_cap)
    grid_k = Kp // tk
    single_k = grid_k == 1
    if not single_k:
        out_dtype = jnp.float32   # multi-K accumulation stays f32 in the output block

    args = [x, lp['w']]
    in_specs = [pl.BlockSpec((M, tk), lambda n, k: (0, k)),
                pl.BlockSpec((tk, tn), lambda n, k: (k, n))]
    if has_bias:
        args.append(lp['b'])
        in_specs.append(pl.BlockSpec((1, tn), lambda n, k: (0, n)))
    if use_bn:
        args += [lp['g'], lp['be']]
        in_specs += [pl.BlockSpec((1, tn), lambda n, k: (0, n)),
                     pl.BlockSpec((1, tn), lambda n, k: (0, n))]
    if has_res:
        res = pad_cols(res, Np)
        args.append(res)
        in_specs.append(pl.BlockSpec((M, tn), lambda n, k: (0, n)))

    kernel = functools.partial(_fused_linear_kernel, use_bn=use_bn, use_act=use_act,
                               has_bias=has_bias, has_res=has_res, single_k=single_k)

    out_itemsize = 2 if out_dtype == jnp.bfloat16 else 4
    bytes_accessed = ((Np // tn) * M * Kp * x.dtype.itemsize          # x re-read per N tile
                      + Kp * Np * 2                                    # bf16 weights
                      + M * Np * out_itemsize                          # output store
                      + Np * 4 * (int(has_bias) + 2 * int(use_bn))     # bias/gamma/beta
                      + (M * Np * res.dtype.itemsize if has_res else 0))
    cost = pl.CostEstimate(flops=2 * M * Kp * Np, transcendentals=0,
                           bytes_accessed=int(bytes_accessed))

    return pl.pallas_call(
        kernel,
        out_shape=jax.ShapeDtypeStruct((M, Np), out_dtype),
        grid_spec=pltpu.PrefetchScalarGridSpec(
            num_scalar_prefetch=0,
            grid=(Np // tn, grid_k),
            in_specs=in_specs,
            out_specs=pl.BlockSpec((M, tn), lambda n, k: (0, n)),
        ),
        compiler_params=pltpu.CompilerParams(
            dimension_semantics=("parallel", "arbitrary"),
            vmem_limit_bytes=vmem_limit,
        ),
        cost_estimate=cost,
    )(*args)


# ----------------------------------------------------------------------------
# Fused "VAE tail": encoder Linear+BN+LReLU -> Linear (mu/log_var) ->
# reparameterization -> 4-layer decoder MLP, all in ONE single-block kernel.
# All operands are tiny at these shapes; everything lives in VMEM at once.
# TODO(synk): fall back to a tiled fused_linear chain for configs whose tail
# weights exceed VMEM (e.g. the celeba config).
# ----------------------------------------------------------------------------
def _vae_tail_kernel(feat_ref, we1_ref, ge1_ref, bee1_ref,
                     wmu_ref, bmu_ref, wlv_ref, blv_ref, eps_ref,
                     wd1_ref, gd1_ref, bed1_ref,
                     wd2_ref, gd2_ref, bed2_ref,
                     wd3_ref, gd3_ref, bed3_ref,
                     wd4_ref, bd4_ref,
                     out_ref, mu_ref, lv_ref):
    def mm(a, w_ref):
        return jnp.dot(a.astype(jnp.bfloat16), w_ref[...],
                       preferred_element_type=jnp.float32)

    def bn(y, g_ref, be_ref):
        mean = jnp.mean(y, axis=0, keepdims=True)
        var = jnp.maximum(jnp.mean(y * y, axis=0, keepdims=True) - mean * mean, 0.0)
        return (y - mean) * lax.rsqrt(var + BN_EPS) * g_ref[...] + be_ref[...]

    def lrelu(y):
        return jnp.where(y >= 0.0, y, LEAKY_SLOPE * y)

    # Encoder MLP head.
    h = lrelu(bn(mm(feat_ref[...], we1_ref), ge1_ref, bee1_ref))
    mu = mm(h, wmu_ref) + bmu_ref[...]
    lv = mm(h, wlv_ref) + blv_ref[...]
    mu_ref[...] = mu
    lv_ref[...] = lv

    # Reparameterization (eps is zero-padded past the real latent lanes).
    z = mu + eps_ref[...] * jnp.exp(lv * 0.5)

    # Decoder 4-layer MLP.
    h = lrelu(bn(mm(z, wd1_ref), gd1_ref, bed1_ref))
    h = lrelu(bn(mm(h, wd2_ref), gd2_ref, bed2_ref))
    h = lrelu(bn(mm(h, wd3_ref), gd3_ref, bed3_ref))
    out_ref[...] = mm(h, wd4_ref) + bd4_ref[...]


def vae_tail(feat, tp, eps):
    B = feat.shape[0]
    feat = pad_cols(feat, tp['featp'])
    vmem = pl.BlockSpec(memory_space=pltpu.MemorySpace.VMEM)
    out_shape = (jax.ShapeDtypeStruct((B, tp['fullp']), jnp.float32),
                 jax.ShapeDtypeStruct((B, tp['Lp']), jnp.float32),
                 jax.ShapeDtypeStruct((B, tp['Lp']), jnp.float32))
    return pl.pallas_call(
        _vae_tail_kernel,
        out_shape=out_shape,
        in_specs=[vmem] * 20,
        out_specs=(vmem, vmem, vmem),
        compiler_params=pltpu.CompilerParams(vmem_limit_bytes=_hw_caps()[2]),
    )(feat,
      tp['e1']['w'], tp['e1']['g'], tp['e1']['be'],
      tp['mu']['w'], tp['mu']['b'], tp['lv']['w'], tp['lv']['b'], eps,
      tp['d1']['w'], tp['d1']['g'], tp['d1']['be'],
      tp['d2']['w'], tp['d2']['g'], tp['d2']['be'],
      tp['d3']['w'], tp['d3']['g'], tp['d3']['be'],
      tp['d4']['w'], tp['d4']['b'])


# ----------------------------------------------------------------------------
# Glue: im2col (pure XLA reshapes/slices, kept on bf16) feeding fused_linear.
# TODO(synk): fold im2col into the conv kernel (tap-offset index_maps) to avoid
# the 9x activation expansion in HBM; kept host-side since it is small here.
# ----------------------------------------------------------------------------
def im2col(x, kh, kw, stride, pad):
    """x: (B,H,W,C) NHWC -> (B*Ho*Wo, kh*kw*C); row order is (b, ho, wo)."""
    B, H, W, C = x.shape
    Ho = (H + 2 * pad - kh) // stride + 1
    Wo = (W + 2 * pad - kw) // stride + 1
    xp = jnp.pad(x, ((0, 0), (pad, pad), (pad, pad), (0, 0)))
    patches = []
    for i in range(kh):
        for j in range(kw):
            patches.append(xp[:, i:i + stride * (Ho - 1) + 1:stride,
                              j:j + stride * (Wo - 1) + 1:stride, :])
    cols = jnp.stack(patches, axis=3)                  # (B,Ho,Wo,kh*kw,C)
    return cols.reshape(B * Ho * Wo, kh * kw * C), (Ho, Wo)


def residual_block(x, p):
    # TODO(synk): module.ResidualBlock source not provided; standard block assumed:
    #   conv3x3(stride)-BN-LReLU -> conv3x3(1)-BN, plus (1x1 conv(stride)-BN |
    #   identity) shortcut, summed, then LReLU.  Conv bias omitted (cancelled by
    #   training-mode BN).  Stride math matches VanillaVAE's fc_dim recurrence.
    B, H, W, Cin = x.shape
    stride, cout = p['stride'], p['cout']

    cols1, (Ho, Wo) = im2col(x, 3, 3, stride, 1)
    h = fused_linear(cols1, p['l1'], use_bn=True, use_act=True,
                     out_dtype=jnp.bfloat16)                       # (B*Ho*Wo, Np)
    h = h[:, :cout].reshape(B, Ho, Wo, cout)
    cols2, _ = im2col(h, 3, 3, 1, 1)

    if 'ls' in p:      # projection shortcut: 1x1 conv (stride) + BN
        xs = x[:, :stride * (Ho - 1) + 1:stride,
               :stride * (Wo - 1) + 1:stride, :].reshape(B * Ho * Wo, Cin)
        sc = fused_linear(xs, p['ls'], use_bn=True, use_act=False,
                          out_dtype=jnp.bfloat16)                  # stays Np-padded (exact zeros)
    else:              # identity shortcut
        assert stride == 1 and Cin == cout, "identity shortcut requires stride=1, cin=cout"
        sc = x.reshape(B * H * W, Cin)

    out = fused_linear(cols2, p['l2'], use_bn=True, use_act=True, res=sc,
                       out_dtype=jnp.bfloat16)
    return out[:, :cout].reshape(B, Ho, Wo, cout)


# ----------------------------------------------------------------------------
# Parameter init (deterministic, synthetic).  Everything is pre-padded and
# pre-cast here so the per-forward path has no weight pad/cast XLA ops.
# ----------------------------------------------------------------------------
def init_params(key, in_ch, latent_ch, hidden_chs, input_dim):
    keys = iter(jax.random.split(key, 64))
    nk = lambda: next(keys)

    fc_dim = input_dim
    for _ in hidden_chs:
        fc_dim = (fc_dim - 1) // 2 + 1

    def conv_w(cin, cout, ksize):
        fan = cin * ksize * ksize
        w = jax.random.normal(nk(), (ksize, ksize, cin, cout), jnp.float32) / jnp.sqrt(fan)
        return w.reshape(ksize * ksize * cin, cout)

    def lin_wb(fin, fout):
        w = jax.random.normal(nk(), (fin, fout), jnp.float32) / jnp.sqrt(fin)
        b = 0.01 * jax.random.normal(nk(), (fout,), jnp.float32)
        return w, b

    def bn_p(n):
        return jnp.ones((n,), jnp.float32), jnp.zeros((n,), jnp.float32)

    def res_block_p(cin, cout, stride):
        g1, be1 = bn_p(cout)
        g2, be2 = bn_p(cout)
        p = {'stride': stride, 'cin': cin, 'cout': cout,
             'l1': prep_linear(conv_w(cin, cout, 3), gamma=g1, beta=be1),
             'l2': prep_linear(conv_w(cout, cout, 3), gamma=g2, beta=be2)}
        if stride != 1 or cin != cout:
            gs, bes = bn_p(cout)
            p['ls'] = prep_linear(conv_w(cin, cout, 1), gamma=gs, beta=bes)
        return p

    enc_blocks = []
    last = in_ch
    for ch in hidden_chs:
        enc_blocks.append(res_block_p(last, ch, 2))
        enc_blocks.append(res_block_p(ch, ch, 1))
        last = ch

    L = latent_ch
    feat = last * fc_dim * fc_dim
    half = input_dim ** 2 * in_ch // 2
    full = input_dim ** 2 * in_ch

    # Biases before training-mode BatchNorm are cancelled by mean subtraction.
    w_e1, _ = lin_wb(feat, 2 * L); g_e1, be_e1 = bn_p(2 * L)
    w_e2, b_e2 = lin_wb(2 * L, 2 * L)
    w_d1, _ = lin_wb(L, half);     g_d1, be_d1 = bn_p(half)
    w_d2, _ = lin_wb(half, half);  g_d2, be_d2 = bn_p(half)
    w_d3, _ = lin_wb(half, full);  g_d3, be_d3 = bn_p(full)
    w_d4, b_d4 = lin_wb(full, full)

    tail = {
        'featp': _round_up(feat, 128),
        'Lp': _round_up(L, 128),
        'full': full,
        'fullp': _round_up(full, 128),
        'e1': prep_linear(w_e1, gamma=g_e1, beta=be_e1),
        'mu': prep_linear(w_e2[:, :L], b=b_e2[:L]),
        'lv': prep_linear(w_e2[:, L:], b=b_e2[L:]),
        'd1': prep_linear(w_d1, gamma=g_d1, beta=be_d1),
        'd2': prep_linear(w_d2, gamma=g_d2, beta=be_d2),
        'd3': prep_linear(w_d3, gamma=g_d3, beta=be_d3),
        'd4': prep_linear(w_d4, b=b_d4),
    }
    return {'enc_blocks': enc_blocks, 'tail': tail,
            'in_ch': in_ch, 'latent': L, 'input_dim': input_dim}


# ----------------------------------------------------------------------------
# VanillaVAE.forward
# ----------------------------------------------------------------------------
def vae_forward(params, x_nchw, noise_key):
    B = x_nchw.shape[0]
    L = params['latent']
    # NCHW -> NHWC; activations stay bf16 through the conv stages (the MXU
    # casts them to bf16 inside the kernels anyway).
    x = jnp.transpose(x_nchw, (0, 2, 3, 1)).astype(jnp.bfloat16)

    # ---- encoder: residual conv stages ----
    for p in params['enc_blocks']:
        x = residual_block(x, p)

    # ---- Flatten (PyTorch NCHW order) ----
    feat = jnp.transpose(x, (0, 3, 1, 2)).reshape(B, -1)

    # ---- fused tail: enc FC + reparameterization + decoder MLP ----
    tp = params['tail']
    eps = pad_cols(jax.random.normal(noise_key, (B, L), jnp.float32), tp['Lp'])
    dec, mu_p, lv_p = vae_tail(feat, tp, eps)

    D, C = params['input_dim'], params['in_ch']
    out = dec[:, :tp['full']].reshape(B, C, D, D)   # Unflatten(1, (C, D, D))
    return out, mu_p[:, :L], lv_p[:, :L]


# ----------------------------------------------------------------------------
if __name__ == "__main__":
    # Small config consistent with VanillaVAE(__init__ args):
    # in_channel=1, latent_channel=16, hidden_channels=[8,16,32], input_dim=16
    B, IN_CH, INPUT_DIM = 2, 1, 16
    LATENT, HIDDEN = 16, [8, 16, 32]

    key = jax.random.PRNGKey(0)
    k_param, k_in, k_eps = jax.random.split(key, 3)

    params = init_params(k_param, IN_CH, LATENT, HIDDEN, INPUT_DIM)
    x = jax.random.normal(k_in, (B, IN_CH, INPUT_DIM, INPUT_DIM), jnp.float32)

    fwd = jax.jit(functools.partial(vae_forward, params))
    out, mu, log_var = fwd(x, k_eps)
    jax.block_until_ready((out, mu, log_var))

    assert out.shape == (B, IN_CH, INPUT_DIM, INPUT_DIM)
    assert mu.shape == (B, LATENT) and log_var.shape == (B, LATENT)
    assert bool(jnp.all(jnp.isfinite(out)))
    assert bool(jnp.all(jnp.isfinite(mu))) and bool(jnp.all(jnp.isfinite(log_var)))
    print("KERNEL_OK")
</pallas_src>

<mosaic_0001>
module attributes {stable_mosaic.version = 11 : i64} {
  func.func @_fused_linear_kernel(%arg0: i32, %arg1: i32, %arg2: memref<128x128xbf16, #tpu.memory_space<vmem>>, %arg3: memref<128x128xbf16, #tpu.memory_space<vmem>>, %arg4: memref<1x128xf32, #tpu.memory_space<vmem>>, %arg5: memref<1x128xf32, #tpu.memory_space<vmem>>, %arg6: memref<128x128xbf16, #tpu.memory_space<vmem>>) attributes {dimension_semantics = [#tpu.dimension_semantics<parallel>, #tpu.dimension_semantics<arbitrary>], iteration_bounds = array<i64: 1, 1>, scalar_prefetch = 0 : i64, scratch_operands = 0 : i64, tpu.core_type = #tpu.core_type<tc>, window_params = [{transform_indices = @transform_0, window_bounds = array<i64: 128, 128>}, {transform_indices = @transform_1, window_bounds = array<i64: 128, 128>}, {transform_indices = @transform_2, window_bounds = array<i64: 1, 128>}, {transform_indices = @transform_3, window_bounds = array<i64: 1, 128>}, {transform_indices = @transform_4, window_bounds = array<i64: 128, 128>}]} {
    %c0 = arith.constant 0 : index
    %c0_0 = arith.constant 0 : index
    %0 = vector.load %arg2[%c0, %c0_0] : memref<128x128xbf16, #tpu.memory_space<vmem>>, vector<128x128xbf16>
    %c0_1 = arith.constant 0 : index
    %c0_2 = arith.constant 0 : index
    %1 = vector.load %arg3[%c0_1, %c0_2] : memref<128x128xbf16, #tpu.memory_space<vmem>>, vector<128x128xbf16>
    %cst = arith.constant dense<0.000000e+00> : vector<128x128xf32>
    %2 = tpu.matmul %0, %1, %cst {dimension_numbers = #tpu.dot_dimension_numbers<[1], [0], [0], [1], [0, 0, 1, 1], [], []>} : vector<128x128xbf16>, vector<128x128xbf16>, vector<128x128xf32> -> vector<128x128xf32>
    %cst_3 = arith.constant dense<0.000000e+00> : vector<128xf32>
    %3 = vector.multi_reduction <add>, %2, %cst_3 [0] : vector<128x128xf32> to vector<128xf32>
    %4 = vector.shape_cast %3 : vector<128xf32> to vector<1x128xf32>
    %cst_4 = arith.constant 1.280000e+02 : f32
    %5 = vector.broadcast %cst_4 : f32 to vector<1x128xf32>
    %6 = arith.divf %4, %5 : vector<1x128xf32>
    %7 = arith.mulf %2, %2 : vector<128x128xf32>
    %cst_5 = arith.constant dense<0.000000e+00> : vector<128xf32>
    %8 = vector.multi_reduction <add>, %7, %cst_5 [0] : vector<128x128xf32> to vector<128xf32>
    %9 = vector.shape_cast %8 : vector<128xf32> to vector<1x128xf32>
    %cst_6 = arith.constant 1.280000e+02 : f32
    %10 = vector.broadcast %cst_6 : f32 to vector<1x128xf32>
    %11 = arith.divf %9, %10 : vector<1x128xf32>
    %12 = arith.mulf %6, %6 : vector<1x128xf32>
    %13 = arith.subf %11, %12 : vector<1x128xf32>
    %cst_7 = arith.constant 0.000000e+00 : f32
    %14 = vector.broadcast %cst_7 : f32 to vector<1x128xf32>
    %15 = arith.maximumf %13, %14 : vector<1x128xf32>
    %16 = vector.broadcast %6 : vector<1x128xf32> to vector<128x128xf32>
    %17 = arith.subf %2, %16 : vector<128x128xf32>
    %cst_8 = arith.constant 9.99999974E-6 : f32
    %18 = vector.broadcast %cst_8 : f32 to vector<1x128xf32>
    %19 = arith.addf %15, %18 : vector<1x128xf32>
    %20 = math.rsqrt %19 : vector<1x128xf32>
    %21 = vector.broadcast %20 : vector<1x128xf32> to vector<128x128xf32>
    %22 = arith.mulf %17, %21 : vector<128x128xf32>
    %c0_9 = arith.constant 0 : index
    %c0_10 = arith.constant 0 : index
    %23 = vector.load %arg4[%c0_9, %c0_10] : memref<1x128xf32, #tpu.memory_space<vmem>>, vector<1x128xf32>
    %24 = vector.broadcast %23 : vector<1x128xf32> to vector<128x128xf32>
    %25 = arith.mulf %22, %24 : vector<128x128xf32>
    %c0_11 = arith.constant 0 : index
    %c0_12 = arith.constant 0 : index
    %26 = vector.load %arg5[%c0_11, %c0_12] : memref<1x128xf32, #tpu.memory_space<vmem>>, vector<1x128xf32>
    %27 = vector.broadcast %26 : vector<1x128xf32> to vector<128x128xf32>
    %28 = arith.addf %25, %27 : vector<128x128xf32>
    %cst_13 = arith.constant 0.000000e+00 : f32
    %29 = vector.broadcast %cst_13 : f32 to vector<128x128xf32>
    %30 = arith.cmpf oge, %28, %29 : vector<128x128xf32>
    %cst_14 = arith.constant 0.00999999977 : f32
    %31 = vector.broadcast %cst_14 : f32 to vector<128x128xf32>
    %32 = arith.mulf %31, %28 : vector<128x128xf32>
    %33 = arith.select %30, %28, %32 : vector<128x128xi1>, vector<128x128xf32>
    %34 = arith.truncf %33 : vector<128x128xf32> to vector<128x128xbf16>
    %c0_15 = arith.constant 0 : index
    %c0_16 = arith.constant 0 : index
    %35 = vector.load %arg6[%c0_15, %c0_16] : memref<128x128xbf16, #tpu.memory_space<vmem>>, vector<128x128xbf16>
    tpu.vector_store %arg6[%c0_15, %c0_16], %34 {strides = array<i32>} : memref<128x128xbf16, #tpu.memory_space<vmem>>, vector<128x128xbf16>,
    return
  }
  func.func @transform_0(%arg0: i32, %arg1: i32) -> (i32, i32) {
    %c0_i32 = arith.constant 0 : i32
    %c0_i32_0 = arith.constant 0 : i32
    return %c0_i32, %arg1 : i32, i32
  }
  func.func @transform_1(%arg0: i32, %arg1: i32) -> (i32, i32) {
    %c0_i32 = arith.constant 0 : i32
    return %arg1, %arg0 : i32, i32
  }
  func.func @transform_2(%arg0: i32, %arg1: i32) -> (i32, i32) {
    %c0_i32 = arith.constant 0 : i32
    %c0_i32_0 = arith.constant 0 : i32
    return %c0_i32, %arg0 : i32, i32
  }
  func.func @transform_3(%arg0: i32, %arg1: i32) -> (i32, i32) {
    %c0_i32 = arith.constant 0 : i32
    %c0_i32_0 = arith.constant 0 : i32
    return %c0_i32, %arg0 : i32, i32
  }
  func.func @transform_4(%arg0: i32, %arg1: i32) -> (i32, i32) {
    %c0_i32 = arith.constant 0 : i32
    %c0_i32_0 = arith.constant 0 : i32
    return %c0_i32, %arg0 : i32, i32
  }
}

module attributes {stable_mosaic.version = 11 : i64} {
  func.func @_fused_linear_kernel(%arg0: i32, %arg1: i32, %arg2: memref<128x128xbf16, #tpu.memory_space<vmem>>, %arg3: memref<128x128xbf16, #tpu.memory_space<vmem>>, %arg4: memref<1x128xf32, #tpu.memory_space<vmem>>, %arg5: memref<1x128xf32, #tpu.memory_space<vmem>>, %arg6: memref<128x128xbf16, #tpu.memory_space<vmem>>, %arg7: memref<128x128xbf16, #tpu.memory_space<vmem>>) attributes {dimension_semantics = [#tpu.dimension_semantics<parallel>, #tpu.dimension_semantics<arbitrary>], iteration_bounds = array<i64: 1, 1>, scalar_prefetch = 0 : i64, scratch_operands = 0 : i64, tpu.core_type = #tpu.core_type<tc>, window_params = [{transform_indices = @transform_0, window_bounds = array<i64: 128, 128>}, {transform_indices = @transform_1, window_bounds = array<i64: 128, 128>}, {transform_indices = @transform_2, window_bounds = array<i64: 1, 128>}, {transform_indices = @transform_3, window_bounds = array<i64: 1, 128>}, {transform_indices = @transform_4, window_bounds = array<i64: 128, 128>}, {transform_indices = @transform_5, window_bounds = array<i64: 128, 128>}]} {
    %c0 = arith.constant 0 : index
    %c0_0 = arith.constant 0 : index
    %0 = vector.load %arg2[%c0, %c0_0] : memref<128x128xbf16, #tpu.memory_space<vmem>>, vector<128x128xbf16>
    %c0_1 = arith.constant 0 : index
    %c0_2 = arith.constant 0 : index
    %1 = vector.load %arg3[%c0_1, %c0_2] : memref<128x128xbf16, #tpu.memory_space<vmem>>, vector<128x128xbf16>
    %cst = arith.constant dense<0.000000e+00> : vector<128x128xf32>
    %2 = tpu.matmul %0, %1, %cst {dimension_numbers = #tpu.dot_dimension_numbers<[1], [0], [0], [1], [0, 0, 1, 1], [], []>} : vector<128x128xbf16>, vector<128x128xbf16>, vector<128x128xf32> -> vector<128x128xf32>
    %cst_3 = arith.constant dense<0.000000e+00> : vector<128xf32>
    %3 = vector.multi_reduction <add>, %2, %cst_3 [0] : vector<128x128xf32> to vector<128xf32>
    %4 = vector.shape_cast %3 : vector<128xf32> to vector<1x128xf32>
    %cst_4 = arith.constant 1.280000e+02 : f32
    %5 = vector.broadcast %cst_4 : f32 to vector<1x128xf32>
    %6 = arith.divf %4, %5 : vector<1x128xf32>
    %7 = arith.mulf %2, %2 : vector<128x128xf32>
    %cst_5 = arith.constant dense<0.000000e+00> : vector<128xf32>
    %8 = vector.multi_reduction <add>, %7, %cst_5 [0] : vector<128x128xf32> to vector<128xf32>
    %9 = vector.shape_cast %8 : vector<128xf32> to vector<1x128xf32>
    %cst_6 = arith.constant 1.280000e+02 : f32
    %10 = vector.broadcast %cst_6 : f32 to vector<1x128xf32>
    %11 = arith.divf %9, %10 : vector<1x128xf32>
    %12 = arith.mulf %6, %6 : vector<1x128xf32>
    %13 = arith.subf %11, %12 : vector<1x128xf32>
    %cst_7 = arith.constant 0.000000e+00 : f32
    %14 = vector.broadcast %cst_7 : f32 to vector<1x128xf32>
    %15 = arith.maximumf %13, %14 : vector<1x128xf32>
    %16 = vector.broadcast %6 : vector<1x128xf32> to vector<128x128xf32>
    %17 = arith.subf %2, %16 : vector<128x128xf32>
    %cst_8 = arith.constant 9.99999974E-6 : f32
    %18 = vector.broadcast %cst_8 : f32 to vector<1x128xf32>
    %19 = arith.addf %15, %18 : vector<1x128xf32>
    %20 = math.rsqrt %19 : vector<1x128xf32>
    %21 = vector.broadcast %20 : vector<1x128xf32> to vector<128x128xf32>
    %22 = arith.mulf %17, %21 : vector<128x128xf32>
    %c0_9 = arith.constant 0 : index
    %c0_10 = arith.constant 0 : index
    %23 = vector.load %arg4[%c0_9, %c0_10] : memref<1x128xf32, #tpu.memory_space<vmem>>, vector<1x128xf32>
    %24 = vector.broadcast %23 : vector<1x128xf32> to vector<128x128xf32>
    %25 = arith.mulf %22, %24 : vector<128x128xf32>
    %c0_11 = arith.constant 0 : index
    %c0_12 = arith.constant 0 : index
    %26 = vector.load %arg5[%c0_11, %c0_12] : memref<1x128xf32, #tpu.memory_space<vmem>>, vector<1x128xf32>
    %27 = vector.broadcast %26 : vector<1x128xf32> to vector<128x128xf32>
    %28 = arith.addf %25, %27 : vector<128x128xf32>
    %c0_13 = arith.constant 0 : index
    %c0_14 = arith.constant 0 : index
    %29 = vector.load %arg6[%c0_13, %c0_14] : memref<128x128xbf16, #tpu.memory_space<vmem>>, vector<128x128xbf16>
    %30 = arith.extf %29 : vector<128x128xbf16> to vector<128x128xf32>
    %31 = arith.addf %28, %30 : vector<128x128xf32>
    %cst_15 = arith.constant 0.000000e+00 : f32
    %32 = vector.broadcast %cst_15 : f32 to vector<128x128xf32>
    %33 = arith.cmpf oge, %31, %32 : vector<128x128xf32>
    %cst_16 = arith.constant 0.00999999977 : f32
    %34 = vector.broadcast %cst_16 : f32 to vector<128x128xf32>
    %35 = arith.mulf %34, %31 : vector<128x128xf32>
    %36 = arith.select %33, %31, %35 : vector<128x128xi1>, vector<128x128xf32>
    %37 = arith.truncf %36 : vector<128x128xf32> to vector<128x128xbf16>
    %c0_17 = arith.constant 0 : index
    %c0_18 = arith.constant 0 : index
    %38 = vector.load %arg7[%c0_17, %c0_18] : memref<128x128xbf16, #tpu.memory_space<vmem>>, vector<128x128xbf16>
    tpu.vector_store %arg7[%c0_17, %c0_18], %37 {strides = array<i32>} : memref<128x128xbf16, #tpu.memory_space<vmem>>, vector<128x128xbf16>,
    return
  }
  func.func @transform_0(%arg0: i32, %arg1: i32) -> (i32, i32) {
    %c0_i32 = arith.constant 0 : i32
    %c0_i32_0 = arith.constant 0 : i32
    return %c0_i32, %arg1 : i32, i32
  }
  func.func @transform_1(%arg0: i32, %arg1: i32) -> (i32, i32) {
    %c0_i32 = arith.constant 0 : i32
    return %arg1, %arg0 : i32, i32
  }
  func.func @transform_2(%arg0: i32, %arg1: i32) -> (i32, i32) {
    %c0_i32 = arith.constant 0 : i32
    %c0_i32_0 = arith.constant 0 : i32
    return %c0_i32, %arg0 : i32, i32
  }
  func.func @transform_3(%arg0: i32, %arg1: i32) -> (i32, i32) {
    %c0_i32 = arith.constant 0 : i32
    %c0_i32_0 = arith.constant 0 : i32
    return %c0_i32, %arg0 : i32, i32
  }
  func.func @transform_4(%arg0: i32, %arg1: i32) -> (i32, i32) {
    %c0_i32 = arith.constant 0 : i32
    %c0_i32_0 = arith.constant 0 : i32
    return %c0_i32, %arg0 : i32, i32
  }
  func.func @transform_5(%arg0: i32, %arg1: i32) -> (i32, i32) {
    %c0_i32 = arith.constant 0 : i32
    %c0_i32_0 = arith.constant 0 : i32
    return %c0_i32, %arg0 : i32, i32
  }
}

module attributes {stable_mosaic.version = 11 : i64} {
  func.func @_fused_linear_kernel(%arg0: i32, %arg1: i32, %arg2: memref<128x128xbf16, #tpu.memory_space<vmem>>, %arg3: memref<128x128xbf16, #tpu.memory_space<vmem>>, %arg4: memref<1x128xf32, #tpu.memory_space<vmem>>, %arg5: memref<1x128xf32, #tpu.memory_space<vmem>>, %arg6: memref<128x128xbf16, #tpu.memory_space<vmem>>) attributes {dimension_semantics = [#tpu.dimension_semantics<parallel>, #tpu.dimension_semantics<arbitrary>], iteration_bounds = array<i64: 1, 1>, scalar_prefetch = 0 : i64, scratch_operands = 0 : i64, tpu.core_type = #tpu.core_type<tc>, window_params = [{transform_indices = @transform_0, window_bounds = array<i64: 128, 128>}, {transform_indices = @transform_1, window_bounds = array<i64: 128, 128>}, {transform_indices = @transform_2, window_bounds = array<i64: 1, 128>}, {transform_indices = @transform_3, window_bounds = array<i64: 1, 128>}, {transform_indices = @transform_4, window_bounds = array<i64: 128, 128>}]} {
    %c0 = arith.constant 0 : index
    %c0_0 = arith.constant 0 : index
    %0 = vector.load %arg2[%c0, %c0_0] : memref<128x128xbf16, #tpu.memory_space<vmem>>, vector<128x128xbf16>
    %c0_1 = arith.constant 0 : index
    %c0_2 = arith.constant 0 : index
    %1 = vector.load %arg3[%c0_1, %c0_2] : memref<128x128xbf16, #tpu.memory_space<vmem>>, vector<128x128xbf16>
    %cst = arith.constant dense<0.000000e+00> : vector<128x128xf32>
    %2 = tpu.matmul %0, %1, %cst {dimension_numbers = #tpu.dot_dimension_numbers<[1], [0], [0], [1], [0, 0, 1, 1], [], []>} : vector<128x128xbf16>, vector<128x128xbf16>, vector<128x128xf32> -> vector<128x128xf32>
    %cst_3 = arith.constant dense<0.000000e+00> : vector<128xf32>
    %3 = vector.multi_reduction <add>, %2, %cst_3 [0] : vector<128x128xf32> to vector<128xf32>
    %4 = vector.shape_cast %3 : vector<128xf32> to vector<1x128xf32>
    %cst_4 = arith.constant 1.280000e+02 : f32
    %5 = vector.broadcast %cst_4 : f32 to vector<1x128xf32>
    %6 = arith.divf %4, %5 : vector<1x128xf32>
    %7 = arith.mulf %2, %2 : vector<128x128xf32>
    %cst_5 = arith.constant dense<0.000000e+00> : vector<128xf32>
    %8 = vector.multi_reduction <add>, %7, %cst_5 [0] : vector<128x128xf32> to vector<128xf32>
    %9 = vector.shape_cast %8 : vector<128xf32> to vector<1x128xf32>
    %cst_6 = arith.constant 1.280000e+02 : f32
    %10 = vector.broadcast %cst_6 : f32 to vector<1x128xf32>
    %11 = arith.divf %9, %10 : vector<1x128xf32>
    %12 = arith.mulf %6, %6 : vector<1x128xf32>
    %13 = arith.subf %11, %12 : vector<1x128xf32>
    %cst_7 = arith.constant 0.000000e+00 : f32
    %14 = vector.broadcast %cst_7 : f32 to vector<1x128xf32>
    %15 = arith.maximumf %13, %14 : vector<1x128xf32>
    %16 = vector.broadcast %6 : vector<1x128xf32> to vector<128x128xf32>
    %17 = arith.subf %2, %16 : vector<128x128xf32>
    %cst_8 = arith.constant 9.99999974E-6 : f32
    %18 = vector.broadcast %cst_8 : f32 to vector<1x128xf32>
    %19 = arith.addf %15, %18 : vector<1x128xf32>
    %20 = math.rsqrt %19 : vector<1x128xf32>
    %21 = vector.broadcast %20 : vector<1x128xf32> to vector<128x128xf32>
    %22 = arith.mulf %17, %21 : vector<128x128xf32>
    %c0_9 = arith.constant 0 : index
    %c0_10 = arith.constant 0 : index
    %23 = vector.load %arg4[%c0_9, %c0_10] : memref<1x128xf32, #tpu.memory_space<vmem>>, vector<1x128xf32>
    %24 = vector.broadcast %23 : vector<1x128xf32> to vector<128x128xf32>
    %25 = arith.mulf %22, %24 : vector<128x128xf32>
    %c0_11 = arith.constant 0 : index
    %c0_12 = arith.constant 0 : index
    %26 = vector.load %arg5[%c0_11, %c0_12] : memref<1x128xf32, #tpu.memory_space<vmem>>, vector<1x128xf32>
    %27 = vector.broadcast %26 : vector<1x128xf32> to vector<128x128xf32>
    %28 = arith.addf %25, %27 : vector<128x128xf32>
    %29 = arith.truncf %28 : vector<128x128xf32> to vector<128x128xbf16>
    %c0_13 = arith.constant 0 : index
    %c0_14 = arith.constant 0 : index
    %30 = vector.load %arg6[%c0_13, %c0_14] : memref<128x128xbf16, #tpu.memory_space<vmem>>, vector<128x128xbf16>
    tpu.vector_store %arg6[%c0_13, %c0_14], %29 {strides = array<i32>} : memref<128x128xbf16, #tpu.memory_space<vmem>>, vector<128x128xbf16>,
    return
  }
  func.func @transform_0(%arg0: i32, %arg1: i32) -> (i32, i32) {
    %c0_i32 = arith.constant 0 : i32
    %c0_i32_0 = arith.constant 0 : i32
    return %c0_i32, %arg1 : i32, i32
  }
  func.func @transform_1(%arg0: i32, %arg1: i32) -> (i32, i32) {
    %c0_i32 = arith.constant 0 : i32
    return %arg1, %arg0 : i32, i32
  }
  func.func @transform_2(%arg0: i32, %arg1: i32) -> (i32, i32) {
    %c0_i32 = arith.constant 0 : i32
    %c0_i32_0 = arith.constant 0 : i32
    return %c0_i32, %arg0 : i32, i32
  }
  func.func @transform_3(%arg0: i32, %arg1: i32) -> (i32, i32) {
    %c0_i32 = arith.constant 0 : i32
    %c0_i32_0 = arith.constant 0 : i32
    return %c0_i32, %arg0 : i32, i32
  }
  func.func @transform_4(%arg0: i32, %arg1: i32) -> (i32, i32) {
    %c0_i32 = arith.constant 0 : i32
    %c0_i32_0 = arith.constant 0 : i32
    return %c0_i32, %arg0 : i32, i32
  }
}

module attributes {stable_mosaic.version = 11 : i64} {
  func.func @_fused_linear_kernel(%arg0: i32, %arg1: i32, %arg2: memref<32x128xbf16, #tpu.memory_space<vmem>>, %arg3: memref<128x128xbf16, #tpu.memory_space<vmem>>, %arg4: memref<1x128xf32, #tpu.memory_space<vmem>>, %arg5: memref<1x128xf32, #tpu.memory_space<vmem>>, %arg6: memref<32x128xbf16, #tpu.memory_space<vmem>>) attributes {dimension_semantics = [#tpu.dimension_semantics<parallel>, #tpu.dimension_semantics<arbitrary>], iteration_bounds = array<i64: 1, 1>, scalar_prefetch = 0 : i64, scratch_operands = 0 : i64, tpu.core_type = #tpu.core_type<tc>, window_params = [{transform_indices = @transform_0, window_bounds = array<i64: 32, 128>}, {transform_indices = @transform_1, window_bounds = array<i64: 128, 128>}, {transform_indices = @transform_2, window_bounds = array<i64: 1, 128>}, {transform_indices = @transform_3, window_bounds = array<i64: 1, 128>}, {transform_indices = @transform_4, window_bounds = array<i64: 32, 128>}]} {
    %c0 = arith.constant 0 : index
    %c0_0 = arith.constant 0 : index
    %0 = vector.load %arg2[%c0, %c0_0] : memref<32x128xbf16, #tpu.memory_space<vmem>>, vector<32x128xbf16>
    %c0_1 = arith.constant 0 : index
    %c0_2 = arith.constant 0 : index
    %1 = vector.load %arg3[%c0_1, %c0_2] : memref<128x128xbf16, #tpu.memory_space<vmem>>, vector<128x128xbf16>
    %cst = arith.constant dense<0.000000e+00> : vector<32x128xf32>
    %2 = tpu.matmul %0, %1, %cst {dimension_numbers = #tpu.dot_dimension_numbers<[1], [0], [0], [1], [0, 0, 1, 1], [], []>} : vector<32x128xbf16>, vector<128x128xbf16>, vector<32x128xf32> -> vector<32x128xf32>
    %cst_3 = arith.constant dense<0.000000e+00> : vector<128xf32>
    %3 = vector.multi_reduction <add>, %2, %cst_3 [0] : vector<32x128xf32> to vector<128xf32>
    %4 = vector.shape_cast %3 : vector<128xf32> to vector<1x128xf32>
    %cst_4 = arith.constant 3.200000e+01 : f32
    %5 = vector.broadcast %cst_4 : f32 to vector<1x128xf32>
    %6 = arith.divf %4, %5 : vector<1x128xf32>
    %7 = arith.mulf %2, %2 : vector<32x128xf32>
    %cst_5 = arith.constant dense<0.000000e+00> : vector<128xf32>
    %8 = vector.multi_reduction <add>, %7, %cst_5 [0] : vector<32x128xf32> to vector<128xf32>
    %9 = vector.shape_cast %8 : vector<128xf32> to vector<1x128xf32>
    %cst_6 = arith.constant 3.200000e+01 : f32
    %10 = vector.broadcast %cst_6 : f32 to vector<1x128xf32>
    %11 = arith.divf %9, %10 : vector<1x128xf32>
    %12 = arith.mulf %6, %6 : vector<1x128xf32>
    %13 = arith.subf %11, %12 : vector<1x128xf32>
    %cst_7 = arith.constant 0.000000e+00 : f32
    %14 = vector.broadcast %cst_7 : f32 to vector<1x128xf32>
    %15 = arith.maximumf %13, %14 : vector<1x128xf32>
    %16 = vector.broadcast %6 : vector<1x128xf32> to vector<32x128xf32>
    %17 = arith.subf %2, %16 : vector<32x128xf32>
    %cst_8 = arith.constant 9.99999974E-6 : f32
    %18 = vector.broadcast %cst_8 : f32 to vector<1x128xf32>
    %19 = arith.addf %15, %18 : vector<1x128xf32>
    %20 = math.rsqrt %19 : vector<1x128xf32>
    %21 = vector.broadcast %20 : vector<1x128xf32> to vector<32x128xf32>
    %22 = arith.mulf %17, %21 : vector<32x128xf32>
    %c0_9 = arith.constant 0 : index
    %c0_10 = arith.constant 0 : index
    %23 = vector.load %arg4[%c0_9, %c0_10] : memref<1x128xf32, #tpu.memory_space<vmem>>, vector<1x128xf32>
    %24 = vector.broadcast %23 : vector<1x128xf32> to vector<32x128xf32>
    %25 = arith.mulf %22, %24 : vector<32x128xf32>
    %c0_11 = arith.constant 0 : index
    %c0_12 = arith.constant 0 : index
    %26 = vector.load %arg5[%c0_11, %c0_12] : memref<1x128xf32, #tpu.memory_space<vmem>>, vector<1x128xf32>
    %27 = vector.broadcast %26 : vector<1x128xf32> to vector<32x128xf32>
    %28 = arith.addf %25, %27 : vector<32x128xf32>
    %cst_13 = arith.constant 0.000000e+00 : f32
    %29 = vector.broadcast %cst_13 : f32 to vector<32x128xf32>
    %30 = arith.cmpf oge, %28, %29 : vector<32x128xf32>
    %cst_14 = arith.constant 0.00999999977 : f32
    %31 = vector.broadcast %cst_14 : f32 to vector<32x128xf32>
    %32 = arith.mulf %31, %28 : vector<32x128xf32>
    %33 = arith.select %30, %28, %32 : vector<32x128xi1>, vector<32x128xf32>
    %34 = arith.truncf %33 : vector<32x128xf32> to vector<32x128xbf16>
    %c0_15 = arith.constant 0 : index
    %c0_16 = arith.constant 0 : index
    %35 = vector.load %arg6[%c0_15, %c0_16] : memref<32x128xbf16, #tpu.memory_space<vmem>>, vector<32x128xbf16>
    tpu.vector_store %arg6[%c0_15, %c0_16], %34 {strides = array<i32>} : memref<32x128xbf16, #tpu.memory_space<vmem>>, vector<32x128xbf16>,
    return
  }
  func.func @transform_0(%arg0: i32, %arg1: i32) -> (i32, i32) {
    %c0_i32 = arith.constant 0 : i32
    %c0_i32_0 = arith.constant 0 : i32
    return %c0_i32, %arg1 : i32, i32
  }
  func.func @transform_1(%arg0: i32, %arg1: i32) -> (i32, i32) {
    %c0_i32 = arith.constant 0 : i32
    return %arg1, %arg0 : i32, i32
  }
  func.func @transform_2(%arg0: i32, %arg1: i32) -> (i32, i32) {
    %c0_i32 = arith.constant 0 : i32
    %c0_i32_0 = arith.constant 0 : i32
    return %c0_i32, %arg0 : i32, i32
  }
  func.func @transform_3(%arg0: i32, %arg1: i32) -> (i32, i32) {
    %c0_i32 = arith.constant 0 : i32
    %c0_i32_0 = arith.constant 0 : i32
    return %c0_i32, %arg0 : i32, i32
  }
  func.func @transform_4(%arg0: i32, %arg1: i32) -> (i32, i32) {
    %c0_i32 = arith.constant 0 : i32
    %c0_i32_0 = arith.constant 0 : i32
    return %c0_i32, %arg0 : i32, i32
  }
}

module attributes {stable_mosaic.version = 11 : i64} {
  func.func @_fused_linear_kernel(%arg0: i32, %arg1: i32, %arg2: memref<32x128xbf16, #tpu.memory_space<vmem>>, %arg3: memref<128x128xbf16, #tpu.memory_space<vmem>>, %arg4: memref<1x128xf32, #tpu.memory_space<vmem>>, %arg5: memref<1x128xf32, #tpu.memory_space<vmem>>, %arg6: memref<32x128xbf16, #tpu.memory_space<vmem>>) attributes {dimension_semantics = [#tpu.dimension_semantics<parallel>, #tpu.dimension_semantics<arbitrary>], iteration_bounds = array<i64: 1, 1>, scalar_prefetch = 0 : i64, scratch_operands = 0 : i64, tpu.core_type = #tpu.core_type<tc>, window_params = [{transform_indices = @transform_0, window_bounds = array<i64: 32, 128>}, {transform_indices = @transform_1, window_bounds = array<i64: 128, 128>}, {transform_indices = @transform_2, window_bounds = array<i64: 1, 128>}, {transform_indices = @transform_3, window_bounds = array<i64: 1, 128>}, {transform_indices = @transform_4, window_bounds = array<i64: 32, 128>}]} {
    %c0 = arith.constant 0 : index
    %c0_0 = arith.constant 0 : index
    %0 = vector.load %arg2[%c0, %c0_0] : memref<32x128xbf16, #tpu.memory_space<vmem>>, vector<32x128xbf16>
    %c0_1 = arith.constant 0 : index
    %c0_2 = arith.constant 0 : index
    %1 = vector.load %arg3[%c0_1, %c0_2] : memref<128x128xbf16, #tpu.memory_space<vmem>>, vector<128x128xbf16>
    %cst = arith.constant dense<0.000000e+00> : vector<32x128xf32>
    %2 = tpu.matmul %0, %1, %cst {dimension_numbers = #tpu.dot_dimension_numbers<[1], [0], [0], [1], [0, 0, 1, 1], [], []>} : vector<32x128xbf16>, vector<128x128xbf16>, vector<32x128xf32> -> vector<32x128xf32>
    %cst_3 = arith.constant dense<0.000000e+00> : vector<128xf32>
    %3 = vector.multi_reduction <add>, %2, %cst_3 [0] : vector<32x128xf32> to vector<128xf32>
    %4 = vector.shape_cast %3 : vector<128xf32> to vector<1x128xf32>
    %cst_4 = arith.constant 3.200000e+01 : f32
    %5 = vector.broadcast %cst_4 : f32 to vector<1x128xf32>
    %6 = arith.divf %4, %5 : vector<1x128xf32>
    %7 = arith.mulf %2, %2 : vector<32x128xf32>
    %cst_5 = arith.constant dense<0.000000e+00> : vector<128xf32>
    %8 = vector.multi_reduction <add>, %7, %cst_5 [0] : vector<32x128xf32> to vector<128xf32>
    %9 = vector.shape_cast %8 : vector<128xf32> to vector<1x128xf32>
    %cst_6 = arith.constant 3.200000e+01 : f32
    %10 = vector.broadcast %cst_6 : f32 to vector<1x128xf32>
    %11 = arith.divf %9, %10 : vector<1x128xf32>
    %12 = arith.mulf %6, %6 : vector<1x128xf32>
    %13 = arith.subf %11, %12 : vector<1x128xf32>
    %cst_7 = arith.constant 0.000000e+00 : f32
    %14 = vector.broadcast %cst_7 : f32 to vector<1x128xf32>
    %15 = arith.maximumf %13, %14 : vector<1x128xf32>
    %16 = vector.broadcast %6 : vector<1x128xf32> to vector<32x128xf32>
    %17 = arith.subf %2, %16 : vector<32x128xf32>
    %cst_8 = arith.constant 9.99999974E-6 : f32
    %18 = vector.broadcast %cst_8 : f32 to vector<1x128xf32>
    %19 = arith.addf %15, %18 : vector<1x128xf32>
    %20 = math.rsqrt %19 : vector<1x128xf32>
    %21 = vector.broadcast %20 : vector<1x128xf32> to vector<32x128xf32>
    %22 = arith.mulf %17, %21 : vector<32x128xf32>
    %c0_9 = arith.constant 0 : index
    %c0_10 = arith.constant 0 : index
    %23 = vector.load %arg4[%c0_9, %c0_10] : memref<1x128xf32, #tpu.memory_space<vmem>>, vector<1x128xf32>
    %24 = vector.broadcast %23 : vector<1x128xf32> to vector<32x128xf32>
    %25 = arith.mulf %22, %24 : vector<32x128xf32>
    %c0_11 = arith.constant 0 : index
    %c0_12 = arith.constant 0 : index
    %26 = vector.load %arg5[%c0_11, %c0_12] : memref<1x128xf32, #tpu.memory_space<vmem>>, vector<1x128xf32>
    %27 = vector.broadcast %26 : vector<1x128xf32> to vector<32x128xf32>
    %28 = arith.addf %25, %27 : vector<32x128xf32>
    %29 = arith.truncf %28 : vector<32x128xf32> to vector<32x128xbf16>
    %c0_13 = arith.constant 0 : index
    %c0_14 = arith.constant 0 : index
    %30 = vector.load %arg6[%c0_13, %c0_14] : memref<32x128xbf16, #tpu.memory_space<vmem>>, vector<32x128xbf16>
    tpu.vector_store %arg6[%c0_13, %c0_14], %29 {strides = array<i32>} : memref<32x128xbf16, #tpu.memory_space<vmem>>, vector<32x128xbf16>,
    return
  }
  func.func @transform_0(%arg0: i32, %arg1: i32) -> (i32, i32) {
    %c0_i32 = arith.constant 0 : i32
    %c0_i32_0 = arith.constant 0 : i32
    return %c0_i32, %arg1 : i32, i32
  }
  func.func @transform_1(%arg0: i32, %arg1: i32) -> (i32, i32) {
    %c0_i32 = arith.constant 0 : i32
    return %arg1, %arg0 : i32, i32
  }
  func.func @transform_2(%arg0: i32, %arg1: i32) -> (i32, i32) {
    %c0_i32 = arith.constant 0 : i32
    %c0_i32_0 = arith.constant 0 : i32
    return %c0_i32, %arg0 : i32, i32
  }
  func.func @transform_3(%arg0: i32, %arg1: i32) -> (i32, i32) {
    %c0_i32 = arith.constant 0 : i32
    %c0_i32_0 = arith.constant 0 : i32
    return %c0_i32, %arg0 : i32, i32
  }
  func.func @transform_4(%arg0: i32, %arg1: i32) -> (i32, i32) {
    %c0_i32 = arith.constant 0 : i32
    %c0_i32_0 = arith.constant 0 : i32
    return %c0_i32, %arg0 : i32, i32
  }
}

module attributes {stable_mosaic.version = 11 : i64} {
  func.func @_fused_linear_kernel(%arg0: i32, %arg1: i32, %arg2: memref<32x256xbf16, #tpu.memory_space<vmem>>, %arg3: memref<256x128xbf16, #tpu.memory_space<vmem>>, %arg4: memref<1x128xf32, #tpu.memory_space<vmem>>, %arg5: memref<1x128xf32, #tpu.memory_space<vmem>>, %arg6: memref<32x128xbf16, #tpu.memory_space<vmem>>, %arg7: memref<32x128xbf16, #tpu.memory_space<vmem>>) attributes {dimension_semantics = [#tpu.dimension_semantics<parallel>, #tpu.dimension_semantics<arbitrary>], iteration_bounds = array<i64: 1, 1>, scalar_prefetch = 0 : i64, scratch_operands = 0 : i64, tpu.core_type = #tpu.core_type<tc>, window_params = [{transform_indices = @transform_0, window_bounds = array<i64: 32, 256>}, {transform_indices = @transform_1, window_bounds = array<i64: 256, 128>}, {transform_indices = @transform_2, window_bounds = array<i64: 1, 128>}, {transform_indices = @transform_3, window_bounds = array<i64: 1, 128>}, {transform_indices = @transform_4, window_bounds = array<i64: 32, 128>}, {transform_indices = @transform_5, window_bounds = array<i64: 32, 128>}]} {
    %c0 = arith.constant 0 : index
    %c0_0 = arith.constant 0 : index
    %0 = vector.load %arg2[%c0, %c0_0] : memref<32x256xbf16, #tpu.memory_space<vmem>>, vector<32x256xbf16>
    %c0_1 = arith.constant 0 : index
    %c0_2 = arith.constant 0 : index
    %1 = vector.load %arg3[%c0_1, %c0_2] : memref<256x128xbf16, #tpu.memory_space<vmem>>, vector<256x128xbf16>
    %cst = arith.constant dense<0.000000e+00> : vector<32x128xf32>
    %2 = tpu.matmul %0, %1, %cst {dimension_numbers = #tpu.dot_dimension_numbers<[1], [0], [0], [1], [0, 0, 1, 1], [], []>} : vector<32x256xbf16>, vector<256x128xbf16>, vector<32x128xf32> -> vector<32x128xf32>
    %cst_3 = arith.constant dense<0.000000e+00> : vector<128xf32>
    %3 = vector.multi_reduction <add>, %2, %cst_3 [0] : vector<32x128xf32> to vector<128xf32>
    %4 = vector.shape_cast %3 : vector<128xf32> to vector<1x128xf32>
    %cst_4 = arith.constant 3.200000e+01 : f32
    %5 = vector.broadcast %cst_4 : f32 to vector<1x128xf32>
    %6 = arith.divf %4, %5 : vector<1x128xf32>
    %7 = arith.mulf %2, %2 : vector<32x128xf32>
    %cst_5 = arith.constant dense<0.000000e+00> : vector<128xf32>
    %8 = vector.multi_reduction <add>, %7, %cst_5 [0] : vector<32x128xf32> to vector<128xf32>
    %9 = vector.shape_cast %8 : vector<128xf32> to vector<1x128xf32>
    %cst_6 = arith.constant 3.200000e+01 : f32
    %10 = vector.broadcast %cst_6 : f32 to vector<1x128xf32>
    %11 = arith.divf %9, %10 : vector<1x128xf32>
    %12 = arith.mulf %6, %6 : vector<1x128xf32>
    %13 = arith.subf %11, %12 : vector<1x128xf32>
    %cst_7 = arith.constant 0.000000e+00 : f32
    %14 = vector.broadcast %cst_7 : f32 to vector<1x128xf32>
    %15 = arith.maximumf %13, %14 : vector<1x128xf32>
    %16 = vector.broadcast %6 : vector<1x128xf32> to vector<32x128xf32>
    %17 = arith.subf %2, %16 : vector<32x128xf32>
    %cst_8 = arith.constant 9.99999974E-6 : f32
    %18 = vector.broadcast %cst_8 : f32 to vector<1x128xf32>
    %19 = arith.addf %15, %18 : vector<1x128xf32>
    %20 = math.rsqrt %19 : vector<1x128xf32>
    %21 = vector.broadcast %20 : vector<1x128xf32> to vector<32x128xf32>
    %22 = arith.mulf %17, %21 : vector<32x128xf32>
    %c0_9 = arith.constant 0 : index
    %c0_10 = arith.constant 0 : index
    %23 = vector.load %arg4[%c0_9, %c0_10] : memref<1x128xf32, #tpu.memory_space<vmem>>, vector<1x128xf32>
    %24 = vector.broadcast %23 : vector<1x128xf32> to vector<32x128xf32>
    %25 = arith.mulf %22, %24 : vector<32x128xf32>
    %c0_11 = arith.constant 0 : index
    %c0_12 = arith.constant 0 : index
    %26 = vector.load %arg5[%c0_11, %c0_12] : memref<1x128xf32, #tpu.memory_space<vmem>>, vector<1x128xf32>
    %27 = vector.broadcast %26 : vector<1x128xf32> to vector<32x128xf32>
    %28 = arith.addf %25, %27 : vector<32x128xf32>
    %c0_13 = arith.constant 0 : index
    %c0_14 = arith.constant 0 : index
    %29 = vector.load %arg6[%c0_13, %c0_14] : memref<32x128xbf16, #tpu.memory_space<vmem>>, vector<32x128xbf16>
    %30 = arith.extf %29 : vector<32x128xbf16> to vector<32x128xf32>
    %31 = arith.addf %28, %30 : vector<32x128xf32>
    %cst_15 = arith.constant 0.000000e+00 : f32
    %32 = vector.broadcast %cst_15 : f32 to vector<32x128xf32>
    %33 = arith.cmpf oge, %31, %32 : vector<32x128xf32>
    %cst_16 = arith.constant 0.00999999977 : f32
    %34 = vector.broadcast %cst_16 : f32 to vector<32x128xf32>
    %35 = arith.mulf %34, %31 : vector<32x128xf32>
    %36 = arith.select %33, %31, %35 : vector<32x128xi1>, vector<32x128xf32>
    %37 = arith.truncf %36 : vector<32x128xf32> to vector<32x128xbf16>
    %c0_17 = arith.constant 0 : index
    %c0_18 = arith.constant 0 : index
    %38 = vector.load %arg7[%c0_17, %c0_18] : memref<32x128xbf16, #tpu.memory_space<vmem>>, vector<32x128xbf16>
    tpu.vector_store %arg7[%c0_17, %c0_18], %37 {strides = array<i32>} : memref<32x128xbf16, #tpu.memory_space<vmem>>, vector<32x128xbf16>,
    return
  }
  func.func @transform_0(%arg0: i32, %arg1: i32) -> (i32, i32) {
    %c0_i32 = arith.constant 0 : i32
    %c0_i32_0 = arith.constant 0 : i32
    return %c0_i32, %arg1 : i32, i32
  }
  func.func @transform_1(%arg0: i32, %arg1: i32) -> (i32, i32) {
    %c0_i32 = arith.constant 0 : i32
    return %arg1, %arg0 : i32, i32
  }
  func.func @transform_2(%arg0: i32, %arg1: i32) -> (i32, i32) {
    %c0_i32 = arith.constant 0 : i32
    %c0_i32_0 = arith.constant 0 : i32
    return %c0_i32, %arg0 : i32, i32
  }
  func.func @transform_3(%arg0: i32, %arg1: i32) -> (i32, i32) {
    %c0_i32 = arith.constant 0 : i32
    %c0_i32_0 = arith.constant 0 : i32
    return %c0_i32, %arg0 : i32, i32
  }
  func.func @transform_4(%arg0: i32, %arg1: i32) -> (i32, i32) {
    %c0_i32 = arith.constant 0 : i32
    %c0_i32_0 = arith.constant 0 : i32
    return %c0_i32, %arg0 : i32, i32
  }
  func.func @transform_5(%arg0: i32, %arg1: i32) -> (i32, i32) {
    %c0_i32 = arith.constant 0 : i32
    %c0_i32_0 = arith.constant 0 : i32
    return %c0_i32, %arg0 : i32, i32
  }
}

module attributes {stable_mosaic.version = 11 : i64} {
  func.func @_fused_linear_kernel(%arg0: i32, %arg1: i32, %arg2: memref<32x256xbf16, #tpu.memory_space<vmem>>, %arg3: memref<256x128xbf16, #tpu.memory_space<vmem>>, %arg4: memref<1x128xf32, #tpu.memory_space<vmem>>, %arg5: memref<1x128xf32, #tpu.memory_space<vmem>>, %arg6: memref<32x128xbf16, #tpu.memory_space<vmem>>) attributes {dimension_semantics = [#tpu.dimension_semantics<parallel>, #tpu.dimension_semantics<arbitrary>], iteration_bounds = array<i64: 1, 1>, scalar_prefetch = 0 : i64, scratch_operands = 0 : i64, tpu.core_type = #tpu.core_type<tc>, window_params = [{transform_indices = @transform_0, window_bounds = array<i64: 32, 256>}, {transform_indices = @transform_1, window_bounds = array<i64: 256, 128>}, {transform_indices = @transform_2, window_bounds = array<i64: 1, 128>}, {transform_indices = @transform_3, window_bounds = array<i64: 1, 128>}, {transform_indices = @transform_4, window_bounds = array<i64: 32, 128>}]} {
    %c0 = arith.constant 0 : index
    %c0_0 = arith.constant 0 : index
    %0 = vector.load %arg2[%c0, %c0_0] : memref<32x256xbf16, #tpu.memory_space<vmem>>, vector<32x256xbf16>
    %c0_1 = arith.constant 0 : index
    %c0_2 = arith.constant 0 : index
    %1 = vector.load %arg3[%c0_1, %c0_2] : memref<256x128xbf16, #tpu.memory_space<vmem>>, vector<256x128xbf16>
    %cst = arith.constant dense<0.000000e+00> : vector<32x128xf32>
    %2 = tpu.matmul %0, %1, %cst {dimension_numbers = #tpu.dot_dimension_numbers<[1], [0], [0], [1], [0, 0, 1, 1], [], []>} : vector<32x256xbf16>, vector<256x128xbf16>, vector<32x128xf32> -> vector<32x128xf32>
    %cst_3 = arith.constant dense<0.000000e+00> : vector<128xf32>
    %3 = vector.multi_reduction <add>, %2, %cst_3 [0] : vector<32x128xf32> to vector<128xf32>
    %4 = vector.shape_cast %3 : vector<128xf32> to vector<1x128xf32>
    %cst_4 = arith.constant 3.200000e+01 : f32
    %5 = vector.broadcast %cst_4 : f32 to vector<1x128xf32>
    %6 = arith.divf %4, %5 : vector<1x128xf32>
    %7 = arith.mulf %2, %2 : vector<32x128xf32>
    %cst_5 = arith.constant dense<0.000000e+00> : vector<128xf32>
    %8 = vector.multi_reduction <add>, %7, %cst_5 [0] : vector<32x128xf32> to vector<128xf32>
    %9 = vector.shape_cast %8 : vector<128xf32> to vector<1x128xf32>
    %cst_6 = arith.constant 3.200000e+01 : f32
    %10 = vector.broadcast %cst_6 : f32 to vector<1x128xf32>
    %11 = arith.divf %9, %10 : vector<1x128xf32>
    %12 = arith.mulf %6, %6 : vector<1x128xf32>
    %13 = arith.subf %11, %12 : vector<1x128xf32>
    %cst_7 = arith.constant 0.000000e+00 : f32
    %14 = vector.broadcast %cst_7 : f32 to vector<1x128xf32>
    %15 = arith.maximumf %13, %14 : vector<1x128xf32>
    %16 = vector.broadcast %6 : vector<1x128xf32> to vector<32x128xf32>
    %17 = arith.subf %2, %16 : vector<32x128xf32>
    %cst_8 = arith.constant 9.99999974E-6 : f32
    %18 = vector.broadcast %cst_8 : f32 to vector<1x128xf32>
    %19 = arith.addf %15, %18 : vector<1x128xf32>
    %20 = math.rsqrt %19 : vector<1x128xf32>
    %21 = vector.broadcast %20 : vector<1x128xf32> to vector<32x128xf32>
    %22 = arith.mulf %17, %21 : vector<32x128xf32>
    %c0_9 = arith.constant 0 : index
    %c0_10 = arith.constant 0 : index
    %23 = vector.load %arg4[%c0_9, %c0_10] : memref<1x128xf32, #tpu.memory_space<vmem>>, vector<1x128xf32>
    %24 = vector.broadcast %23 : vector<1x128xf32> to vector<32x128xf32>
    %25 = arith.mulf %22, %24 : vector<32x128xf32>
    %c0_11 = arith.constant 0 : index
    %c0_12 = arith.constant 0 : index
    %26 = vector.load %arg5[%c0_11, %c0_12] : memref<1x128xf32, #tpu.memory_space<vmem>>, vector<1x128xf32>
    %27 = vector.broadcast %26 : vector<1x128xf32> to vector<32x128xf32>
    %28 = arith.addf %25, %27 : vector<32x128xf32>
    %cst_13 = arith.constant 0.000000e+00 : f32
    %29 = vector.broadcast %cst_13 : f32 to vector<32x128xf32>
    %30 = arith.cmpf oge, %28, %29 : vector<32x128xf32>
    %cst_14 = arith.constant 0.00999999977 : f32
    %31 = vector.broadcast %cst_14 : f32 to vector<32x128xf32>
    %32 = arith.mulf %31, %28 : vector<32x128xf32>
    %33 = arith.select %30, %28, %32 : vector<32x128xi1>, vector<32x128xf32>
    %34 = arith.truncf %33 : vector<32x128xf32> to vector<32x128xbf16>
    %c0_15 = arith.constant 0 : index
    %c0_16 = arith.constant 0 : index
    %35 = vector.load %arg6[%c0_15, %c0_16] : memref<32x128xbf16, #tpu.memory_space<vmem>>, vector<32x128xbf16>
    tpu.vector_store %arg6[%c0_15, %c0_16], %34 {strides = array<i32>} : memref<32x128xbf16, #tpu.memory_space<vmem>>, vector<32x128xbf16>,
    return
  }
  func.func @transform_0(%arg0: i32, %arg1: i32) -> (i32, i32) {
    %c0_i32 = arith.constant 0 : i32
    %c0_i32_0 = arith.constant 0 : i32
    return %c0_i32, %arg1 : i32, i32
  }
  func.func @transform_1(%arg0: i32, %arg1: i32) -> (i32, i32) {
    %c0_i32 = arith.constant 0 : i32
    return %arg1, %arg0 : i32, i32
  }
  func.func @transform_2(%arg0: i32, %arg1: i32) -> (i32, i32) {
    %c0_i32 = arith.constant 0 : i32
    %c0_i32_0 = arith.constant 0 : i32
    return %c0_i32, %arg0 : i32, i32
  }
  func.func @transform_3(%arg0: i32, %arg1: i32) -> (i32, i32) {
    %c0_i32 = arith.constant 0 : i32
    %c0_i32_0 = arith.constant 0 : i32
    return %c0_i32, %arg0 : i32, i32
  }
  func.func @transform_4(%arg0: i32, %arg1: i32) -> (i32, i32) {
    %c0_i32 = arith.constant 0 : i32
    %c0_i32_0 = arith.constant 0 : i32
    return %c0_i32, %arg0 : i32, i32
  }
}

module attributes {stable_mosaic.version = 11 : i64} {
  func.func @_fused_linear_kernel(%arg0: i32, %arg1: i32, %arg2: memref<8x256xbf16, #tpu.memory_space<vmem>>, %arg3: memref<256x128xbf16, #tpu.memory_space<vmem>>, %arg4: memref<1x128xf32, #tpu.memory_space<vmem>>, %arg5: memref<1x128xf32, #tpu.memory_space<vmem>>, %arg6: memref<8x128xbf16, #tpu.memory_space<vmem>>) attributes {dimension_semantics = [#tpu.dimension_semantics<parallel>, #tpu.dimension_semantics<arbitrary>], iteration_bounds = array<i64: 1, 1>, scalar_prefetch = 0 : i64, scratch_operands = 0 : i64, tpu.core_type = #tpu.core_type<tc>, window_params = [{transform_indices = @transform_0, window_bounds = array<i64: 8, 256>}, {transform_indices = @transform_1, window_bounds = array<i64: 256, 128>}, {transform_indices = @transform_2, window_bounds = array<i64: 1, 128>}, {transform_indices = @transform_3, window_bounds = array<i64: 1, 128>}, {transform_indices = @transform_4, window_bounds = array<i64: 8, 128>}]} {
    %c0 = arith.constant 0 : index
    %c0_0 = arith.constant 0 : index
    %0 = vector.load %arg2[%c0, %c0_0] : memref<8x256xbf16, #tpu.memory_space<vmem>>, vector<8x256xbf16>
    %c0_1 = arith.constant 0 : index
    %c0_2 = arith.constant 0 : index
    %1 = vector.load %arg3[%c0_1, %c0_2] : memref<256x128xbf16, #tpu.memory_space<vmem>>, vector<256x128xbf16>
    %cst = arith.constant dense<0.000000e+00> : vector<8x128xf32>
    %2 = tpu.matmul %0, %1, %cst {dimension_numbers = #tpu.dot_dimension_numbers<[1], [0], [0], [1], [0, 0, 1, 1], [], []>} : vector<8x256xbf16>, vector<256x128xbf16>, vector<8x128xf32> -> vector<8x128xf32>
    %cst_3 = arith.constant dense<0.000000e+00> : vector<128xf32>
    %3 = vector.multi_reduction <add>, %2, %cst_3 [0] : vector<8x128xf32> to vector<128xf32>
    %4 = vector.shape_cast %3 : vector<128xf32> to vector<1x128xf32>
    %cst_4 = arith.constant 8.000000e+00 : f32
    %5 = vector.broadcast %cst_4 : f32 to vector<1x128xf32>
    %6 = arith.divf %4, %5 : vector<1x128xf32>
    %7 = arith.mulf %2, %2 : vector<8x128xf32>
    %cst_5 = arith.constant dense<0.000000e+00> : vector<128xf32>
    %8 = vector.multi_reduction <add>, %7, %cst_5 [0] : vector<8x128xf32> to vector<128xf32>
    %9 = vector.shape_cast %8 : vector<128xf32> to vector<1x128xf32>
    %cst_6 = arith.constant 8.000000e+00 : f32
    %10 = vector.broadcast %cst_6 : f32 to vector<1x128xf32>
    %11 = arith.divf %9, %10 : vector<1x128xf32>
    %12 = arith.mulf %6, %6 : vector<1x128xf32>
    %13 = arith.subf %11, %12 : vector<1x128xf32>
    %cst_7 = arith.constant 0.000000e+00 : f32
    %14 = vector.broadcast %cst_7 : f32 to vector<1x128xf32>
    %15 = arith.maximumf %13, %14 : vector<1x128xf32>
    %16 = vector.broadcast %6 : vector<1x128xf32> to vector<8x128xf32>
    %17 = arith.subf %2, %16 : vector<8x128xf32>
    %cst_8 = arith.constant 9.99999974E-6 : f32
    %18 = vector.broadcast %cst_8 : f32 to vector<1x128xf32>
    %19 = arith.addf %15, %18 : vector<1x128xf32>
    %20 = math.rsqrt %19 : vector<1x128xf32>
    %21 = vector.broadcast %20 : vector<1x128xf32> to vector<8x128xf32>
    %22 = arith.mulf %17, %21 : vector<8x128xf32>
    %c0_9 = arith.constant 0 : index
    %c0_10 = arith.constant 0 : index
    %23 = vector.load %arg4[%c0_9, %c0_10] : memref<1x128xf32, #tpu.memory_space<vmem>>, vector<1x128xf32>
    %24 = vector.broadcast %23 : vector<1x128xf32> to vector<8x128xf32>
    %25 = arith.mulf %22, %24 : vector<8x128xf32>
    %c0_11 = arith.constant 0 : index
    %c0_12 = arith.constant 0 : index
    %26 = vector.load %arg5[%c0_11, %c0_12] : memref<1x128xf32, #tpu.memory_space<vmem>>, vector<1x128xf32>
    %27 = vector.broadcast %26 : vector<1x128xf32> to vector<8x128xf32>
    %28 = arith.addf %25, %27 : vector<8x128xf32>
    %cst_13 = arith.constant 0.000000e+00 : f32
    %29 = vector.broadcast %cst_13 : f32 to vector<8x128xf32>
    %30 = arith.cmpf oge, %28, %29 : vector<8x128xf32>
    %cst_14 = arith.constant 0.00999999977 : f32
    %31 = vector.broadcast %cst_14 : f32 to vector<8x128xf32>
    %32 = arith.mulf %31, %28 : vector<8x128xf32>
    %33 = arith.select %30, %28, %32 : vector<8x128xi1>, vector<8x128xf32>
    %34 = arith.truncf %33 : vector<8x128xf32> to vector<8x128xbf16>
    %c0_15 = arith.constant 0 : index
    %c0_16 = arith.constant 0 : index
    %35 = vector.load %arg6[%c0_15, %c0_16] : memref<8x128xbf16, #tpu.memory_space<vmem>>, vector<8x128xbf16>
    tpu.vector_store %arg6[%c0_15, %c0_16], %34 {strides = array<i32>} : memref<8x128xbf16, #tpu.memory_space<vmem>>, vector<8x128xbf16>,
    return
  }
  func.func @transform_0(%arg0: i32, %arg1: i32) -> (i32, i32) {
    %c0_i32 = arith.constant 0 : i32
    %c0_i32_0 = arith.constant 0 : i32
    return %c0_i32, %arg1 : i32, i32
  }
  func.func @transform_1(%arg0: i32, %arg1: i32) -> (i32, i32) {
    %c0_i32 = arith.constant 0 : i32
    return %arg1, %arg0 : i32, i32
  }
  func.func @transform_2(%arg0: i32, %arg1: i32) -> (i32, i32) {
    %c0_i32 = arith.constant 0 : i32
    %c0_i32_0 = arith.constant 0 : i32
    return %c0_i32, %arg0 : i32, i32
  }
  func.func @transform_3(%arg0: i32, %arg1: i32) -> (i32, i32) {
    %c0_i32 = arith.constant 0 : i32
    %c0_i32_0 = arith.constant 0 : i32
    return %c0_i32, %arg0 : i32, i32
  }
  func.func @transform_4(%arg0: i32, %arg1: i32) -> (i32, i32) {
    %c0_i32 = arith.constant 0 : i32
    %c0_i32_0 = arith.constant 0 : i32
    return %c0_i32, %arg0 : i32, i32
  }
}

module attributes {stable_mosaic.version = 11 : i64} {
  func.func @_fused_linear_kernel(%arg0: i32, %arg1: i32, %arg2: memref<8x384xbf16, #tpu.memory_space<vmem>>, %arg3: memref<384x128xbf16, #tpu.memory_space<vmem>>, %arg4: memref<1x128xf32, #tpu.memory_space<vmem>>, %arg5: memref<1x128xf32, #tpu.memory_space<vmem>>, %arg6: memref<8x128xbf16, #tpu.memory_space<vmem>>, %arg7: memref<8x128xbf16, #tpu.memory_space<vmem>>) attributes {dimension_semantics = [#tpu.dimension_semantics<parallel>, #tpu.dimension_semantics<arbitrary>], iteration_bounds = array<i64: 1, 1>, scalar_prefetch = 0 : i64, scratch_operands = 0 : i64, tpu.core_type = #tpu.core_type<tc>, window_params = [{transform_indices = @transform_0, window_bounds = array<i64: 8, 384>}, {transform_indices = @transform_1, window_bounds = array<i64: 384, 128>}, {transform_indices = @transform_2, window_bounds = array<i64: 1, 128>}, {transform_indices = @transform_3, window_bounds = array<i64: 1, 128>}, {transform_indices = @transform_4, window_bounds = array<i64: 8, 128>}, {transform_indices = @transform_5, window_bounds = array<i64: 8, 128>}]} {
    %c0 = arith.constant 0 : index
    %c0_0 = arith.constant 0 : index
    %0 = vector.load %arg2[%c0, %c0_0] : memref<8x384xbf16, #tpu.memory_space<vmem>>, vector<8x384xbf16>
    %c0_1 = arith.constant 0 : index
    %c0_2 = arith.constant 0 : index
    %1 = vector.load %arg3[%c0_1, %c0_2] : memref<384x128xbf16, #tpu.memory_space<vmem>>, vector<384x128xbf16>
    %cst = arith.constant dense<0.000000e+00> : vector<8x128xf32>
    %2 = tpu.matmul %0, %1, %cst {dimension_numbers = #tpu.dot_dimension_numbers<[1], [0], [0], [1], [0, 0, 1, 1], [], []>} : vector<8x384xbf16>, vector<384x128xbf16>, vector<8x128xf32> -> vector<8x128xf32>
    %cst_3 = arith.constant dense<0.000000e+00> : vector<128xf32>
    %3 = vector.multi_reduction <add>, %2, %cst_3 [0] : vector<8x128xf32> to vector<128xf32>
    %4 = vector.shape_cast %3 : vector<128xf32> to vector<1x128xf32>
    %cst_4 = arith.constant 8.000000e+00 : f32
    %5 = vector.broadcast %cst_4 : f32 to vector<1x128xf32>
    %6 = arith.divf %4, %5 : vector<1x128xf32>
    %7 = arith.mulf %2, %2 : vector<8x128xf32>
    %cst_5 = arith.constant dense<0.000000e+00> : vector<128xf32>
    %8 = vector.multi_reduction <add>, %7, %cst_5 [0] : vector<8x128xf32> to vector<128xf32>
    %9 = vector.shape_cast %8 : vector<128xf32> to vector<1x128xf32>
    %cst_6 = arith.constant 8.000000e+00 : f32
    %10 = vector.broadcast %cst_6 : f32 to vector<1x128xf32>
    %11 = arith.divf %9, %10 : vector<1x128xf32>
    %12 = arith.mulf %6, %6 : vector<1x128xf32>
    %13 = arith.subf %11, %12 : vector<1x128xf32>
    %cst_7 = arith.constant 0.000000e+00 : f32
    %14 = vector.broadcast %cst_7 : f32 to vector<1x128xf32>
    %15 = arith.maximumf %13, %14 : vector<1x128xf32>
    %16 = vector.broadcast %6 : vector<1x128xf32> to vector<8x128xf32>
    %17 = arith.subf %2, %16 : vector<8x128xf32>
    %cst_8 = arith.constant 9.99999974E-6 : f32
    %18 = vector.broadcast %cst_8 : f32 to vector<1x128xf32>
    %19 = arith.addf %15, %18 : vector<1x128xf32>
    %20 = math.rsqrt %19 : vector<1x128xf32>
    %21 = vector.broadcast %20 : vector<1x128xf32> to vector<8x128xf32>
    %22 = arith.mulf %17, %21 : vector<8x128xf32>
    %c0_9 = arith.constant 0 : index
    %c0_10 = arith.constant 0 : index
    %23 = vector.load %arg4[%c0_9, %c0_10] : memref<1x128xf32, #tpu.memory_space<vmem>>, vector<1x128xf32>
    %24 = vector.broadcast %23 : vector<1x128xf32> to vector<8x128xf32>
    %25 = arith.mulf %22, %24 : vector<8x128xf32>
    %c0_11 = arith.constant 0 : index
    %c0_12 = arith.constant 0 : index
    %26 = vector.load %arg5[%c0_11, %c0_12] : memref<1x128xf32, #tpu.memory_space<vmem>>, vector<1x128xf32>
    %27 = vector.broadcast %26 : vector<1x128xf32> to vector<8x128xf32>
    %28 = arith.addf %25, %27 : vector<8x128xf32>
    %c0_13 = arith.constant 0 : index
    %c0_14 = arith.constant 0 : index
    %29 = vector.load %arg6[%c0_13, %c0_14] : memref<8x128xbf16, #tpu.memory_space<vmem>>, vector<8x128xbf16>
    %30 = arith.extf %29 : vector<8x128xbf16> to vector<8x128xf32>
    %31 = arith.addf %28, %30 : vector<8x128xf32>
    %cst_15 = arith.constant 0.000000e+00 : f32
    %32 = vector.broadcast %cst_15 : f32 to vector<8x128xf32>
    %33 = arith.cmpf oge, %31, %32 : vector<8x128xf32>
    %cst_16 = arith.constant 0.00999999977 : f32
    %34 = vector.broadcast %cst_16 : f32 to vector<8x128xf32>
    %35 = arith.mulf %34, %31 : vector<8x128xf32>
    %36 = arith.select %33, %31, %35 : vector<8x128xi1>, vector<8x128xf32>
    %37 = arith.truncf %36 : vector<8x128xf32> to vector<8x128xbf16>
    %c0_17 = arith.constant 0 : index
    %c0_18 = arith.constant 0 : index
    %38 = vector.load %arg7[%c0_17, %c0_18] : memref<8x128xbf16, #tpu.memory_space<vmem>>, vector<8x128xbf16>
    tpu.vector_store %arg7[%c0_17, %c0_18], %37 {strides = array<i32>} : memref<8x128xbf16, #tpu.memory_space<vmem>>, vector<8x128xbf16>,
    return
  }
  func.func @transform_0(%arg0: i32, %arg1: i32) -> (i32, i32) {
    %c0_i32 = arith.constant 0 : i32
    %c0_i32_0 = arith.constant 0 : i32
    return %c0_i32, %arg1 : i32, i32
  }
  func.func @transform_1(%arg0: i32, %arg1: i32) -> (i32, i32) {
    %c0_i32 = arith.constant 0 : i32
    return %arg1, %arg0 : i32, i32
  }
  func.func @transform_2(%arg0: i32, %arg1: i32) -> (i32, i32) {
    %c0_i32 = arith.constant 0 : i32
    %c0_i32_0 = arith.constant 0 : i32
    return %c0_i32, %arg0 : i32, i32
  }
  func.func @transform_3(%arg0: i32, %arg1: i32) -> (i32, i32) {
    %c0_i32 = arith.constant 0 : i32
    %c0_i32_0 = arith.constant 0 : i32
    return %c0_i32, %arg0 : i32, i32
  }
  func.func @transform_4(%arg0: i32, %arg1: i32) -> (i32, i32) {
    %c0_i32 = arith.constant 0 : i32
    %c0_i32_0 = arith.constant 0 : i32
    return %c0_i32, %arg0 : i32, i32
  }
  func.func @transform_5(%arg0: i32, %arg1: i32) -> (i32, i32) {
    %c0_i32 = arith.constant 0 : i32
    %c0_i32_0 = arith.constant 0 : i32
    return %c0_i32, %arg0 : i32, i32
  }
}

module attributes {stable_mosaic.version = 11 : i64} {
  func.func @_fused_linear_kernel(%arg0: i32, %arg1: i32, %arg2: memref<8x128xbf16, #tpu.memory_space<vmem>>, %arg3: memref<128x128xbf16, #tpu.memory_space<vmem>>, %arg4: memref<1x128xf32, #tpu.memory_space<vmem>>, %arg5: memref<1x128xf32, #tpu.memory_space<vmem>>, %arg6: memref<8x128xbf16, #tpu.memory_space<vmem>>) attributes {dimension_semantics = [#tpu.dimension_semantics<parallel>, #tpu.dimension_semantics<arbitrary>], iteration_bounds = array<i64: 1, 1>, scalar_prefetch = 0 : i64, scratch_operands = 0 : i64, tpu.core_type = #tpu.core_type<tc>, window_params = [{transform_indices = @transform_0, window_bounds = array<i64: 8, 128>}, {transform_indices = @transform_1, window_bounds = array<i64: 128, 128>}, {transform_indices = @transform_2, window_bounds = array<i64: 1, 128>}, {transform_indices = @transform_3, window_bounds = array<i64: 1, 128>}, {transform_indices = @transform_4, window_bounds = array<i64: 8, 128>}]} {
    %c0 = arith.constant 0 : index
    %c0_0 = arith.constant 0 : index
    %0 = vector.load %arg2[%c0, %c0_0] : memref<8x128xbf16, #tpu.memory_space<vmem>>, vector<8x128xbf16>
    %c0_1 = arith.constant 0 : index
    %c0_2 = arith.constant 0 : index
    %1 = vector.load %arg3[%c0_1, %c0_2] : memref<128x128xbf16, #tpu.memory_space<vmem>>, vector<128x128xbf16>
    %cst = arith.constant dense<0.000000e+00> : vector<8x128xf32>
    %2 = tpu.matmul %0, %1, %cst {dimension_numbers = #tpu.dot_dimension_numbers<[1], [0], [0], [1], [0, 0, 1, 1], [], []>} : vector<8x128xbf16>, vector<128x128xbf16>, vector<8x128xf32> -> vector<8x128xf32>
    %cst_3 = arith.constant dense<0.000000e+00> : vector<128xf32>
    %3 = vector.multi_reduction <add>, %2, %cst_3 [0] : vector<8x128xf32> to vector<128xf32>
    %4 = vector.shape_cast %3 : vector<128xf32> to vector<1x128xf32>
    %cst_4 = arith.constant 8.000000e+00 : f32
    %5 = vector.broadcast %cst_4 : f32 to vector<1x128xf32>
    %6 = arith.divf %4, %5 : vector<1x128xf32>
    %7 = arith.mulf %2, %2 : vector<8x128xf32>
    %cst_5 = arith.constant dense<0.000000e+00> : vector<128xf32>
    %8 = vector.multi_reduction <add>, %7, %cst_5 [0] : vector<8x128xf32> to vector<128xf32>
    %9 = vector.shape_cast %8 : vector<128xf32> to vector<1x128xf32>
    %cst_6 = arith.constant 8.000000e+00 : f32
    %10 = vector.broadcast %cst_6 : f32 to vector<1x128xf32>
    %11 = arith.divf %9, %10 : vector<1x128xf32>
    %12 = arith.mulf %6, %6 : vector<1x128xf32>
    %13 = arith.subf %11, %12 : vector<1x128xf32>
    %cst_7 = arith.constant 0.000000e+00 : f32
    %14 = vector.broadcast %cst_7 : f32 to vector<1x128xf32>
    %15 = arith.maximumf %13, %14 : vector<1x128xf32>
    %16 = vector.broadcast %6 : vector<1x128xf32> to vector<8x128xf32>
    %17 = arith.subf %2, %16 : vector<8x128xf32>
    %cst_8 = arith.constant 9.99999974E-6 : f32
    %18 = vector.broadcast %cst_8 : f32 to vector<1x128xf32>
    %19 = arith.addf %15, %18 : vector<1x128xf32>
    %20 = math.rsqrt %19 : vector<1x128xf32>
    %21 = vector.broadcast %20 : vector<1x128xf32> to vector<8x128xf32>
    %22 = arith.mulf %17, %21 : vector<8x128xf32>
    %c0_9 = arith.constant 0 : index
    %c0_10 = arith.constant 0 : index
    %23 = vector.load %arg4[%c0_9, %c0_10] : memref<1x128xf32, #tpu.memory_space<vmem>>, vector<1x128xf32>
    %24 = vector.broadcast %23 : vector<1x128xf32> to vector<8x128xf32>
    %25 = arith.mulf %22, %24 : vector<8x128xf32>
    %c0_11 = arith.constant 0 : index
    %c0_12 = arith.constant 0 : index
    %26 = vector.load %arg5[%c0_11, %c0_12] : memref<1x128xf32, #tpu.memory_space<vmem>>, vector<1x128xf32>
    %27 = vector.broadcast %26 : vector<1x128xf32> to vector<8x128xf32>
    %28 = arith.addf %25, %27 : vector<8x128xf32>
    %29 = arith.truncf %28 : vector<8x128xf32> to vector<8x128xbf16>
    %c0_13 = arith.constant 0 : index
    %c0_14 = arith.constant 0 : index
    %30 = vector.load %arg6[%c0_13, %c0_14] : memref<8x128xbf16, #tpu.memory_space<vmem>>, vector<8x128xbf16>
    tpu.vector_store %arg6[%c0_13, %c0_14], %29 {strides = array<i32>} : memref<8x128xbf16, #tpu.memory_space<vmem>>, vector<8x128xbf16>,
    return
  }
  func.func @transform_0(%arg0: i32, %arg1: i32) -> (i32, i32) {
    %c0_i32 = arith.constant 0 : i32
    %c0_i32_0 = arith.constant 0 : i32
    return %c0_i32, %arg1 : i32, i32
  }
  func.func @transform_1(%arg0: i32, %arg1: i32) -> (i32, i32) {
    %c0_i32 = arith.constant 0 : i32
    return %arg1, %arg0 : i32, i32
  }
  func.func @transform_2(%arg0: i32, %arg1: i32) -> (i32, i32) {
    %c0_i32 = arith.constant 0 : i32
    %c0_i32_0 = arith.constant 0 : i32
    return %c0_i32, %arg0 : i32, i32
  }
  func.func @transform_3(%arg0: i32, %arg1: i32) -> (i32, i32) {
    %c0_i32 = arith.constant 0 : i32
    %c0_i32_0 = arith.constant 0 : i32
    return %c0_i32, %arg0 : i32, i32
  }
  func.func @transform_4(%arg0: i32, %arg1: i32) -> (i32, i32) {
    %c0_i32 = arith.constant 0 : i32
    %c0_i32_0 = arith.constant 0 : i32
    return %c0_i32, %arg0 : i32, i32
  }
}

module attributes {stable_mosaic.version = 11 : i64} {
  func.func @_fused_linear_kernel(%arg0: i32, %arg1: i32, %arg2: memref<8x384xbf16, #tpu.memory_space<vmem>>, %arg3: memref<384x128xbf16, #tpu.memory_space<vmem>>, %arg4: memref<1x128xf32, #tpu.memory_space<vmem>>, %arg5: memref<1x128xf32, #tpu.memory_space<vmem>>, %arg6: memref<8x128xbf16, #tpu.memory_space<vmem>>) attributes {dimension_semantics = [#tpu.dimension_semantics<parallel>, #tpu.dimension_semantics<arbitrary>], iteration_bounds = array<i64: 1, 1>, scalar_prefetch = 0 : i64, scratch_operands = 0 : i64, tpu.core_type = #tpu.core_type<tc>, window_params = [{transform_indices = @transform_0, window_bounds = array<i64: 8, 384>}, {transform_indices = @transform_1, window_bounds = array<i64: 384, 128>}, {transform_indices = @transform_2, window_bounds = array<i64: 1, 128>}, {transform_indices = @transform_3, window_bounds = array<i64: 1, 128>}, {transform_indices = @transform_4, window_bounds = array<i64: 8, 128>}]} {
    %c0 = arith.constant 0 : index
    %c0_0 = arith.constant 0 : index
    %0 = vector.load %arg2[%c0, %c0_0] : memref<8x384xbf16, #tpu.memory_space<vmem>>, vector<8x384xbf16>
    %c0_1 = arith.constant 0 : index
    %c0_2 = arith.constant 0 : index
    %1 = vector.load %arg3[%c0_1, %c0_2] : memref<384x128xbf16, #tpu.memory_space<vmem>>, vector<384x128xbf16>
    %cst = arith.constant dense<0.000000e+00> : vector<8x128xf32>
    %2 = tpu.matmul %0, %1, %cst {dimension_numbers = #tpu.dot_dimension_numbers<[1], [0], [0], [1], [0, 0, 1, 1], [], []>} : vector<8x384xbf16>, vector<384x128xbf16>, vector<8x128xf32> -> vector<8x128xf32>
    %cst_3 = arith.constant dense<0.000000e+00> : vector<128xf32>
    %3 = vector.multi_reduction <add>, %2, %cst_3 [0] : vector<8x128xf32> to vector<128xf32>
    %4 = vector.shape_cast %3 : vector<128xf32> to vector<1x128xf32>
    %cst_4 = arith.constant 8.000000e+00 : f32
    %5 = vector.broadcast %cst_4 : f32 to vector<1x128xf32>
    %6 = arith.divf %4, %5 : vector<1x128xf32>
    %7 = arith.mulf %2, %2 : vector<8x128xf32>
    %cst_5 = arith.constant dense<0.000000e+00> : vector<128xf32>
    %8 = vector.multi_reduction <add>, %7, %cst_5 [0] : vector<8x128xf32> to vector<128xf32>
    %9 = vector.shape_cast %8 : vector<128xf32> to vector<1x128xf32>
    %cst_6 = arith.constant 8.000000e+00 : f32
    %10 = vector.broadcast %cst_6 : f32 to vector<1x128xf32>
    %11 = arith.divf %9, %10 : vector<1x128xf32>
    %12 = arith.mulf %6, %6 : vector<1x128xf32>
    %13 = arith.subf %11, %12 : vector<1x128xf32>
    %cst_7 = arith.constant 0.000000e+00 : f32
    %14 = vector.broadcast %cst_7 : f32 to vector<1x128xf32>
    %15 = arith.maximumf %13, %14 : vector<1x128xf32>
    %16 = vector.broadcast %6 : vector<1x128xf32> to vector<8x128xf32>
    %17 = arith.subf %2, %16 : vector<8x128xf32>
    %cst_8 = arith.constant 9.99999974E-6 : f32
    %18 = vector.broadcast %cst_8 : f32 to vector<1x128xf32>
    %19 = arith.addf %15, %18 : vector<1x128xf32>
    %20 = math.rsqrt %19 : vector<1x128xf32>
    %21 = vector.broadcast %20 : vector<1x128xf32> to vector<8x128xf32>
    %22 = arith.mulf %17, %21 : vector<8x128xf32>
    %c0_9 = arith.constant 0 : index
    %c0_10 = arith.constant 0 : index
    %23 = vector.load %arg4[%c0_9, %c0_10] : memref<1x128xf32, #tpu.memory_space<vmem>>, vector<1x128xf32>
    %24 = vector.broadcast %23 : vector<1x128xf32> to vector<8x128xf32>
    %25 = arith.mulf %22, %24 : vector<8x128xf32>
    %c0_11 = arith.constant 0 : index
    %c0_12 = arith.constant 0 : index
    %26 = vector.load %arg5[%c0_11, %c0_12] : memref<1x128xf32, #tpu.memory_space<vmem>>, vector<1x128xf32>
    %27 = vector.broadcast %26 : vector<1x128xf32> to vector<8x128xf32>
    %28 = arith.addf %25, %27 : vector<8x128xf32>
    %cst_13 = arith.constant 0.000000e+00 : f32
    %29 = vector.broadcast %cst_13 : f32 to vector<8x128xf32>
    %30 = arith.cmpf oge, %28, %29 : vector<8x128xf32>
    %cst_14 = arith.constant 0.00999999977 : f32
    %31 = vector.broadcast %cst_14 : f32 to vector<8x128xf32>
    %32 = arith.mulf %31, %28 : vector<8x128xf32>
    %33 = arith.select %30, %28, %32 : vector<8x128xi1>, vector<8x128xf32>
    %34 = arith.truncf %33 : vector<8x128xf32> to vector<8x128xbf16>
    %c0_15 = arith.constant 0 : index
    %c0_16 = arith.constant 0 : index
    %35 = vector.load %arg6[%c0_15, %c0_16] : memref<8x128xbf16, #tpu.memory_space<vmem>>, vector<8x128xbf16>
    tpu.vector_store %arg6[%c0_15, %c0_16], %34 {strides = array<i32>} : memref<8x128xbf16, #tpu.memory_space<vmem>>, vector<8x128xbf16>,
    return
  }
  func.func @transform_0(%arg0: i32, %arg1: i32) -> (i32, i32) {
    %c0_i32 = arith.constant 0 : i32
    %c0_i32_0 = arith.constant 0 : i32
    return %c0_i32, %arg1 : i32, i32
  }
  func.func @transform_1(%arg0: i32, %arg1: i32) -> (i32, i32) {
    %c0_i32 = arith.constant 0 : i32
    return %arg1, %arg0 : i32, i32
  }
  func.func @transform_2(%arg0: i32, %arg1: i32) -> (i32, i32) {
    %c0_i32 = arith.constant 0 : i32
    %c0_i32_0 = arith.constant 0 : i32
    return %c0_i32, %arg0 : i32, i32
  }
  func.func @transform_3(%arg0: i32, %arg1: i32) -> (i32, i32) {
    %c0_i32 = arith.constant 0 : i32
    %c0_i32_0 = arith.constant 0 : i32
    return %c0_i32, %arg0 : i32, i32
  }
  func.func @transform_4(%arg0: i32, %arg1: i32) -> (i32, i32) {
    %c0_i32 = arith.constant 0 : i32
    %c0_i32_0 = arith.constant 0 : i32
    return %c0_i32, %arg0 : i32, i32
  }
}

module attributes {stable_mosaic.version = 11 : i64} {
  func.func @_vae_tail_kernel(%arg0: memref<2x128xbf16, #tpu.memory_space<vmem>>, %arg1: memref<128x128xbf16, #tpu.memory_space<vmem>>, %arg2: memref<1x128xf32, #tpu.memory_space<vmem>>, %arg3: memref<1x128xf32, #tpu.memory_space<vmem>>, %arg4: memref<128x128xbf16, #tpu.memory_space<vmem>>, %arg5: memref<1x128xf32, #tpu.memory_space<vmem>>, %arg6: memref<128x128xbf16, #tpu.memory_space<vmem>>, %arg7: memref<1x128xf32, #tpu.memory_space<vmem>>, %arg8: memref<2x128xf32, #tpu.memory_space<vmem>>, %arg9: memref<128x128xbf16, #tpu.memory_space<vmem>>, %arg10: memref<1x128xf32, #tpu.memory_space<vmem>>, %arg11: memref<1x128xf32, #tpu.memory_space<vmem>>, %arg12: memref<128x128xbf16, #tpu.memory_space<vmem>>, %arg13: memref<1x128xf32, #tpu.memory_space<vmem>>, %arg14: memref<1x128xf32, #tpu.memory_space<vmem>>, %arg15: memref<128x256xbf16, #tpu.memory_space<vmem>>, %arg16: memref<1x256xf32, #tpu.memory_space<vmem>>, %arg17: memref<1x256xf32, #tpu.memory_space<vmem>>, %arg18: memref<256x256xbf16, #tpu.memory_space<vmem>>, %arg19: memref<1x256xf32, #tpu.memory_space<vmem>>, %arg20: memref<2x256xf32, #tpu.memory_space<vmem>>, %arg21: memref<2x128xf32, #tpu.memory_space<vmem>>, %arg22: memref<2x128xf32, #tpu.memory_space<vmem>>) attributes {dimension_semantics = [], scalar_prefetch = 0 : i64, scratch_operands = 0 : i64, tpu.core_type = #tpu.core_type<tc>} {
    %c0 = arith.constant 0 : index
    %c0_0 = arith.constant 0 : index
    %0 = vector.load %arg0[%c0, %c0_0] : memref<2x128xbf16, #tpu.memory_space<vmem>>, vector<2x128xbf16>
    %c0_1 = arith.constant 0 : index
    %c0_2 = arith.constant 0 : index
    %1 = vector.load %arg1[%c0_1, %c0_2] : memref<128x128xbf16, #tpu.memory_space<vmem>>, vector<128x128xbf16>
    %cst = arith.constant dense<0.000000e+00> : vector<2x128xf32>
    %2 = tpu.matmul %0, %1, %cst {dimension_numbers = #tpu.dot_dimension_numbers<[1], [0], [0], [1], [0, 0, 1, 1], [], []>} : vector<2x128xbf16>, vector<128x128xbf16>, vector<2x128xf32> -> vector<2x128xf32>
    %cst_3 = arith.constant dense<0.000000e+00> : vector<128xf32>
    %3 = vector.multi_reduction <add>, %2, %cst_3 [0] : vector<2x128xf32> to vector<128xf32>
    %4 = vector.shape_cast %3 : vector<128xf32> to vector<1x128xf32>
    %cst_4 = arith.constant 2.000000e+00 : f32
    %5 = vector.broadcast %cst_4 : f32 to vector<1x128xf32>
    %6 = arith.divf %4, %5 : vector<1x128xf32>
    %7 = arith.mulf %2, %2 : vector<2x128xf32>
    %cst_5 = arith.constant dense<0.000000e+00> : vector<128xf32>
    %8 = vector.multi_reduction <add>, %7, %cst_5 [0] : vector<2x128xf32> to vector<128xf32>
    %9 = vector.shape_cast %8 : vector<128xf32> to vector<1x128xf32>
    %cst_6 = arith.constant 2.000000e+00 : f32
    %10 = vector.broadcast %cst_6 : f32 to vector<1x128xf32>
    %11 = arith.divf %9, %10 : vector<1x128xf32>
    %12 = arith.mulf %6, %6 : vector<1x128xf32>
    %13 = arith.subf %11, %12 : vector<1x128xf32>
    %cst_7 = arith.constant 0.000000e+00 : f32
    %14 = vector.broadcast %cst_7 : f32 to vector<1x128xf32>
    %15 = arith.maximumf %13, %14 : vector<1x128xf32>
    %16 = vector.broadcast %6 : vector<1x128xf32> to vector<2x128xf32>
    %17 = arith.subf %2, %16 : vector<2x128xf32>
    %cst_8 = arith.constant 9.99999974E-6 : f32
    %18 = vector.broadcast %cst_8 : f32 to vector<1x128xf32>
    %19 = arith.addf %15, %18 : vector<1x128xf32>
    %20 = math.rsqrt %19 : vector<1x128xf32>
    %21 = vector.broadcast %20 : vector<1x128xf32> to vector<2x128xf32>
    %22 = arith.mulf %17, %21 : vector<2x128xf32>
    %c0_9 = arith.constant 0 : index
    %c0_10 = arith.constant 0 : index
    %23 = vector.load %arg2[%c0_9, %c0_10] : memref<1x128xf32, #tpu.memory_space<vmem>>, vector<1x128xf32>
    %24 = vector.broadcast %23 : vector<1x128xf32> to vector<2x128xf32>
    %25 = arith.mulf %22, %24 : vector<2x128xf32>
    %c0_11 = arith.constant 0 : index
    %c0_12 = arith.constant 0 : index
    %26 = vector.load %arg3[%c0_11, %c0_12] : memref<1x128xf32, #tpu.memory_space<vmem>>, vector<1x128xf32>
    %27 = vector.broadcast %26 : vector<1x128xf32> to vector<2x128xf32>
    %28 = arith.addf %25, %27 : vector<2x128xf32>
    %cst_13 = arith.constant 0.000000e+00 : f32
    %29 = vector.broadcast %cst_13 : f32 to vector<2x128xf32>
    %30 = arith.cmpf oge, %28, %29 : vector<2x128xf32>
    %cst_14 = arith.constant 0.00999999977 : f32
    %31 = vector.broadcast %cst_14 : f32 to vector<2x128xf32>
    %32 = arith.mulf %31, %28 : vector<2x128xf32>
    %33 = arith.select %30, %28, %32 : vector<2x128xi1>, vector<2x128xf32>
    %34 = arith.truncf %33 : vector<2x128xf32> to vector<2x128xbf16>
    %c0_15 = arith.constant 0 : index
    %c0_16 = arith.constant 0 : index
    %35 = vector.load %arg4[%c0_15, %c0_16] : memref<128x128xbf16, #tpu.memory_space<vmem>>, vector<128x128xbf16>
    %cst_17 = arith.constant dense<0.000000e+00> : vector<2x128xf32>
    %36 = tpu.matmul %34, %35, %cst_17 {dimension_numbers = #tpu.dot_dimension_numbers<[1], [0], [0], [1], [0, 0, 1, 1], [], []>} : vector<2x128xbf16>, vector<128x128xbf16>, vector<2x128xf32> -> vector<2x128xf32>
    %c0_18 = arith.constant 0 : index
    %c0_19 = arith.constant 0 : index
    %37 = vector.load %arg5[%c0_18, %c0_19] : memref<1x128xf32, #tpu.memory_space<vmem>>, vector<1x128xf32>
    %38 = vector.broadcast %37 : vector<1x128xf32> to vector<2x128xf32>
    %39 = arith.addf %36, %38 : vector<2x128xf32>
    %40 = arith.truncf %33 : vector<2x128xf32> to vector<2x128xbf16>
    %c0_20 = arith.constant 0 : index
    %c0_21 = arith.constant 0 : index
    %41 = vector.load %arg6[%c0_20, %c0_21] : memref<128x128xbf16, #tpu.memory_space<vmem>>, vector<128x128xbf16>
    %cst_22 = arith.constant dense<0.000000e+00> : vector<2x128xf32>
    %42 = tpu.matmul %40, %41, %cst_22 {dimension_numbers = #tpu.dot_dimension_numbers<[1], [0], [0], [1], [0, 0, 1, 1], [], []>} : vector<2x128xbf16>, vector<128x128xbf16>, vector<2x128xf32> -> vector<2x128xf32>
    %c0_23 = arith.constant 0 : index
    %c0_24 = arith.constant 0 : index
    %43 = vector.load %arg7[%c0_23, %c0_24] : memref<1x128xf32, #tpu.memory_space<vmem>>, vector<1x128xf32>
    %44 = vector.broadcast %43 : vector<1x128xf32> to vector<2x128xf32>
    %45 = arith.addf %42, %44 : vector<2x128xf32>
    %c0_25 = arith.constant 0 : index
    %c0_26 = arith.constant 0 : index
    %46 = vector.load %arg21[%c0_25, %c0_26] : memref<2x128xf32, #tpu.memory_space<vmem>>, vector<2x128xf32>
    tpu.vector_store %arg21[%c0_25, %c0_26], %39 {strides = array<i32>} : memref<2x128xf32, #tpu.memory_space<vmem>>, vector<2x128xf32>,
    %c0_27 = arith.constant 0 : index
    %c0_28 = arith.constant 0 : index
    %47 = vector.load %arg22[%c0_27, %c0_28] : memref<2x128xf32, #tpu.memory_space<vmem>>, vector<2x128xf32>
    tpu.vector_store %arg22[%c0_27, %c0_28], %45 {strides = array<i32>} : memref<2x128xf32, #tpu.memory_space<vmem>>, vector<2x128xf32>,
    %c0_29 = arith.constant 0 : index
    %c0_30 = arith.constant 0 : index
    %48 = vector.load %arg8[%c0_29, %c0_30] : memref<2x128xf32, #tpu.memory_space<vmem>>, vector<2x128xf32>
    %cst_31 = arith.constant 5.000000e-01 : f32
    %49 = vector.broadcast %cst_31 : f32 to vector<2x128xf32>
    %50 = arith.mulf %45, %49 : vector<2x128xf32>
    %51 = math.exp %50 : vector<2x128xf32>
    %52 = arith.mulf %48, %51 : vector<2x128xf32>
    %53 = arith.addf %39, %52 : vector<2x128xf32>
    %54 = arith.truncf %53 : vector<2x128xf32> to vector<2x128xbf16>
    %c0_32 = arith.constant 0 : index
    %c0_33 = arith.constant 0 : index
    %55 = vector.load %arg9[%c0_32, %c0_33] : memref<128x128xbf16, #tpu.memory_space<vmem>>, vector<128x128xbf16>
    %cst_34 = arith.constant dense<0.000000e+00> : vector<2x128xf32>
    %56 = tpu.matmul %54, %55, %cst_34 {dimension_numbers = #tpu.dot_dimension_numbers<[1], [0], [0], [1], [0, 0, 1, 1], [], []>} : vector<2x128xbf16>, vector<128x128xbf16>, vector<2x128xf32> -> vector<2x128xf32>
    %cst_35 = arith.constant dense<0.000000e+00> : vector<128xf32>
    %57 = vector.multi_reduction <add>, %56, %cst_35 [0] : vector<2x128xf32> to vector<128xf32>
    %58 = vector.shape_cast %57 : vector<128xf32> to vector<1x128xf32>
    %cst_36 = arith.constant 2.000000e+00 : f32
    %59 = vector.broadcast %cst_36 : f32 to vector<1x128xf32>
    %60 = arith.divf %58, %59 : vector<1x128xf32>
    %61 = arith.mulf %56, %56 : vector<2x128xf32>
    %cst_37 = arith.constant dense<0.000000e+00> : vector<128xf32>
    %62 = vector.multi_reduction <add>, %61, %cst_37 [0] : vector<2x128xf32> to vector<128xf32>
    %63 = vector.shape_cast %62 : vector<128xf32> to vector<1x128xf32>
    %cst_38 = arith.constant 2.000000e+00 : f32
    %64 = vector.broadcast %cst_38 : f32 to vector<1x128xf32>
    %65 = arith.divf %63, %64 : vector<1x128xf32>
    %66 = arith.mulf %60, %60 : vector<1x128xf32>
    %67 = arith.subf %65, %66 : vector<1x128xf32>
    %cst_39 = arith.constant 0.000000e+00 : f32
    %68 = vector.broadcast %cst_39 : f32 to vector<1x128xf32>
    %69 = arith.maximumf %67, %68 : vector<1x128xf32>
    %70 = vector.broadcast %60 : vector<1x128xf32> to vector<2x128xf32>
    %71 = arith.subf %56, %70 : vector<2x128xf32>
    %cst_40 = arith.constant 9.99999974E-6 : f32
    %72 = vector.broadcast %cst_40 : f32 to vector<1x128xf32>
    %73 = arith.addf %69, %72 : vector<1x128xf32>
    %74 = math.rsqrt %73 : vector<1x128xf32>
    %75 = vector.broadcast %74 : vector<1x128xf32> to vector<2x128xf32>
    %76 = arith.mulf %71, %75 : vector<2x128xf32>
    %c0_41 = arith.constant 0 : index
    %c0_42 = arith.constant 0 : index
    %77 = vector.load %arg10[%c0_41, %c0_42] : memref<1x128xf32, #tpu.memory_space<vmem>>, vector<1x128xf32>
    %78 = vector.broadcast %77 : vector<1x128xf32> to vector<2x128xf32>
    %79 = arith.mulf %76, %78 : vector<2x128xf32>
    %c0_43 = arith.constant 0 : index
    %c0_44 = arith.constant 0 : index
    %80 = vector.load %arg11[%c0_43, %c0_44] : memref<1x128xf32, #tpu.memory_space<vmem>>, vector<1x128xf32>
    %81 = vector.broadcast %80 : vector<1x128xf32> to vector<2x128xf32>
    %82 = arith.addf %79, %81 : vector<2x128xf32>
    %cst_45 = arith.constant 0.000000e+00 : f32
    %83 = vector.broadcast %cst_45 : f32 to vector<2x128xf32>
    %84 = arith.cmpf oge, %82, %83 : vector<2x128xf32>
    %cst_46 = arith.constant 0.00999999977 : f32
    %85 = vector.broadcast %cst_46 : f32 to vector<2x128xf32>
    %86 = arith.mulf %85, %82 : vector<2x128xf32>
    %87 = arith.select %84, %82, %86 : vector<2x128xi1>, vector<2x128xf32>
    %88 = arith.truncf %87 : vector<2x128xf32> to vector<2x128xbf16>
    %c0_47 = arith.constant 0 : index
    %c0_48 = arith.constant 0 : index
    %89 = vector.load %arg12[%c0_47, %c0_48] : memref<128x128xbf16, #tpu.memory_space<vmem>>, vector<128x128xbf16>
    %cst_49 = arith.constant dense<0.000000e+00> : vector<2x128xf32>
    %90 = tpu.matmul %88, %89, %cst_49 {dimension_numbers = #tpu.dot_dimension_numbers<[1], [0], [0], [1], [0, 0, 1, 1], [], []>} : vector<2x128xbf16>, vector<128x128xbf16>, vector<2x128xf32> -> vector<2x128xf32>
    %cst_50 = arith.constant dense<0.000000e+00> : vector<128xf32>
    %91 = vector.multi_reduction <add>, %90, %cst_50 [0] : vector<2x128xf32> to vector<128xf32>
    %92 = vector.shape_cast %91 : vector<128xf32> to vector<1x128xf32>
    %cst_51 = arith.constant 2.000000e+00 : f32
    %93 = vector.broadcast %cst_51 : f32 to vector<1x128xf32>
    %94 = arith.divf %92, %93 : vector<1x128xf32>
    %95 = arith.mulf %90, %90 : vector<2x128xf32>
    %cst_52 = arith.constant dense<0.000000e+00> : vector<128xf32>
    %96 = vector.multi_reduction <add>, %95, %cst_52 [0] : vector<2x128xf32> to vector<128xf32>
    %97 = vector.shape_cast %96 : vector<128xf32> to vector<1x128xf32>
    %cst_53 = arith.constant 2.000000e+00 : f32
    %98 = vector.broadcast %cst_53 : f32 to vector<1x128xf32>
    %99 = arith.divf %97, %98 : vector<1x128xf32>
    %100 = arith.mulf %94, %94 : vector<1x128xf32>
    %101 = arith.subf %99, %100 : vector<1x128xf32>
    %cst_54 = arith.constant 0.000000e+00 : f32
    %102 = vector.broadcast %cst_54 : f32 to vector<1x128xf32>
    %103 = arith.maximumf %101, %102 : vector<1x128xf32>
    %104 = vector.broadcast %94 : vector<1x128xf32> to vector<2x128xf32>
    %105 = arith.subf %90, %104 : vector<2x128xf32>
    %cst_55 = arith.constant 9.99999974E-6 : f32
    %106 = vector.broadcast %cst_55 : f32 to vector<1x128xf32>
    %107 = arith.addf %103, %106 : vector<1x128xf32>
    %108 = math.rsqrt %107 : vector<1x128xf32>
    %109 = vector.broadcast %108 : vector<1x128xf32> to vector<2x128xf32>
    %110 = arith.mulf %105, %109 : vector<2x128xf32>
    %c0_56 = arith.constant 0 : index
    %c0_57 = arith.constant 0 : index
    %111 = vector.load %arg13[%c0_56, %c0_57] : memref<1x128xf32, #tpu.memory_space<vmem>>, vector<1x128xf32>
    %112 = vector.broadcast %111 : vector<1x128xf32> to vector<2x128xf32>
    %113 = arith.mulf %110, %112 : vector<2x128xf32>
    %c0_58 = arith.constant 0 : index
    %c0_59 = arith.constant 0 : index
    %114 = vector.load %arg14[%c0_58, %c0_59] : memref<1x128xf32, #tpu.memory_space<vmem>>, vector<1x128xf32>
    %115 = vector.broadcast %114 : vector<1x128xf32> to vector<2x128xf32>
    %116 = arith.addf %113, %115 : vector<2x128xf32>
    %cst_60 = arith.constant 0.000000e+00 : f32
    %117 = vector.broadcast %cst_60 : f32 to vector<2x128xf32>
    %118 = arith.cmpf oge, %116, %117 : vector<2x128xf32>
    %cst_61 = arith.constant 0.00999999977 : f32
    %119 = vector.broadcast %cst_61 : f32 to vector<2x128xf32>
    %120 = arith.mulf %119, %116 : vector<2x128xf32>
    %121 = arith.select %118, %116, %120 : vector<2x128xi1>, vector<2x128xf32>
    %122 = arith.truncf %121 : vector<2x128xf32> to vector<2x128xbf16>
    %c0_62 = arith.constant 0 : index
    %c0_63 = arith.constant 0 : index
    %123 = vector.load %arg15[%c0_62, %c0_63] : memref<128x256xbf16, #tpu.memory_space<vmem>>, vector<128x256xbf16>
    %cst_64 = arith.constant dense<0.000000e+00> : vector<2x256xf32>
    %124 = tpu.matmul %122, %123, %cst_64 {dimension_numbers = #tpu.dot_dimension_numbers<[1], [0], [0], [1], [0, 0, 1, 1], [], []>} : vector<2x128xbf16>, vector<128x256xbf16>, vector<2x256xf32> -> vector<2x256xf32>
    %cst_65 = arith.constant dense<0.000000e+00> : vector<256xf32>
    %125 = vector.multi_reduction <add>, %124, %cst_65 [0] : vector<2x256xf32> to vector<256xf32>
    %126 = vector.shape_cast %125 : vector<256xf32> to vector<1x256xf32>
    %cst_66 = arith.constant 2.000000e+00 : f32
    %127 = vector.broadcast %cst_66 : f32 to vector<1x256xf32>
    %128 = arith.divf %126, %127 : vector<1x256xf32>
    %129 = arith.mulf %124, %124 : vector<2x256xf32>
    %cst_67 = arith.constant dense<0.000000e+00> : vector<256xf32>
    %130 = vector.multi_reduction <add>, %129, %cst_67 [0] : vector<2x256xf32> to vector<256xf32>
    %131 = vector.shape_cast %130 : vector<256xf32> to vector<1x256xf32>
    %cst_68 = arith.constant 2.000000e+00 : f32
    %132 = vector.broadcast %cst_68 : f32 to vector<1x256xf32>
    %133 = arith.divf %131, %132 : vector<1x256xf32>
    %134 = arith.mulf %128, %128 : vector<1x256xf32>
    %135 = arith.subf %133, %134 : vector<1x256xf32>
    %cst_69 = arith.constant 0.000000e+00 : f32
    %136 = vector.broadcast %cst_69 : f32 to vector<1x256xf32>
    %137 = arith.maximumf %135, %136 : vector<1x256xf32>
    %138 = vector.broadcast %128 : vector<1x256xf32> to vector<2x256xf32>
    %139 = arith.subf %124, %138 : vector<2x256xf32>
    %cst_70 = arith.constant 9.99999974E-6 : f32
    %140 = vector.broadcast %cst_70 : f32 to vector<1x256xf32>
    %141 = arith.addf %137, %140 : vector<1x256xf32>
    %142 = math.rsqrt %141 : vector<1x256xf32>
    %143 = vector.broadcast %142 : vector<1x256xf32> to vector<2x256xf32>
    %144 = arith.mulf %139, %143 : vector<2x256xf32>
    %c0_71 = arith.constant 0 : index
    %c0_72 = arith.constant 0 : index
    %145 = vector.load %arg16[%c0_71, %c0_72] : memref<1x256xf32, #tpu.memory_space<vmem>>, vector<1x256xf32>
    %146 = vector.broadcast %145 : vector<1x256xf32> to vector<2x256xf32>
    %147 = arith.mulf %144, %146 : vector<2x256xf32>
    %c0_73 = arith.constant 0 : index
    %c0_74 = arith.constant 0 : index
    %148 = vector.load %arg17[%c0_73, %c0_74] : memref<1x256xf32, #tpu.memory_space<vmem>>, vector<1x256xf32>
    %149 = vector.broadcast %148 : vector<1x256xf32> to vector<2x256xf32>
    %150 = arith.addf %147, %149 : vector<2x256xf32>
    %cst_75 = arith.constant 0.000000e+00 : f32
    %151 = vector.broadcast %cst_75 : f32 to vector<2x256xf32>
    %152 = arith.cmpf oge, %150, %151 : vector<2x256xf32>
    %cst_76 = arith.constant 0.00999999977 : f32
    %153 = vector.broadcast %cst_76 : f32 to vector<2x256xf32>
    %154 = arith.mulf %153, %150 : vector<2x256xf32>
    %155 = arith.select %152, %150, %154 : vector<2x256xi1>, vector<2x256xf32>
    %156 = arith.truncf %155 : vector<2x256xf32> to vector<2x256xbf16>
    %c0_77 = arith.constant 0 : index
    %c0_78 = arith.constant 0 : index
    %157 = vector.load %arg18[%c0_77, %c0_78] : memref<256x256xbf16, #tpu.memory_space<vmem>>, vector<256x256xbf16>
    %cst_79 = arith.constant dense<0.000000e+00> : vector<2x256xf32>
    %158 = tpu.matmul %156, %157, %cst_79 {dimension_numbers = #tpu.dot_dimension_numbers<[1], [0], [0], [1], [0, 0, 1, 1], [], []>} : vector<2x256xbf16>, vector<256x256xbf16>, vector<2x256xf32> -> vector<2x256xf32>
    %c0_80 = arith.constant 0 : index
    %c0_81 = arith.constant 0 : index
    %159 = vector.load %arg19[%c0_80, %c0_81] : memref<1x256xf32, #tpu.memory_space<vmem>>, vector<1x256xf32>
    %160 = vector.broadcast %159 : vector<1x256xf32> to vector<2x256xf32>
    %161 = arith.addf %158, %160 : vector<2x256xf32>
    %c0_82 = arith.constant 0 : index
    %c0_83 = arith.constant 0 : index
    %162 = vector.load %arg20[%c0_82, %c0_83] : memref<2x256xf32, #tpu.memory_space<vmem>>, vector<2x256xf32>
    tpu.vector_store %arg20[%c0_82, %c0_83], %161 {strides = array<i32>} : memref<2x256xf32, #tpu.memory_space<vmem>>, vector<2x256xf32>,
    return
  }
}

</mosaic_0001>

<bundles_post_ra>
// kernel: vae_forward.16
= control target key start
LH: loop header
LB: loop body
LE: loop exit
PB: predicated region body
PF: predicated region fallthrough
CT: control target
= control target key end

     0   :  { %s913_s1 = inlined_call_operand.vmem [shape: bf16[128,128], index: 1, kind: input, shape index: {}]   ;;  %s914_s0 = inlined_call_operand.vmem [shape: bf16[128,128], index: 0, kind: input, shape index: {}]   ;;  %s915_s2 = inlined_call_operand.vmem [shape: f32[1,128], index: 2, kind: input, shape index: {}]   ;;  %s916_s3 = inlined_call_operand.vmem [shape: f32[1,128], index: 3, kind: input, shape index: {}]   ;;  %s917_s4 = inlined_call_operand.vmem [shape: bf16[128,128], index: 4, kind: output, shape index: {}]  }
   0x1   :  { %v680_v0 = vld [vmem:[%s913_s1] sm:$0xff]   ;;  %v681_v1 = vld [vmem:[%s913_s1 + $0x8] sm:$0xff]   ;;  %v682_v2 = vld [vmem:[%s913_s1 + $0x10] sm:$0xff]  }
   0x2   :  { %632 = vmatprep.subr.bf16.mxu0 %v680_v0  ;;  %664 = vmatprep.subr.bf16.mxu1 %v680_v0  ;;  %v683_v3 = vld [vmem:[%s913_s1 + $0x18] sm:$0xff]   ;;  %v688_v4 = vld [vmem:[%s914_s0] sm:$0xff]   ;;  %v685_v7 = vld [vmem:[%s913_s1 + $0x28] sm:$0xff]  }
   0x3   :  { %633 = vmatpush3.bf16.msra.mxu0 %v680_v0  ;;  %672 = vmatpush3.bf16.msra.mxu1 %v680_v0  ;;  %v684_v5 = vld [vmem:[%s913_s1 + $0x20] sm:$0xff]   ;;  %v686_v8 = vld [vmem:[%s913_s1 + $0x30] sm:$0xff]   ;;  %v687_v9 = vld [vmem:[%s913_s1 + $0x38] sm:$0xff]  }
   0x4   :  { %634 = vmatprep.subr.bf16.mxu0 %v681_v1  ;;  %665 = vmatprep.subr.bf16.mxu1 %v681_v1  ;;  %v692_v6 = vld [vmem:[%s914_s0 + $0x20] sm:$0xff]   ;;  %v689_v10 = vld [vmem:[%s914_s0 + $0x8] sm:$0xff]   ;;  %v690_v12 = vld [vmem:[%s914_s0 + $0x10] sm:$0xff]  }
   0x5   :  { %648 = vmatprep.mubr.bf16.mxu0 %v688_v4  ;;  %656 = vmatprep.mubr.bf16.mxu1 %v692_v6  ;;  %v693_v11 = vld [vmem:[%s914_s0 + $0x28] sm:$0xff]   ;;  %v694_v13 = vld [vmem:[%s914_s0 + $0x30] sm:$0xff]   ;;  %v691_v14 = vld [vmem:[%s914_s0 + $0x18] sm:$0xff]  }
   0x6   :  { %v695_v15 = vld [vmem:[%s914_s0 + $0x38] sm:$0xff]  }
   0x7   :  { %635 = vmatpush3.bf16.msra.mxu0 %v681_v1  ;;  %673 = vmatpush3.bf16.msra.mxu1 %v681_v1 }
   0x8   :  { %636 = vmatprep.subr.bf16.mxu0 %v682_v2  ;;  %666 = vmatprep.subr.bf16.mxu1 %v682_v2 }
   0xb   :  { %637 = vmatpush3.bf16.msra.mxu0 %v682_v2  ;;  %674 = vmatpush3.bf16.msra.mxu1 %v682_v2 }
   0xc   :  { %638 = vmatprep.subr.bf16.mxu0 %v683_v3  ;;  %667 = vmatprep.subr.bf16.mxu1 %v683_v3 }
   0xf   :  { %639 = vmatpush3.bf16.msra.mxu0 %v683_v3  ;;  %675 = vmatpush3.bf16.msra.mxu1 %v683_v3 }
  0x10   :  { %640 = vmatprep.subr.bf16.mxu0 %v684_v5  ;;  %668 = vmatprep.subr.bf16.mxu1 %v684_v5 }
  0x13   :  { %641 = vmatpush3.bf16.msra.mxu0 %v684_v5  ;;  %676 = vmatpush3.bf16.msra.mxu1 %v684_v5 }
  0x14   :  { %642 = vmatprep.subr.bf16.mxu0 %v685_v7  ;;  %669 = vmatprep.subr.bf16.mxu1 %v685_v7 }
  0x17   :  { %643 = vmatpush3.bf16.msra.mxu0 %v685_v7  ;;  %677 = vmatpush3.bf16.msra.mxu1 %v685_v7 }
  0x18   :  { %644 = vmatprep.subr.bf16.mxu0 %v686_v8  ;;  %670 = vmatprep.subr.bf16.mxu1 %v686_v8 }
  0x1b   :  { %645 = vmatpush3.bf16.msra.mxu0 %v686_v8  ;;  %678 = vmatpush3.bf16.msra.mxu1 %v686_v8 }
  0x1c   :  { %646 = vmatprep.subr.bf16.mxu0 %v687_v9  ;;  %671 = vmatprep.subr.bf16.mxu1 %v687_v9 }
  0x1f   :  { %647 = vmatpush3.bf16.msra.mxu0 %v687_v9  ;;  %679 = vmatpush3.bf16.msra.mxu1 %v687_v9 }
  0x22   :  { %649 = vmatmul.mubr.bf16.vlgmr.msra.gmra.mrb[0].mxu0 %v689_v10  ;;  %657 = vmatmul.mubr.bf16.vlgmr.msra.gmra.mrb[0].mxu1 %v693_v11 }
  0x23   :  { %652 = vmatprep.mubr.bf16.mxu0 %v690_v12  ;;  %660 = vmatprep.mubr.bf16.mxu1 %v694_v13 }
  0x2a   :  { %653 = vmatmul.mubr.bf16.gmra.mrb[4].mxu0 %v691_v14  ;;  %661 = vmatmul.mubr.bf16.gmra.mrb[4].mxu1 %v695_v15 }
  0xf5   :  { %v771_v16 = vpop.f32.mrb[0].mxu0  ;;  %v773_v17 = vpop.f32.mrb[0].mxu1 }
  0xf6   :  { %v775_v18 = vpop.f32.mrb[1].mxu0  ;;  %v777_v19 = vpop.f32.mrb[1].mxu1  ;;  %v268_v27 = vmul.f32 %v771_v16, %v771_v16  ;;  %v276_v59 = vmul.f32 %v773_v17, %v773_v17 }
  0xf7   :  { %v779_v20 = vpop.f32.mrb[2].mxu0  ;;  %v781_v21 = vpop.f32.mrb[2].mxu1  ;;  %v266_v24 = vmul.f32 %v775_v18, %v775_v18  ;;  %v274_v53 = vmul.f32 %v777_v19, %v777_v19 }
  0xf8   :  { %v783_v22 = vpop.f32.mrb[3].mxu0  ;;  %v785_v23 = vpop.f32.mrb[3].mxu1  ;;  %v269_v30 = vmul.f32 %v779_v20, %v779_v20  ;;  %v277_v62 = vmul.f32 %v781_v21, %v781_v21 }
  0xf9   :  { %v243_v25 = vadd.f32 %v783_v22, %v775_v18  ;;  %v267_v26 = vmul.f32 %v783_v22, %v783_v22  ;;  %v275_v58 = vmul.f32 %v785_v23, %v785_v23 }
  0xfb   :  { %v244_v28 = vadd.f32 %v771_v16, %v243_v25  ;;  %v282_v29 = vadd.f32 %v267_v26, %v266_v24 }
  0xfd   :  { %v283_v31 = vadd.f32 %v282_v29, %v268_v27  ;;  %v798_v32 = vpop.f32.mrb[4].mxu0  ;;  %v245_v33 = vadd.f32 %v779_v20, %v244_v28  ;;  %v801_v34 = vpop.f32.mrb[4].mxu1 }
  0xfe   :  { %v803_v35 = vpop.f32.mrb[5].mxu0  ;;  %v805_v36 = vpop.f32.mrb[5].mxu1  ;;  %v272_v47 = vmul.f32 %v798_v32, %v798_v32  ;;  %v280_v7 = vmul.f32 %v801_v34, %v801_v34 }
  0xff   :  { %v246_v37 = vadd.f32 %v245_v33, %v803_v35  ;;  %v270_v38 = vmul.f32 %v803_v35, %v803_v35  ;;  %v284_v39 = vadd.f32 %v283_v31, %v269_v30  ;;  %v810_v40 = vpop.f32.mrb[6].mxu0  ;;  %v812_v41 = vpop.f32.mrb[6].mxu1  ;;  %v278_v1 = vmul.f32 %v805_v36, %v805_v36 }
 0x100   :  { %v814_v42 = vpop.f32.mrb[7].mxu0  ;;  %v816_v43 = vpop.f32.mrb[7].mxu1  ;;  %v273_v50 = vmul.f32 %v810_v40, %v810_v40  ;;  %v281_v10 = vmul.f32 %v812_v41, %v812_v41 }
 0x101   :  { %v285_v44 = vadd.f32 %v284_v39, %v270_v38  ;;  %v247_v45 = vadd.f32 %v246_v37, %v814_v42  ;;  %v271_v46 = vmul.f32 %v814_v42, %v814_v42  ;;  %v279_v6 = vmul.f32 %v816_v43, %v816_v43 }
 0x103   :  { %v248_v48 = vadd.f32 %v798_v32, %v247_v45  ;;  %v286_v49 = vadd.f32 %v285_v44, %v271_v46 }
 0x105   :  { %v287_v51 = vadd.f32 %v286_v49, %v272_v47  ;;  %v249_v52 = vadd.f32 %v810_v40, %v248_v48 }
 0x107   :  { %v250_v54 = vadd.f32 %v249_v52, %v777_v19  ;;  %v288_v55 = vadd.f32 %v287_v51, %v273_v50 }
 0x109   :  { %v289_v56 = vadd.f32 %v288_v55, %v274_v53  ;;  %v251_v57 = vadd.f32 %v250_v54, %v785_v23 }
 0x10b   :  { %v252_v60 = vadd.f32 %v773_v17, %v251_v57  ;;  %v290_v61 = vadd.f32 %v289_v56, %v275_v58 }
 0x10d   :  { %v291_v63 = vadd.f32 %v290_v61, %v276_v59  ;;  %v253_v0 = vadd.f32 %v781_v21, %v252_v60 }
 0x10f   :  { %v254_v2 = vadd.f32 %v253_v0, %v805_v36  ;;  %v292_v3 = vadd.f32 %v291_v63, %v277_v62 }
 0x111   :  { %v293_v4 = vadd.f32 %v292_v3, %v278_v1  ;;  %v255_v5 = vadd.f32 %v254_v2, %v816_v43 }
 0x113   :  { %v256_v8 = vadd.f32 %v801_v34, %v255_v5  ;;  %v294_v9 = vadd.f32 %v293_v4, %v279_v6 }
 0x115   :  { %v257_v11 = vadd.f32 %v812_v41, %v256_v8  ;;  %v295_v12 = vadd.f32 %v294_v9, %v280_v7 }
 0x117   :  { %v258_v13 = vrot.slane %v257_v11, 4  ;;  %v296_v14 = vadd.f32 %v295_v12, %v281_v10  ;;  %v536_v10 = vld [vmem:[%s916_s3] ss:$0 sm:$0xff] }
 0x119   :  { %v259_v15 = vadd.f32 %v258_v13, %v257_v11  ;;  %v297_v24 = vrot.slane %v296_v14, 4 }
 0x11b   :  { %v260_v25 = vrot.slane %v259_v15, 2  ;;  %v298_v26 = vadd.f32 %v297_v24, %v296_v14 }
 0x11d   :  { %v261_v27 = vadd.f32 %v260_v25, %v259_v15  ;;  %v299_v28 = vrot.slane %v298_v26, 2 }
 0x11f   :  { %v262_v29 = vrot.slane %v261_v27, 1  ;;  %v300_v30 = vadd.f32 %v299_v28, %v298_v26 }
 0x121   :  { %v263_v31 = vadd.f32 %v262_v29, %v261_v27  ;;  %v301_v33 = vrot.slane %v300_v30, 1 }
 0x123   :  { %v265_v37 = vmul.f32 0.0078125, %v263_v31  ;;  %v302_v38 = vadd.f32 %v301_v33, %v300_v30 }
 0x125   :  { %v303_v39 = vmul.f32 0.0078125, %v302_v38  ;;  %v304_v44 = vmul.f32 %v265_v37, %v265_v37  ;;  %v307_v45 = vsub.f32 %v775_v18, %v265_v37  ;;  %v308_v46 = vsub.f32 %v783_v22, %v265_v37 }
 0x126   :  { %v309_v47 = vsub.f32 %v771_v16, %v265_v37  ;;  %v310_v48 = vsub.f32 %v779_v20, %v265_v37  ;;  %v311_v49 = vsub.f32 %v803_v35, %v265_v37  ;;  %v312_v50 = vsub.f32 %v814_v42, %v265_v37 }
 0x127   :  { %v305_v51 = vsub.f32 %v303_v39, %v304_v44  ;;  %v313_v52 = vsub.f32 %v798_v32, %v265_v37  ;;  %v314_v53 = vsub.f32 %v810_v40, %v265_v37  ;;  %v315_v54 = vsub.f32 %v777_v19, %v265_v37 }
 0x128   :  { %v316_v55 = vsub.f32 %v785_v23, %v265_v37  ;;  %v317_v18 = vsub.f32 %v773_v17, %v265_v37  ;;  %v318_v22 = vsub.f32 %v781_v21, %v265_v37  ;;  %v319_v16 = vsub.f32 %v805_v36, %v265_v37  ;;  %v535_v36 = vld [vmem:[%s915_s2] ss:$0 sm:$0xff] }
 0x129   :  { %v306_v20 = vmax.f32 %v305_v51, 0.0  ;;  %v320_v35 = vsub.f32 %v816_v43, %v265_v37  ;;  %v321_v42 = vsub.f32 %v801_v34, %v265_v37  ;;  %v322_v56 = vsub.f32 %v812_v41, %v265_v37 }
 0x12b   :  { %v323_v32 = vadd.f32 1e-05, %v306_v20 }
 0x12d   :  { %696 = vrsqrt.f32 %v323_v32 }
 0x137   :  { %v697_v40 = vpop.eup %696 }
 0x138   :  { %v325_v57 = vmul.f32 %v697_v40, %v307_v45  ;;  %v326_v19 = vmul.f32 %v697_v40, %v308_v46  ;;  %v327_v58 = vmul.f32 %v697_v40, %v309_v47  ;;  %v328_v23 = vmul.f32 %v697_v40, %v310_v48 }
 0x139   :  { %v329_v59 = vmul.f32 %v697_v40, %v311_v49  ;;  %v330_v17 = vmul.f32 %v697_v40, %v312_v50  ;;  %v331_v60 = vmul.f32 %v697_v40, %v313_v52  ;;  %v332_v21 = vmul.f32 %v697_v40, %v314_v53 }
 0x13a   :  { %v333_v43 = vmul.f32 %v697_v40, %v315_v54  ;;  %v334_v61 = vmul.f32 %v697_v40, %v316_v55  ;;  %v335_v34 = vmul.f32 %v697_v40, %v317_v18  ;;  %v336_v62 = vmul.f32 %v697_v40, %v318_v22 }
 0x13b   :  { %v337_v41 = vmul.f32 %v697_v40, %v319_v16  ;;  %v338_v63 = vmul.f32 %v697_v40, %v320_v35  ;;  %v339_v0 = vmul.f32 %v697_v40, %v321_v42  ;;  %v340_v1 = vmul.f32 %v697_v40, %v322_v56 }
 0x13c   :  { %v348_v2 = vmul.f32 %v535_v36, %v325_v57  ;;  %v349_v3 = vmul.f32 %v535_v36, %v326_v19  ;;  %v350_v4 = vmul.f32 %v535_v36, %v327_v58  ;;  %v351_v5 = vmul.f32 %v535_v36, %v328_v23 }
 0x13d   :  { %v352_v6 = vmul.f32 %v535_v36, %v329_v59  ;;  %v353_v7 = vmul.f32 %v535_v36, %v330_v17  ;;  %v354_v8 = vmul.f32 %v535_v36, %v331_v60  ;;  %v355_v9 = vmul.f32 %v535_v36, %v332_v21 }
 0x13e   :  { %v356_v11 = vmul.f32 %v535_v36, %v333_v43  ;;  %v357_v12 = vmul.f32 %v535_v36, %v334_v61  ;;  %v358_v13 = vmul.f32 %v535_v36, %v335_v34  ;;  %v359_v14 = vmul.f32 %v535_v36, %v336_v62 }
 0x13f   :  { %v360_v15 = vmul.f32 %v535_v36, %v337_v41  ;;  %v361_v24 = vmul.f32 %v535_v36, %v338_v63  ;;  %v362_v25 = vmul.f32 %v535_v36, %v339_v0  ;;  %v363_v26 = vmul.f32 %v535_v36, %v340_v1 }
 0x140   :  { %v371_v27 = vadd.f32 %v536_v10, %v348_v2  ;;  %v372_v28 = vadd.f32 %v536_v10, %v349_v3  ;;  %v373_v29 = vadd.f32 %v536_v10, %v350_v4  ;;  %v374_v30 = vadd.f32 %v536_v10, %v351_v5 }
 0x141   :  { %v375_v31 = vadd.f32 %v536_v10, %v352_v6  ;;  %v376_v33 = vadd.f32 %v536_v10, %v353_v7  ;;  %v377_v37 = vadd.f32 %v536_v10, %v354_v8  ;;  %v378_v38 = vadd.f32 %v536_v10, %v355_v9 }
 0x142   :  { %v379_v39 = vadd.f32 %v536_v10, %v356_v11  ;;  %v380_v44 = vadd.f32 %v536_v10, %v357_v12  ;;  %v381_v45 = vadd.f32 %v536_v10, %v358_v13  ;;  %v382_v46 = vadd.f32 %v536_v10, %v359_v14 }
 0x143   :  { %v383_v47 = vadd.f32 %v536_v10, %v360_v15  ;;  %v384_v48 = vadd.f32 %v536_v10, %v361_v24  ;;  %v385_v49 = vadd.f32 %v536_v10, %v362_v25  ;;  %v386_v50 = vadd.f32 %v536_v10, %v363_v26 }
 0x144   :  { %vm387_vm0 = vcmp.ge.f32.partialorder %v371_v27, 0.0  ;;  %vm388_vm1 = vcmp.ge.f32.partialorder %v372_v28, 0.0  ;;  %vm389_vm2 = vcmp.ge.f32.partialorder %v373_v29, 0.0  ;;  %vm390_vm3 = vcmp.ge.f32.partialorder %v374_v30, 0.0 }
 0x145   :  { %vm391_vm4 = vcmp.ge.f32.partialorder %v375_v31, 0.0  ;;  %vm392_vm5 = vcmp.ge.f32.partialorder %v376_v33, 0.0  ;;  %vm393_vm6 = vcmp.ge.f32.partialorder %v377_v37, 0.0  ;;  %vm394_vm7 = vcmp.ge.f32.partialorder %v378_v38, 0.0 }
 0x146   :  { %vm395_vm8 = vcmp.ge.f32.partialorder %v379_v39, 0.0  ;;  %vm396_vm9 = vcmp.ge.f32.partialorder %v380_v44, 0.0  ;;  %vm397_vm10 = vcmp.ge.f32.partialorder %v381_v45, 0.0  ;;  %vm398_vm11 = vcmp.ge.f32.partialorder %v382_v46, 0.0 }
 0x147   :  { %vm399_vm12 = vcmp.ge.f32.partialorder %v383_v47, 0.0  ;;  %vm400_vm13 = vcmp.ge.f32.partialorder %v384_v48, 0.0  ;;  %vm401_vm14 = vcmp.ge.f32.partialorder %v385_v49, 0.0  ;;  %vm402_vm15 = vcmp.ge.f32.partialorder %v386_v50, 0.0 }
 0x148   :  { %v403_v51 = vmul.f32 0.01, %v371_v27  ;;  %v404_v52 = vmul.f32 0.01, %v372_v28  ;;  %v405_v53 = vmul.f32 0.01, %v373_v29 }
 0x149   :  { %v406_v54 = vmul.f32 0.01, %v374_v30  ;;  %v407_v55 = vmul.f32 0.01, %v375_v31  ;;  %v408_v18 = vmul.f32 0.01, %v376_v33 }
 0x14a   :  { %v409_v22 = vmul.f32 0.01, %v377_v37  ;;  %v410_v16 = vmul.f32 0.01, %v378_v38  ;;  %v411_v20 = vmul.f32 0.01, %v379_v39  ;;  %v419_v35 = vsel %vm387_vm0, %v371_v27, %v403_v51 }
 0x14b   :  { %v412_v42 = vmul.f32 0.01, %v380_v44  ;;  %v413_v56 = vmul.f32 0.01, %v381_v45  ;;  %v414_v32 = vmul.f32 0.01, %v382_v46  ;;  %v420_v40 = vsel %vm388_vm1, %v372_v28, %v404_v52 }
 0x14c   :  { %v415_v57 = vmul.f32 0.01, %v383_v47  ;;  %v416_v19 = vmul.f32 0.01, %v384_v48  ;;  %v417_v58 = vmul.f32 0.01, %v385_v49  ;;  %v421_v23 = vsel %vm389_vm2, %v373_v29, %v405_v53 }
 0x14d   :  { %v418_v59 = vmul.f32 0.01, %v386_v50  ;;  %v422_v17 = vsel %vm390_vm3, %v374_v30, %v406_v54  ;;  %v423_v60 = vsel %vm391_vm4, %v375_v31, %v407_v55  ;;  %v424_v21 = vsel %vm392_vm5, %v376_v33, %v408_v18 }
 0x14e   :  { %v425_v36 = vsel %vm393_vm6, %v377_v37, %v409_v22  ;;  %v426_v43 = vsel %vm394_vm7, %v378_v38, %v410_v16  ;;  %v427_v61 = vsel %vm395_vm8, %v379_v39, %v411_v20  ;;  %v428_v34 = vsel %vm396_vm9, %v380_v44, %v412_v42 }
 0x14f   :  { %v429_v62 = vsel %vm397_vm10, %v381_v45, %v413_v56  ;;  %v430_v41 = vsel %vm398_vm11, %v382_v46, %v414_v32  ;;  %v431_v63 = vsel %vm399_vm12, %v383_v47, %v415_v57  ;;  %v432_v0 = vsel %vm400_vm13, %v384_v48, %v416_v19 }
 0x150   :  { %v433_v1 = vsel %vm401_vm14, %v385_v49, %v417_v58  ;;  %v434_v2 = vsel %vm402_vm15, %v386_v50, %v418_v59  ;;  %v572_v3 = vpack.c.bf16 %v420_v40, %v419_v35  ;;  %v577_v4 = vpack.c.bf16 %v422_v17, %v421_v23 }
 0x151   :  { %v582_v5 = vpack.c.bf16 %v424_v21, %v423_v60  ;;  %v587_v6 = vpack.c.bf16 %v426_v43, %v425_v36  ;;  %v592_v7 = vpack.c.bf16 %v428_v34, %v427_v61  ;;  %v597_v8 = vpack.c.bf16 %v430_v41, %v429_v62 }
 0x152   :  { %573 = vst [vmem:[%s917_s4] sm:$0xff] %v572_v3   ;;  %609 = vst [vmem:[%s917_s4 + $0x8] sm:$0xff] %v577_v4   ;;  %v602_v9 = vpack.c.bf16 %v432_v0, %v431_v63  ;;  %v607_v10 = vpack.c.bf16 %v434_v2, %v433_v1 }
 0x153   :  { %610 = vst [vmem:[%s917_s4 + $0x10] sm:$0xff] %v582_v5   ;;  %611 = vst [vmem:[%s917_s4 + $0x18] sm:$0xff] %v587_v6  }
 0x154   :  { %612 = vst [vmem:[%s917_s4 + $0x20] sm:$0xff] %v592_v7   ;;  %613 = vst [vmem:[%s917_s4 + $0x28] sm:$0xff] %v597_v8  }
 0x155   :  { %614 = vst [vmem:[%s917_s4 + $0x30] sm:$0xff] %v602_v9   ;;  %615 = vst [vmem:[%s917_s4 + $0x38] sm:$0xff] %v607_v10  }

// kernel: vae_forward.18
= control target key start
LH: loop header
LB: loop body
LE: loop exit
PB: predicated region body
PF: predicated region fallthrough
CT: control target
= control target key end

     0   :  { %s1116_s1 = inlined_call_operand.vmem [shape: bf16[128,128], index: 1, kind: input, shape index: {}]   ;;  %s1117_s0 = inlined_call_operand.vmem [shape: bf16[128,128], index: 0, kind: input, shape index: {}]   ;;  %s1118_s4 = inlined_call_operand.vmem [shape: bf16[128,128], index: 4, kind: input, shape index: {}]   ;;  %s1119_s2 = inlined_call_operand.vmem [shape: f32[1,128], index: 2, kind: input, shape index: {}]   ;;  %s1120_s3 = inlined_call_operand.vmem [shape: f32[1,128], index: 3, kind: input, shape index: {}]   ;;  %s1121_s5 = inlined_call_operand.vmem [shape: bf16[128,128], index: 5, kind: output, shape index: {}]  }
   0x1   :  { %v770_v0 = vld [vmem:[%s1116_s1] sm:$0xff]   ;;  %v771_v1 = vld [vmem:[%s1116_s1 + $0x8] sm:$0xff]   ;;  %v772_v2 = vld [vmem:[%s1116_s1 + $0x10] sm:$0xff]  }
   0x2   :  { %722 = vmatprep.subr.bf16.mxu0 %v770_v0  ;;  %754 = vmatprep.subr.bf16.mxu1 %v770_v0  ;;  %v773_v3 = vld [vmem:[%s1116_s1 + $0x18] sm:$0xff]   ;;  %v778_v4 = vld [vmem:[%s1117_s0] sm:$0xff]   ;;  %v775_v7 = vld [vmem:[%s1116_s1 + $0x28] sm:$0xff]  }
   0x3   :  { %723 = vmatpush3.bf16.msra.mxu0 %v770_v0  ;;  %762 = vmatpush3.bf16.msra.mxu1 %v770_v0  ;;  %v774_v5 = vld [vmem:[%s1116_s1 + $0x20] sm:$0xff]   ;;  %v776_v8 = vld [vmem:[%s1116_s1 + $0x30] sm:$0xff]   ;;  %v777_v9 = vld [vmem:[%s1116_s1 + $0x38] sm:$0xff]  }
   0x4   :  { %724 = vmatprep.subr.bf16.mxu0 %v771_v1  ;;  %755 = vmatprep.subr.bf16.mxu1 %v771_v1  ;;  %v782_v6 = vld [vmem:[%s1117_s0 + $0x20] sm:$0xff]   ;;  %v779_v10 = vld [vmem:[%s1117_s0 + $0x8] sm:$0xff]   ;;  %v780_v12 = vld [vmem:[%s1117_s0 + $0x10] sm:$0xff]  }
   0x5   :  { %738 = vmatprep.mubr.bf16.mxu0 %v778_v4  ;;  %746 = vmatprep.mubr.bf16.mxu1 %v782_v6  ;;  %v783_v11 = vld [vmem:[%s1117_s0 + $0x28] sm:$0xff]   ;;  %v784_v13 = vld [vmem:[%s1117_s0 + $0x30] sm:$0xff]   ;;  %v781_v14 = vld [vmem:[%s1117_s0 + $0x18] sm:$0xff]  }
   0x6   :  { %v785_v15 = vld [vmem:[%s1117_s0 + $0x38] sm:$0xff]  }
   0x7   :  { %725 = vmatpush3.bf16.msra.mxu0 %v771_v1  ;;  %763 = vmatpush3.bf16.msra.mxu1 %v771_v1 }
   0x8   :  { %726 = vmatprep.subr.bf16.mxu0 %v772_v2  ;;  %756 = vmatprep.subr.bf16.mxu1 %v772_v2 }
   0xb   :  { %727 = vmatpush3.bf16.msra.mxu0 %v772_v2  ;;  %764 = vmatpush3.bf16.msra.mxu1 %v772_v2 }
   0xc   :  { %728 = vmatprep.subr.bf16.mxu0 %v773_v3  ;;  %757 = vmatprep.subr.bf16.mxu1 %v773_v3 }
   0xf   :  { %729 = vmatpush3.bf16.msra.mxu0 %v773_v3  ;;  %765 = vmatpush3.bf16.msra.mxu1 %v773_v3 }
  0x10   :  { %730 = vmatprep.subr.bf16.mxu0 %v774_v5  ;;  %758 = vmatprep.subr.bf16.mxu1 %v774_v5 }
  0x13   :  { %731 = vmatpush3.bf16.msra.mxu0 %v774_v5  ;;  %766 = vmatpush3.bf16.msra.mxu1 %v774_v5 }
  0x14   :  { %732 = vmatprep.subr.bf16.mxu0 %v775_v7  ;;  %759 = vmatprep.subr.bf16.mxu1 %v775_v7 }
  0x17   :  { %733 = vmatpush3.bf16.msra.mxu0 %v775_v7  ;;  %767 = vmatpush3.bf16.msra.mxu1 %v775_v7 }
  0x18   :  { %734 = vmatprep.subr.bf16.mxu0 %v776_v8  ;;  %760 = vmatprep.subr.bf16.mxu1 %v776_v8 }
  0x1b   :  { %735 = vmatpush3.bf16.msra.mxu0 %v776_v8  ;;  %768 = vmatpush3.bf16.msra.mxu1 %v776_v8 }
  0x1c   :  { %736 = vmatprep.subr.bf16.mxu0 %v777_v9  ;;  %761 = vmatprep.subr.bf16.mxu1 %v777_v9 }
  0x1f   :  { %737 = vmatpush3.bf16.msra.mxu0 %v777_v9  ;;  %769 = vmatpush3.bf16.msra.mxu1 %v777_v9 }
  0x22   :  { %739 = vmatmul.mubr.bf16.vlgmr.msra.gmra.mrb[0].mxu0 %v779_v10  ;;  %747 = vmatmul.mubr.bf16.vlgmr.msra.gmra.mrb[0].mxu1 %v783_v11 }
  0x23   :  { %742 = vmatprep.mubr.bf16.mxu0 %v780_v12  ;;  %750 = vmatprep.mubr.bf16.mxu1 %v784_v13 }
  0x2a   :  { %743 = vmatmul.mubr.bf16.gmra.mrb[4].mxu0 %v781_v14  ;;  %751 = vmatmul.mubr.bf16.gmra.mrb[4].mxu1 %v785_v15 }
  0xf5   :  { %v866_v16 = vpop.f32.mrb[0].mxu0  ;;  %v868_v17 = vpop.f32.mrb[0].mxu1 }
  0xf6   :  { %v870_v18 = vpop.f32.mrb[1].mxu0  ;;  %v872_v19 = vpop.f32.mrb[1].mxu1  ;;  %v271_v27 = vmul.f32 %v866_v16, %v866_v16  ;;  %v279_v59 = vmul.f32 %v868_v17, %v868_v17 }
  0xf7   :  { %v874_v20 = vpop.f32.mrb[2].mxu0  ;;  %v876_v21 = vpop.f32.mrb[2].mxu1  ;;  %v269_v24 = vmul.f32 %v870_v18, %v870_v18  ;;  %v277_v53 = vmul.f32 %v872_v19, %v872_v19 }
  0xf8   :  { %v878_v22 = vpop.f32.mrb[3].mxu0  ;;  %v880_v23 = vpop.f32.mrb[3].mxu1  ;;  %v272_v30 = vmul.f32 %v874_v20, %v874_v20  ;;  %v280_v62 = vmul.f32 %v876_v21, %v876_v21 }
  0xf9   :  { %v246_v25 = vadd.f32 %v878_v22, %v870_v18  ;;  %v270_v26 = vmul.f32 %v878_v22, %v878_v22  ;;  %v278_v58 = vmul.f32 %v880_v23, %v880_v23 }
  0xfb   :  { %v247_v28 = vadd.f32 %v866_v16, %v246_v25  ;;  %v285_v29 = vadd.f32 %v270_v26, %v269_v24 }
  0xfd   :  { %v286_v31 = vadd.f32 %v285_v29, %v271_v27  ;;  %v893_v32 = vpop.f32.mrb[4].mxu0  ;;  %v248_v33 = vadd.f32 %v874_v20, %v247_v28  ;;  %v896_v34 = vpop.f32.mrb[4].mxu1 }
  0xfe   :  { %v898_v35 = vpop.f32.mrb[5].mxu0  ;;  %v900_v36 = vpop.f32.mrb[5].mxu1  ;;  %v275_v47 = vmul.f32 %v893_v32, %v893_v32  ;;  %v283_v7 = vmul.f32 %v896_v34, %v896_v34 }
  0xff   :  { %v249_v37 = vadd.f32 %v248_v33, %v898_v35  ;;  %v273_v38 = vmul.f32 %v898_v35, %v898_v35  ;;  %v287_v39 = vadd.f32 %v286_v31, %v272_v30  ;;  %v905_v40 = vpop.f32.mrb[6].mxu0  ;;  %v907_v41 = vpop.f32.mrb[6].mxu1  ;;  %v281_v1 = vmul.f32 %v900_v36, %v900_v36 }
 0x100   :  { %v909_v42 = vpop.f32.mrb[7].mxu0  ;;  %v911_v43 = vpop.f32.mrb[7].mxu1  ;;  %v276_v50 = vmul.f32 %v905_v40, %v905_v40  ;;  %v284_v10 = vmul.f32 %v907_v41, %v907_v41 }
 0x101   :  { %v288_v44 = vadd.f32 %v287_v39, %v273_v38  ;;  %v250_v45 = vadd.f32 %v249_v37, %v909_v42  ;;  %v274_v46 = vmul.f32 %v909_v42, %v909_v42  ;;  %v282_v6 = vmul.f32 %v911_v43, %v911_v43 }
 0x103   :  { %v251_v48 = vadd.f32 %v893_v32, %v250_v45  ;;  %v289_v49 = vadd.f32 %v288_v44, %v274_v46 }
 0x105   :  { %v290_v51 = vadd.f32 %v289_v49, %v275_v47  ;;  %v252_v52 = vadd.f32 %v905_v40, %v251_v48 }
 0x107   :  { %v253_v54 = vadd.f32 %v252_v52, %v872_v19  ;;  %v291_v55 = vadd.f32 %v290_v51, %v276_v50 }
 0x109   :  { %v292_v56 = vadd.f32 %v291_v55, %v277_v53  ;;  %v254_v57 = vadd.f32 %v253_v54, %v880_v23 }
 0x10b   :  { %v255_v60 = vadd.f32 %v868_v17, %v254_v57  ;;  %v293_v61 = vadd.f32 %v292_v56, %v278_v58  ;;  %v1019_v58 = vld [vmem:[%s1118_s4 + $0x30] sm:$0xff]  }
 0x10d   :  { %v294_v63 = vadd.f32 %v293_v61, %v279_v59  ;;  %v256_v0 = vadd.f32 %v876_v21, %v255_v60  ;;  %v1024_v59 = vld [vmem:[%s1118_s4 + $0x38] sm:$0xff]  }
 0x10f   :  { %v257_v2 = vadd.f32 %v256_v0, %v900_v36  ;;  %v295_v3 = vadd.f32 %v294_v63, %v280_v62 }
 0x111   :  { %v296_v4 = vadd.f32 %v295_v3, %v281_v1  ;;  %v258_v5 = vadd.f32 %v257_v2, %v911_v43 }
 0x113   :  { %v259_v8 = vadd.f32 %v896_v34, %v258_v5  ;;  %v297_v9 = vadd.f32 %v296_v4, %v282_v6  ;;  %v646_v5 = vunpack.c.l.bf16 %v1019_v58  ;;  %v647_v6 = vunpack.c.h.bf16 %v1019_v58 }
 0x115   :  { %v260_v11 = vadd.f32 %v907_v41, %v259_v8  ;;  %v298_v12 = vadd.f32 %v297_v9, %v283_v7  ;;  %v650_v7 = vunpack.c.l.bf16 %v1024_v59  ;;  %v651_v8 = vunpack.c.h.bf16 %v1024_v59 }
 0x117   :  { %v261_v13 = vrot.slane %v260_v11, 4  ;;  %v299_v14 = vadd.f32 %v298_v12, %v284_v10 }
 0x119   :  { %v262_v15 = vadd.f32 %v261_v13, %v260_v11  ;;  %v300_v24 = vrot.slane %v299_v14, 4 }
 0x11b   :  { %v263_v25 = vrot.slane %v262_v15, 2  ;;  %v301_v26 = vadd.f32 %v300_v24, %v299_v14 }
 0x11d   :  { %v264_v27 = vadd.f32 %v263_v25, %v262_v15  ;;  %v302_v28 = vrot.slane %v301_v26, 2  ;;  %v586_v25 = vld [vmem:[%s1119_s2] ss:$0 sm:$0xff] }
 0x11f   :  { %v265_v29 = vrot.slane %v264_v27, 1  ;;  %v303_v30 = vadd.f32 %v302_v28, %v301_v26 }
 0x121   :  { %v266_v31 = vadd.f32 %v265_v29, %v264_v27  ;;  %v304_v33 = vrot.slane %v303_v30, 1 }
 0x123   :  { %v946_v37 = vmul.f32 0.0078125, %v266_v31  ;;  %v305_v38 = vadd.f32 %v304_v33, %v303_v30 }
 0x125   :  { %v306_v39 = vmul.f32 0.0078125, %v305_v38  ;;  %v307_v44 = vmul.f32 %v946_v37, %v946_v37  ;;  %v310_v45 = vsub.f32 %v870_v18, %v946_v37  ;;  %v311_v46 = vsub.f32 %v878_v22, %v946_v37 }
 0x126   :  { %v312_v47 = vsub.f32 %v866_v16, %v946_v37  ;;  %v313_v48 = vsub.f32 %v874_v20, %v946_v37  ;;  %v314_v49 = vsub.f32 %v898_v35, %v946_v37  ;;  %v315_v50 = vsub.f32 %v909_v42, %v946_v37 }
 0x127   :  { %v308_v51 = vsub.f32 %v306_v39, %v307_v44  ;;  %v316_v52 = vsub.f32 %v893_v32, %v946_v37  ;;  %v317_v18 = vsub.f32 %v905_v40, %v946_v37  ;;  %v318_v22 = vsub.f32 %v872_v19, %v946_v37 }
 0x128   :  { %v319_v16 = vsub.f32 %v880_v23, %v946_v37  ;;  %v320_v20 = vsub.f32 %v868_v17, %v946_v37  ;;  %v321_v35 = vsub.f32 %v876_v21, %v946_v37  ;;  %v322_v42 = vsub.f32 %v900_v36, %v946_v37  ;;  %v985_v17 = vld [vmem:[%s1118_s4] sm:$0xff]   ;;  %v990_v21 = vld [vmem:[%s1118_s4 + $0x8] sm:$0xff]   ;;  %v995_v36 = vld [vmem:[%s1118_s4 + $0x10] sm:$0xff]  }
 0x129   :  { %v309_v53 = vmax.f32 %v308_v51, 0.0  ;;  %v323_v32 = vsub.f32 %v911_v43, %v946_v37  ;;  %v324_v40 = vsub.f32 %v896_v34, %v946_v37  ;;  %v325_v19 = vsub.f32 %v907_v41, %v946_v37  ;;  %v1000_v34 = vld [vmem:[%s1118_s4 + $0x18] sm:$0xff]   ;;  %v1005_v41 = vld [vmem:[%s1118_s4 + $0x20] sm:$0xff]   ;;  %v1010_v43 = vld [vmem:[%s1118_s4 + $0x28] sm:$0xff]  }
 0x12a   :  { %v622_v54 = vunpack.c.l.bf16 %v985_v17  ;;  %v623_v55 = vunpack.c.h.bf16 %v985_v17  ;;  %v626_v56 = vunpack.c.l.bf16 %v990_v21  ;;  %v627_v57 = vunpack.c.h.bf16 %v990_v21 }
 0x12b   :  { %v326_v23 = vadd.f32 1e-05, %v309_v53  ;;  %v630_v60 = vunpack.c.l.bf16 %v995_v36  ;;  %v631_v61 = vunpack.c.h.bf16 %v995_v36  ;;  %v634_v62 = vunpack.c.l.bf16 %v1000_v34 }
 0x12c   :  { %v635_v63 = vunpack.c.h.bf16 %v1000_v34  ;;  %v638_v0 = vunpack.c.l.bf16 %v1005_v41  ;;  %v639_v1 = vunpack.c.h.bf16 %v1005_v41  ;;  %v642_v2 = vunpack.c.l.bf16 %v1010_v43 }
 0x12d   :  { %786 = vrsqrt.f32 %v326_v23  ;;  %v643_v3 = vunpack.c.h.bf16 %v1010_v43 }
 0x137   :  { %v787_v4 = vpop.eup %786 }
 0x138   :  { %v328_v9 = vmul.f32 %v787_v4, %v310_v45  ;;  %v329_v10 = vmul.f32 %v787_v4, %v311_v46  ;;  %v330_v11 = vmul.f32 %v787_v4, %v312_v47  ;;  %v331_v12 = vmul.f32 %v787_v4, %v313_v48 }
 0x139   :  { %v332_v13 = vmul.f32 %v787_v4, %v314_v49  ;;  %v333_v14 = vmul.f32 %v787_v4, %v315_v50  ;;  %v334_v15 = vmul.f32 %v787_v4, %v316_v52  ;;  %v335_v24 = vmul.f32 %v787_v4, %v317_v18  ;;  %v587_v50 = vld [vmem:[%s1120_s3] ss:$0 sm:$0xff] }
 0x13a   :  { %v336_v26 = vmul.f32 %v787_v4, %v318_v22  ;;  %v337_v27 = vmul.f32 %v787_v4, %v319_v16  ;;  %v338_v28 = vmul.f32 %v787_v4, %v320_v20  ;;  %v339_v29 = vmul.f32 %v787_v4, %v321_v35 }
 0x13b   :  { %v340_v30 = vmul.f32 %v787_v4, %v322_v42  ;;  %v341_v31 = vmul.f32 %v787_v4, %v323_v32  ;;  %v342_v33 = vmul.f32 %v787_v4, %v324_v40  ;;  %v343_v37 = vmul.f32 %v787_v4, %v325_v19 }
 0x13c   :  { %v351_v38 = vmul.f32 %v586_v25, %v328_v9  ;;  %v352_v39 = vmul.f32 %v586_v25, %v329_v10  ;;  %v353_v44 = vmul.f32 %v586_v25, %v330_v11  ;;  %v354_v45 = vmul.f32 %v586_v25, %v331_v12 }
 0x13d   :  { %v355_v46 = vmul.f32 %v586_v25, %v332_v13  ;;  %v356_v47 = vmul.f32 %v586_v25, %v333_v14  ;;  %v357_v48 = vmul.f32 %v586_v25, %v334_v15  ;;  %v358_v49 = vmul.f32 %v586_v25, %v335_v24 }
 0x13e   :  { %v359_v51 = vmul.f32 %v586_v25, %v336_v26  ;;  %v360_v52 = vmul.f32 %v586_v25, %v337_v27  ;;  %v361_v18 = vmul.f32 %v586_v25, %v338_v28  ;;  %v362_v22 = vmul.f32 %v586_v25, %v339_v29 }
 0x13f   :  { %v363_v16 = vmul.f32 %v586_v25, %v340_v30  ;;  %v364_v20 = vmul.f32 %v586_v25, %v341_v31  ;;  %v365_v35 = vmul.f32 %v586_v25, %v342_v33  ;;  %v366_v42 = vmul.f32 %v586_v25, %v343_v37 }
 0x140   :  { %v374_v53 = vadd.f32 %v587_v50, %v351_v38  ;;  %v375_v32 = vadd.f32 %v587_v50, %v352_v39  ;;  %v376_v40 = vadd.f32 %v587_v50, %v353_v44  ;;  %v377_v19 = vadd.f32 %v587_v50, %v354_v45 }
 0x141   :  { %v378_v23 = vadd.f32 %v587_v50, %v355_v46  ;;  %v379_v4 = vadd.f32 %v587_v50, %v356_v47  ;;  %v380_v9 = vadd.f32 %v587_v50, %v357_v48  ;;  %v381_v10 = vadd.f32 %v587_v50, %v358_v49 }
 0x142   :  { %v382_v11 = vadd.f32 %v587_v50, %v359_v51  ;;  %v383_v12 = vadd.f32 %v587_v50, %v360_v52  ;;  %v384_v13 = vadd.f32 %v587_v50, %v361_v18  ;;  %v385_v14 = vadd.f32 %v587_v50, %v362_v22 }
 0x143   :  { %v386_v15 = vadd.f32 %v587_v50, %v363_v16  ;;  %v387_v24 = vadd.f32 %v587_v50, %v364_v20  ;;  %v388_v26 = vadd.f32 %v587_v50, %v365_v35  ;;  %v389_v27 = vadd.f32 %v587_v50, %v366_v42 }
 0x144   :  { %v422_v28 = vadd.f32 %v622_v54, %v374_v53  ;;  %v423_v25 = vadd.f32 %v623_v55, %v375_v32  ;;  %v424_v29 = vadd.f32 %v626_v56, %v376_v40  ;;  %v425_v30 = vadd.f32 %v627_v57, %v377_v19 }
 0x145   :  { %v426_v31 = vadd.f32 %v630_v60, %v378_v23  ;;  %v427_v33 = vadd.f32 %v631_v61, %v379_v4  ;;  %v428_v37 = vadd.f32 %v634_v62, %v380_v9  ;;  %v429_v54 = vadd.f32 %v635_v63, %v381_v10 }
 0x146   :  { %v430_v17 = vadd.f32 %v638_v0, %v382_v11  ;;  %v431_v55 = vadd.f32 %v639_v1, %v383_v12  ;;  %v432_v21 = vadd.f32 %v642_v2, %v384_v13  ;;  %v433_v56 = vadd.f32 %v643_v3, %v385_v14 }
 0x147   :  { %v434_v36 = vadd.f32 %v646_v5, %v386_v15  ;;  %v435_v57 = vadd.f32 %v647_v6, %v387_v24  ;;  %v436_v34 = vadd.f32 %v650_v7, %v388_v26  ;;  %v437_v60 = vadd.f32 %v651_v8, %v389_v27 }
 0x148   :  { %vm438_vm0 = vcmp.ge.f32.partialorder %v422_v28, 0.0  ;;  %vm439_vm1 = vcmp.ge.f32.partialorder %v423_v25, 0.0  ;;  %vm440_vm2 = vcmp.ge.f32.partialorder %v424_v29, 0.0  ;;  %vm441_vm3 = vcmp.ge.f32.partialorder %v425_v30, 0.0 }
 0x149   :  { %vm442_vm4 = vcmp.ge.f32.partialorder %v426_v31, 0.0  ;;  %vm443_vm5 = vcmp.ge.f32.partialorder %v427_v33, 0.0  ;;  %vm444_vm6 = vcmp.ge.f32.partialorder %v428_v37, 0.0  ;;  %vm445_vm7 = vcmp.ge.f32.partialorder %v429_v54, 0.0 }
 0x14a   :  { %vm446_vm8 = vcmp.ge.f32.partialorder %v430_v17, 0.0  ;;  %vm447_vm9 = vcmp.ge.f32.partialorder %v431_v55, 0.0  ;;  %vm448_vm10 = vcmp.ge.f32.partialorder %v432_v21, 0.0  ;;  %vm449_vm11 = vcmp.ge.f32.partialorder %v433_v56, 0.0 }
 0x14b   :  { %vm450_vm12 = vcmp.ge.f32.partialorder %v434_v36, 0.0  ;;  %vm451_vm13 = vcmp.ge.f32.partialorder %v435_v57, 0.0  ;;  %vm452_vm14 = vcmp.ge.f32.partialorder %v436_v34, 0.0  ;;  %vm453_vm15 = vcmp.ge.f32.partialorder %v437_v60, 0.0 }
 0x14c   :  { %v454_v41 = vmul.f32 0.01, %v422_v28  ;;  %v455_v43 = vmul.f32 0.01, %v423_v25  ;;  %v456_v58 = vmul.f32 0.01, %v424_v29 }
 0x14d   :  { %v457_v59 = vmul.f32 0.01, %v425_v30  ;;  %v458_v61 = vmul.f32 0.01, %v426_v31  ;;  %v459_v62 = vmul.f32 0.01, %v427_v33 }
 0x14e   :  { %v460_v63 = vmul.f32 0.01, %v428_v37  ;;  %v461_v0 = vmul.f32 0.01, %v429_v54  ;;  %v462_v1 = vmul.f32 0.01, %v430_v17  ;;  %v470_v2 = vsel %vm438_vm0, %v422_v28, %v454_v41 }
 0x14f   :  { %v463_v3 = vmul.f32 0.01, %v431_v55  ;;  %v464_v5 = vmul.f32 0.01, %v432_v21  ;;  %v465_v6 = vmul.f32 0.01, %v433_v56  ;;  %v471_v7 = vsel %vm439_vm1, %v423_v25, %v455_v43 }
 0x150   :  { %v466_v8 = vmul.f32 0.01, %v434_v36  ;;  %v467_v38 = vmul.f32 0.01, %v435_v57  ;;  %v468_v39 = vmul.f32 0.01, %v436_v34  ;;  %v472_v44 = vsel %vm440_vm2, %v424_v29, %v456_v58 }
 0x151   :  { %v469_v45 = vmul.f32 0.01, %v437_v60  ;;  %v473_v46 = vsel %vm441_vm3, %v425_v30, %v457_v59  ;;  %v474_v47 = vsel %vm442_vm4, %v426_v31, %v458_v61  ;;  %v475_v48 = vsel %vm443_vm5, %v427_v33, %v459_v62 }
 0x152   :  { %v476_v49 = vsel %vm444_vm6, %v428_v37, %v460_v63  ;;  %v477_v50 = vsel %vm445_vm7, %v429_v54, %v461_v0  ;;  %v478_v51 = vsel %vm446_vm8, %v430_v17, %v462_v1  ;;  %v479_v52 = vsel %vm447_vm9, %v431_v55, %v463_v3 }
 0x153   :  { %v480_v18 = vsel %vm448_vm10, %v432_v21, %v464_v5  ;;  %v481_v22 = vsel %vm449_vm11, %v433_v56, %v465_v6  ;;  %v482_v16 = vsel %vm450_vm12, %v434_v36, %v466_v8  ;;  %v483_v20 = vsel %vm451_vm13, %v435_v57, %v467_v38 }
 0x154   :  { %v484_v35 = vsel %vm452_vm14, %v436_v34, %v468_v39  ;;  %v485_v42 = vsel %vm453_vm15, %v437_v60, %v469_v45  ;;  %v655_v53 = vpack.c.bf16 %v471_v7, %v470_v2  ;;  %v660_v32 = vpack.c.bf16 %v473_v46, %v472_v44 }
 0x155   :  { %v665_v40 = vpack.c.bf16 %v475_v48, %v474_v47  ;;  %v670_v19 = vpack.c.bf16 %v477_v50, %v476_v49  ;;  %v675_v23 = vpack.c.bf16 %v479_v52, %v478_v51  ;;  %v680_v4 = vpack.c.bf16 %v481_v22, %v480_v18 }
 0x156   :  { %656 = vst [vmem:[%s1121_s5] sm:$0xff] %v655_v53   ;;  %699 = vst [vmem:[%s1121_s5 + $0x8] sm:$0xff] %v660_v32   ;;  %v685_v9 = vpack.c.bf16 %v483_v20, %v482_v16  ;;  %v690_v10 = vpack.c.bf16 %v485_v42, %v484_v35 }
 0x157   :  { %700 = vst [vmem:[%s1121_s5 + $0x10] sm:$0xff] %v665_v40   ;;  %701 = vst [vmem:[%s1121_s5 + $0x18] sm:$0xff] %v670_v19  }
 0x158   :  { %702 = vst [vmem:[%s1121_s5 + $0x20] sm:$0xff] %v675_v23   ;;  %703 = vst [vmem:[%s1121_s5 + $0x28] sm:$0xff] %v680_v4  }
 0x159   :  { %704 = vst [vmem:[%s1121_s5 + $0x30] sm:$0xff] %v685_v9   ;;  %705 = vst [vmem:[%s1121_s5 + $0x38] sm:$0xff] %v690_v10  }

// kernel: vae_forward.17
= control target key start
LH: loop header
LB: loop body
LE: loop exit
PB: predicated region body
PF: predicated region fallthrough
CT: control target
= control target key end

     0   :  { %s849_s1 = inlined_call_operand.vmem [shape: bf16[128,128], index: 1, kind: input, shape index: {}]   ;;  %s850_s0 = inlined_call_operand.vmem [shape: bf16[128,128], index: 0, kind: input, shape index: {}]   ;;  %s851_s2 = inlined_call_operand.vmem [shape: f32[1,128], index: 2, kind: input, shape index: {}]   ;;  %s852_s3 = inlined_call_operand.vmem [shape: f32[1,128], index: 3, kind: input, shape index: {}]   ;;  %s853_s4 = inlined_call_operand.vmem [shape: bf16[128,128], index: 4, kind: output, shape index: {}]  }
   0x1   :  { %v632_v0 = vld [vmem:[%s849_s1] sm:$0xff]   ;;  %v633_v1 = vld [vmem:[%s849_s1 + $0x8] sm:$0xff]   ;;  %v634_v2 = vld [vmem:[%s849_s1 + $0x10] sm:$0xff]  }
   0x2   :  { %584 = vmatprep.subr.bf16.mxu0 %v632_v0  ;;  %616 = vmatprep.subr.bf16.mxu1 %v632_v0  ;;  %v635_v3 = vld [vmem:[%s849_s1 + $0x18] sm:$0xff]   ;;  %v640_v4 = vld [vmem:[%s850_s0] sm:$0xff]   ;;  %v637_v7 = vld [vmem:[%s849_s1 + $0x28] sm:$0xff]  }
   0x3   :  { %585 = vmatpush3.bf16.msra.mxu0 %v632_v0  ;;  %624 = vmatpush3.bf16.msra.mxu1 %v632_v0  ;;  %v636_v5 = vld [vmem:[%s849_s1 + $0x20] sm:$0xff]   ;;  %v638_v8 = vld [vmem:[%s849_s1 + $0x30] sm:$0xff]   ;;  %v639_v9 = vld [vmem:[%s849_s1 + $0x38] sm:$0xff]  }
   0x4   :  { %586 = vmatprep.subr.bf16.mxu0 %v633_v1  ;;  %617 = vmatprep.subr.bf16.mxu1 %v633_v1  ;;  %v644_v6 = vld [vmem:[%s850_s0 + $0x20] sm:$0xff]   ;;  %v641_v10 = vld [vmem:[%s850_s0 + $0x8] sm:$0xff]   ;;  %v642_v12 = vld [vmem:[%s850_s0 + $0x10] sm:$0xff]  }
   0x5   :  { %600 = vmatprep.mubr.bf16.mxu0 %v640_v4  ;;  %608 = vmatprep.mubr.bf16.mxu1 %v644_v6  ;;  %v645_v11 = vld [vmem:[%s850_s0 + $0x28] sm:$0xff]   ;;  %v646_v13 = vld [vmem:[%s850_s0 + $0x30] sm:$0xff]   ;;  %v643_v14 = vld [vmem:[%s850_s0 + $0x18] sm:$0xff]  }
   0x6   :  { %v647_v15 = vld [vmem:[%s850_s0 + $0x38] sm:$0xff]  }
   0x7   :  { %587 = vmatpush3.bf16.msra.mxu0 %v633_v1  ;;  %625 = vmatpush3.bf16.msra.mxu1 %v633_v1 }
   0x8   :  { %588 = vmatprep.subr.bf16.mxu0 %v634_v2  ;;  %618 = vmatprep.subr.bf16.mxu1 %v634_v2 }
   0xb   :  { %589 = vmatpush3.bf16.msra.mxu0 %v634_v2  ;;  %626 = vmatpush3.bf16.msra.mxu1 %v634_v2 }
   0xc   :  { %590 = vmatprep.subr.bf16.mxu0 %v635_v3  ;;  %619 = vmatprep.subr.bf16.mxu1 %v635_v3 }
   0xf   :  { %591 = vmatpush3.bf16.msra.mxu0 %v635_v3  ;;  %627 = vmatpush3.bf16.msra.mxu1 %v635_v3 }
  0x10   :  { %592 = vmatprep.subr.bf16.mxu0 %v636_v5  ;;  %620 = vmatprep.subr.bf16.mxu1 %v636_v5 }
  0x13   :  { %593 = vmatpush3.bf16.msra.mxu0 %v636_v5  ;;  %628 = vmatpush3.bf16.msra.mxu1 %v636_v5 }
  0x14   :  { %594 = vmatprep.subr.bf16.mxu0 %v637_v7  ;;  %621 = vmatprep.subr.bf16.mxu1 %v637_v7 }
  0x17   :  { %595 = vmatpush3.bf16.msra.mxu0 %v637_v7  ;;  %629 = vmatpush3.bf16.msra.mxu1 %v637_v7 }
  0x18   :  { %596 = vmatprep.subr.bf16.mxu0 %v638_v8  ;;  %622 = vmatprep.subr.bf16.mxu1 %v638_v8 }
  0x1b   :  { %597 = vmatpush3.bf16.msra.mxu0 %v638_v8  ;;  %630 = vmatpush3.bf16.msra.mxu1 %v638_v8 }
  0x1c   :  { %598 = vmatprep.subr.bf16.mxu0 %v639_v9  ;;  %623 = vmatprep.subr.bf16.mxu1 %v639_v9 }
  0x1f   :  { %599 = vmatpush3.bf16.msra.mxu0 %v639_v9  ;;  %631 = vmatpush3.bf16.msra.mxu1 %v639_v9 }
  0x22   :  { %601 = vmatmul.mubr.bf16.vlgmr.msra.gmra.mrb[0].mxu0 %v641_v10  ;;  %609 = vmatmul.mubr.bf16.vlgmr.msra.gmra.mrb[0].mxu1 %v645_v11 }
  0x23   :  { %604 = vmatprep.mubr.bf16.mxu0 %v642_v12  ;;  %612 = vmatprep.mubr.bf16.mxu1 %v646_v13 }
  0x2a   :  { %605 = vmatmul.mubr.bf16.gmra.mrb[4].mxu0 %v643_v14  ;;  %613 = vmatmul.mubr.bf16.gmra.mrb[4].mxu1 %v647_v15 }
  0xf5   :  { %v723_v16 = vpop.f32.mrb[0].mxu0  ;;  %v725_v17 = vpop.f32.mrb[0].mxu1 }
  0xf6   :  { %v727_v18 = vpop.f32.mrb[1].mxu0  ;;  %v729_v19 = vpop.f32.mrb[1].mxu1  ;;  %v268_v27 = vmul.f32 %v723_v16, %v723_v16  ;;  %v276_v59 = vmul.f32 %v725_v17, %v725_v17 }
  0xf7   :  { %v731_v20 = vpop.f32.mrb[2].mxu0  ;;  %v733_v21 = vpop.f32.mrb[2].mxu1  ;;  %v266_v24 = vmul.f32 %v727_v18, %v727_v18  ;;  %v274_v53 = vmul.f32 %v729_v19, %v729_v19 }
  0xf8   :  { %v735_v22 = vpop.f32.mrb[3].mxu0  ;;  %v737_v23 = vpop.f32.mrb[3].mxu1  ;;  %v269_v30 = vmul.f32 %v731_v20, %v731_v20  ;;  %v277_v62 = vmul.f32 %v733_v21, %v733_v21 }
  0xf9   :  { %v243_v25 = vadd.f32 %v735_v22, %v727_v18  ;;  %v267_v26 = vmul.f32 %v735_v22, %v735_v22  ;;  %v275_v58 = vmul.f32 %v737_v23, %v737_v23 }
  0xfb   :  { %v244_v28 = vadd.f32 %v723_v16, %v243_v25  ;;  %v282_v29 = vadd.f32 %v267_v26, %v266_v24 }
  0xfd   :  { %v283_v31 = vadd.f32 %v282_v29, %v268_v27  ;;  %v750_v32 = vpop.f32.mrb[4].mxu0  ;;  %v245_v33 = vadd.f32 %v731_v20, %v244_v28  ;;  %v753_v34 = vpop.f32.mrb[4].mxu1 }
  0xfe   :  { %v755_v35 = vpop.f32.mrb[5].mxu0  ;;  %v757_v36 = vpop.f32.mrb[5].mxu1  ;;  %v272_v47 = vmul.f32 %v750_v32, %v750_v32  ;;  %v280_v7 = vmul.f32 %v753_v34, %v753_v34 }
  0xff   :  { %v246_v37 = vadd.f32 %v245_v33, %v755_v35  ;;  %v270_v38 = vmul.f32 %v755_v35, %v755_v35  ;;  %v284_v39 = vadd.f32 %v283_v31, %v269_v30  ;;  %v762_v40 = vpop.f32.mrb[6].mxu0  ;;  %v764_v41 = vpop.f32.mrb[6].mxu1  ;;  %v278_v1 = vmul.f32 %v757_v36, %v757_v36 }
 0x100   :  { %v766_v42 = vpop.f32.mrb[7].mxu0  ;;  %v768_v43 = vpop.f32.mrb[7].mxu1  ;;  %v273_v50 = vmul.f32 %v762_v40, %v762_v40  ;;  %v281_v10 = vmul.f32 %v764_v41, %v764_v41 }
 0x101   :  { %v285_v44 = vadd.f32 %v284_v39, %v270_v38  ;;  %v247_v45 = vadd.f32 %v246_v37, %v766_v42  ;;  %v271_v46 = vmul.f32 %v766_v42, %v766_v42  ;;  %v279_v6 = vmul.f32 %v768_v43, %v768_v43 }
 0x103   :  { %v248_v48 = vadd.f32 %v750_v32, %v247_v45  ;;  %v286_v49 = vadd.f32 %v285_v44, %v271_v46 }
 0x105   :  { %v287_v51 = vadd.f32 %v286_v49, %v272_v47  ;;  %v249_v52 = vadd.f32 %v762_v40, %v248_v48 }
 0x107   :  { %v250_v54 = vadd.f32 %v249_v52, %v729_v19  ;;  %v288_v55 = vadd.f32 %v287_v51, %v273_v50 }
 0x109   :  { %v289_v56 = vadd.f32 %v288_v55, %v274_v53  ;;  %v251_v57 = vadd.f32 %v250_v54, %v737_v23 }
 0x10b   :  { %v252_v60 = vadd.f32 %v725_v17, %v251_v57  ;;  %v290_v61 = vadd.f32 %v289_v56, %v275_v58 }
 0x10d   :  { %v291_v63 = vadd.f32 %v290_v61, %v276_v59  ;;  %v253_v0 = vadd.f32 %v733_v21, %v252_v60 }
 0x10f   :  { %v254_v2 = vadd.f32 %v253_v0, %v757_v36  ;;  %v292_v3 = vadd.f32 %v291_v63, %v277_v62 }
 0x111   :  { %v293_v4 = vadd.f32 %v292_v3, %v278_v1  ;;  %v255_v5 = vadd.f32 %v254_v2, %v768_v43 }
 0x113   :  { %v256_v8 = vadd.f32 %v753_v34, %v255_v5  ;;  %v294_v9 = vadd.f32 %v293_v4, %v279_v6 }
 0x115   :  { %v257_v11 = vadd.f32 %v764_v41, %v256_v8  ;;  %v295_v12 = vadd.f32 %v294_v9, %v280_v7 }
 0x117   :  { %v258_v13 = vrot.slane %v257_v11, 4  ;;  %v296_v14 = vadd.f32 %v295_v12, %v281_v10  ;;  %v488_v10 = vld [vmem:[%s852_s3] ss:$0 sm:$0xff] }
 0x119   :  { %v259_v15 = vadd.f32 %v258_v13, %v257_v11  ;;  %v297_v24 = vrot.slane %v296_v14, 4 }
 0x11b   :  { %v260_v25 = vrot.slane %v259_v15, 2  ;;  %v298_v26 = vadd.f32 %v297_v24, %v296_v14 }
 0x11d   :  { %v261_v27 = vadd.f32 %v260_v25, %v259_v15  ;;  %v299_v28 = vrot.slane %v298_v26, 2 }
 0x11f   :  { %v262_v29 = vrot.slane %v261_v27, 1  ;;  %v300_v30 = vadd.f32 %v299_v28, %v298_v26 }
 0x121   :  { %v263_v31 = vadd.f32 %v262_v29, %v261_v27  ;;  %v301_v33 = vrot.slane %v300_v30, 1 }
 0x123   :  { %v265_v37 = vmul.f32 0.0078125, %v263_v31  ;;  %v302_v38 = vadd.f32 %v301_v33, %v300_v30 }
 0x125   :  { %v303_v39 = vmul.f32 0.0078125, %v302_v38  ;;  %v304_v44 = vmul.f32 %v265_v37, %v265_v37  ;;  %v307_v45 = vsub.f32 %v727_v18, %v265_v37  ;;  %v308_v46 = vsub.f32 %v735_v22, %v265_v37 }
 0x126   :  { %v309_v47 = vsub.f32 %v723_v16, %v265_v37  ;;  %v310_v48 = vsub.f32 %v731_v20, %v265_v37  ;;  %v311_v49 = vsub.f32 %v755_v35, %v265_v37  ;;  %v312_v50 = vsub.f32 %v766_v42, %v265_v37 }
 0x127   :  { %v305_v51 = vsub.f32 %v303_v39, %v304_v44  ;;  %v313_v52 = vsub.f32 %v750_v32, %v265_v37  ;;  %v314_v53 = vsub.f32 %v762_v40, %v265_v37  ;;  %v315_v54 = vsub.f32 %v729_v19, %v265_v37 }
 0x128   :  { %v316_v55 = vsub.f32 %v737_v23, %v265_v37  ;;  %v317_v18 = vsub.f32 %v725_v17, %v265_v37  ;;  %v318_v22 = vsub.f32 %v733_v21, %v265_v37  ;;  %v319_v16 = vsub.f32 %v757_v36, %v265_v37  ;;  %v487_v36 = vld [vmem:[%s851_s2] ss:$0 sm:$0xff] }
 0x129   :  { %v306_v20 = vmax.f32 %v305_v51, 0.0  ;;  %v320_v35 = vsub.f32 %v768_v43, %v265_v37  ;;  %v321_v42 = vsub.f32 %v753_v34, %v265_v37  ;;  %v322_v56 = vsub.f32 %v764_v41, %v265_v37 }
 0x12b   :  { %v323_v32 = vadd.f32 1e-05, %v306_v20 }
 0x12d   :  { %648 = vrsqrt.f32 %v323_v32 }
 0x137   :  { %v649_v40 = vpop.eup %648 }
 0x138   :  { %v325_v57 = vmul.f32 %v649_v40, %v307_v45  ;;  %v326_v19 = vmul.f32 %v649_v40, %v308_v46  ;;  %v327_v58 = vmul.f32 %v649_v40, %v309_v47  ;;  %v328_v23 = vmul.f32 %v649_v40, %v310_v48 }
 0x139   :  { %v329_v59 = vmul.f32 %v649_v40, %v311_v49  ;;  %v330_v17 = vmul.f32 %v649_v40, %v312_v50  ;;  %v331_v60 = vmul.f32 %v649_v40, %v313_v52  ;;  %v332_v21 = vmul.f32 %v649_v40, %v314_v53 }
 0x13a   :  { %v333_v43 = vmul.f32 %v649_v40, %v315_v54  ;;  %v334_v61 = vmul.f32 %v649_v40, %v316_v55  ;;  %v335_v34 = vmul.f32 %v649_v40, %v317_v18  ;;  %v336_v62 = vmul.f32 %v649_v40, %v318_v22 }
 0x13b   :  { %v337_v41 = vmul.f32 %v649_v40, %v319_v16  ;;  %v338_v63 = vmul.f32 %v649_v40, %v320_v35  ;;  %v339_v0 = vmul.f32 %v649_v40, %v321_v42  ;;  %v340_v1 = vmul.f32 %v649_v40, %v322_v56 }
 0x13c   :  { %v348_v2 = vmul.f32 %v487_v36, %v325_v57  ;;  %v349_v3 = vmul.f32 %v487_v36, %v326_v19  ;;  %v350_v4 = vmul.f32 %v487_v36, %v327_v58  ;;  %v351_v5 = vmul.f32 %v487_v36, %v328_v23 }
 0x13d   :  { %v352_v6 = vmul.f32 %v487_v36, %v329_v59  ;;  %v353_v7 = vmul.f32 %v487_v36, %v330_v17  ;;  %v354_v8 = vmul.f32 %v487_v36, %v331_v60  ;;  %v355_v9 = vmul.f32 %v487_v36, %v332_v21 }
 0x13e   :  { %v356_v11 = vmul.f32 %v487_v36, %v333_v43  ;;  %v357_v12 = vmul.f32 %v487_v36, %v334_v61  ;;  %v358_v13 = vmul.f32 %v487_v36, %v335_v34  ;;  %v359_v14 = vmul.f32 %v487_v36, %v336_v62 }
 0x13f   :  { %v360_v15 = vmul.f32 %v487_v36, %v337_v41  ;;  %v361_v24 = vmul.f32 %v487_v36, %v338_v63  ;;  %v362_v25 = vmul.f32 %v487_v36, %v339_v0  ;;  %v363_v26 = vmul.f32 %v487_v36, %v340_v1 }
 0x140   :  { %v371_v27 = vadd.f32 %v488_v10, %v348_v2  ;;  %v372_v28 = vadd.f32 %v488_v10, %v349_v3  ;;  %v373_v29 = vadd.f32 %v488_v10, %v350_v4  ;;  %v374_v30 = vadd.f32 %v488_v10, %v351_v5 }
 0x141   :  { %v375_v31 = vadd.f32 %v488_v10, %v352_v6  ;;  %v376_v33 = vadd.f32 %v488_v10, %v353_v7  ;;  %v377_v37 = vadd.f32 %v488_v10, %v354_v8  ;;  %v378_v38 = vadd.f32 %v488_v10, %v355_v9 }
 0x142   :  { %v379_v39 = vadd.f32 %v488_v10, %v356_v11  ;;  %v380_v44 = vadd.f32 %v488_v10, %v357_v12  ;;  %v381_v45 = vadd.f32 %v488_v10, %v358_v13  ;;  %v382_v46 = vadd.f32 %v488_v10, %v359_v14 }
 0x143   :  { %v383_v47 = vadd.f32 %v488_v10, %v360_v15  ;;  %v384_v48 = vadd.f32 %v488_v10, %v361_v24  ;;  %v385_v49 = vadd.f32 %v488_v10, %v362_v25  ;;  %v386_v50 = vadd.f32 %v488_v10, %v363_v26 }
 0x144   :  { %v524_v51 = vpack.c.bf16 %v372_v28, %v371_v27  ;;  %v529_v52 = vpack.c.bf16 %v374_v30, %v373_v29  ;;  %v534_v53 = vpack.c.bf16 %v376_v33, %v375_v31  ;;  %v539_v54 = vpack.c.bf16 %v378_v38, %v377_v37 }
 0x145   :  { %v544_v55 = vpack.c.bf16 %v380_v44, %v379_v39  ;;  %v549_v18 = vpack.c.bf16 %v382_v46, %v381_v45  ;;  %v554_v22 = vpack.c.bf16 %v384_v48, %v383_v47  ;;  %v559_v16 = vpack.c.bf16 %v386_v50, %v385_v49 }
 0x146   :  { %525 = vst [vmem:[%s853_s4] sm:$0xff] %v524_v51   ;;  %561 = vst [vmem:[%s853_s4 + $0x8] sm:$0xff] %v529_v52  }
 0x147   :  { %562 = vst [vmem:[%s853_s4 + $0x10] sm:$0xff] %v534_v53   ;;  %563 = vst [vmem:[%s853_s4 + $0x18] sm:$0xff] %v539_v54  }
 0x148   :  { %564 = vst [vmem:[%s853_s4 + $0x20] sm:$0xff] %v544_v55   ;;  %565 = vst [vmem:[%s853_s4 + $0x28] sm:$0xff] %v549_v18  }
 0x149   :  { %566 = vst [vmem:[%s853_s4 + $0x30] sm:$0xff] %v554_v22   ;;  %567 = vst [vmem:[%s853_s4 + $0x38] sm:$0xff] %v559_v16  }

// kernel: vae_forward.21
= control target key start
LH: loop header
LB: loop body
LE: loop exit
PB: predicated region body
PF: predicated region fallthrough
CT: control target
= control target key end

     0   :  { %s383_s1 = inlined_call_operand.vmem [shape: bf16[128,128], index: 1, kind: input, shape index: {}]   ;;  %s384_s0 = inlined_call_operand.vmem [shape: bf16[32,128], index: 0, kind: input, shape index: {}]   ;;  %s385_s2 = inlined_call_operand.vmem [shape: f32[1,128], index: 2, kind: input, shape index: {}]   ;;  %s386_s3 = inlined_call_operand.vmem [shape: f32[1,128], index: 3, kind: input, shape index: {}]   ;;  %s387_s4 = inlined_call_operand.vmem [shape: bf16[32,128], index: 4, kind: output, shape index: {}]  }
   0x1   :  { %v304_v0 = vld [vmem:[%s383_s1] sm:$0xff]   ;;  %v305_v1 = vld [vmem:[%s383_s1 + $0x8] sm:$0xff]   ;;  %v306_v2 = vld [vmem:[%s383_s1 + $0x10] sm:$0xff]  }
   0x2   :  { %284 = vmatprep.subr.bf16.mxu0 %v304_v0  ;;  %v307_v3 = vld [vmem:[%s383_s1 + $0x18] sm:$0xff]   ;;  %v312_v4 = vld [vmem:[%s384_s0] sm:$0xff]   ;;  %v309_v6 = vld [vmem:[%s383_s1 + $0x28] sm:$0xff]  }
   0x3   :  { %285 = vmatpush3.bf16.msra.mxu0 %v304_v0  ;;  %300 = vmatprep.mubr.bf16.mxu0 %v312_v4  ;;  %v308_v5 = vld [vmem:[%s383_s1 + $0x20] sm:$0xff]   ;;  %v310_v7 = vld [vmem:[%s383_s1 + $0x30] sm:$0xff]   ;;  %v311_v8 = vld [vmem:[%s383_s1 + $0x38] sm:$0xff]  }
   0x4   :  { %286 = vmatprep.subr.bf16.mxu0 %v305_v1  ;;  %v313_v9 = vld [vmem:[%s384_s0 + $0x8] sm:$0xff]   ;;  %v253_v47 = vld [vmem:[%s385_s2] ss:$0 sm:$0xff] }
   0x5   :  { %v254_v52 = vld [vmem:[%s386_s3] ss:$0 sm:$0xff] }
   0x7   :  { %287 = vmatpush3.bf16.msra.mxu0 %v305_v1 }
   0x8   :  { %288 = vmatprep.subr.bf16.mxu0 %v306_v2 }
   0xb   :  { %289 = vmatpush3.bf16.msra.mxu0 %v306_v2 }
   0xc   :  { %290 = vmatprep.subr.bf16.mxu0 %v307_v3 }
   0xf   :  { %291 = vmatpush3.bf16.msra.mxu0 %v307_v3 }
  0x10   :  { %292 = vmatprep.subr.bf16.mxu0 %v308_v5 }
  0x13   :  { %293 = vmatpush3.bf16.msra.mxu0 %v308_v5 }
  0x14   :  { %294 = vmatprep.subr.bf16.mxu0 %v309_v6 }
  0x17   :  { %295 = vmatpush3.bf16.msra.mxu0 %v309_v6 }
  0x18   :  { %296 = vmatprep.subr.bf16.mxu0 %v310_v7 }
  0x1b   :  { %297 = vmatpush3.bf16.msra.mxu0 %v310_v7 }
  0x1c   :  { %298 = vmatprep.subr.bf16.mxu0 %v311_v8 }
  0x1f   :  { %299 = vmatpush3.bf16.msra.mxu0 %v311_v8 }
  0x22   :  { %301 = vmatmul.mubr.bf16.vlgmr.msra.gmra.mrb[0].mxu0 %v313_v9 }
  0xf5   :  { %v302_v10 = vpop.f32.mrb[0].mxu0 }
  0xf6   :  { %v132_v11 = vpop.f32.mrb[1].mxu0  ;;  %v160_v17 = vmul.f32 %v302_v10, %v302_v10 }
  0xf7   :  { %v303_v12 = vpop.f32.mrb[2].mxu0  ;;  %v158_v14 = vmul.f32 %v132_v11, %v132_v11 }
  0xf8   :  { %v135_v13 = vpop.f32.mrb[3].mxu0  ;;  %v161_v20 = vmul.f32 %v303_v12, %v303_v12 }
  0xf9   :  { %v147_v15 = vadd.f32 %v135_v13, %v132_v11  ;;  %v159_v16 = vmul.f32 %v135_v13, %v135_v13 }
  0xfb   :  { %v148_v18 = vadd.f32 %v302_v10, %v147_v15  ;;  %v162_v19 = vadd.f32 %v159_v16, %v158_v14 }
  0xfd   :  { %v149_v21 = vadd.f32 %v303_v12, %v148_v18  ;;  %v163_v22 = vadd.f32 %v162_v19, %v160_v17 }
  0xff   :  { %v150_v23 = vrot.slane %v149_v21, 4  ;;  %v164_v24 = vadd.f32 %v163_v22, %v161_v20 }
 0x101   :  { %v151_v25 = vadd.f32 %v150_v23, %v149_v21  ;;  %v165_v26 = vrot.slane %v164_v24, 4 }
 0x103   :  { %v152_v27 = vrot.slane %v151_v25, 2  ;;  %v166_v28 = vadd.f32 %v165_v26, %v164_v24 }
 0x105   :  { %v153_v29 = vadd.f32 %v152_v27, %v151_v25  ;;  %v167_v30 = vrot.slane %v166_v28, 2 }
 0x107   :  { %v154_v31 = vrot.slane %v153_v29, 1  ;;  %v168_v32 = vadd.f32 %v167_v30, %v166_v28 }
 0x109   :  { %v155_v33 = vadd.f32 %v154_v31, %v153_v29  ;;  %v169_v34 = vrot.slane %v168_v32, 1 }
 0x10b   :  { %v157_v35 = vmul.f32 0.03125, %v155_v33  ;;  %v170_v36 = vadd.f32 %v169_v34, %v168_v32 }
 0x10d   :  { %v171_v37 = vmul.f32 0.03125, %v170_v36  ;;  %v172_v38 = vmul.f32 %v157_v35, %v157_v35  ;;  %v175_v39 = vsub.f32 %v132_v11, %v157_v35  ;;  %v176_v40 = vsub.f32 %v135_v13, %v157_v35 }
 0x10e   :  { %v177_v41 = vsub.f32 %v302_v10, %v157_v35  ;;  %v178_v42 = vsub.f32 %v303_v12, %v157_v35 }
 0x10f   :  { %v173_v43 = vsub.f32 %v171_v37, %v172_v38 }
 0x111   :  { %v174_v44 = vmax.f32 %v173_v43, 0.0 }
 0x113   :  { %v179_v45 = vadd.f32 1e-05, %v174_v44 }
 0x115   :  { %314 = vrsqrt.f32 %v179_v45 }
 0x11f   :  { %v315_v46 = vpop.eup %314 }
 0x120   :  { %v181_v48 = vmul.f32 %v315_v46, %v175_v39  ;;  %v182_v49 = vmul.f32 %v315_v46, %v176_v40  ;;  %v183_v50 = vmul.f32 %v315_v46, %v177_v41  ;;  %v184_v51 = vmul.f32 %v315_v46, %v178_v42 }
 0x122   :  { %v192_v53 = vmul.f32 %v253_v47, %v181_v48  ;;  %v193_v54 = vmul.f32 %v253_v47, %v182_v49  ;;  %v194_v55 = vmul.f32 %v253_v47, %v183_v50  ;;  %v195_v56 = vmul.f32 %v253_v47, %v184_v51 }
 0x124   :  { %v203_v57 = vadd.f32 %v254_v52, %v192_v53  ;;  %v204_v58 = vadd.f32 %v254_v52, %v193_v54  ;;  %v205_v59 = vadd.f32 %v254_v52, %v194_v55  ;;  %v206_v60 = vadd.f32 %v254_v52, %v195_v56 }
 0x126   :  { %vm207_vm0 = vcmp.ge.f32.partialorder %v203_v57, 0.0  ;;  %vm208_vm1 = vcmp.ge.f32.partialorder %v204_v58, 0.0  ;;  %vm209_vm2 = vcmp.ge.f32.partialorder %v205_v59, 0.0  ;;  %vm210_vm3 = vcmp.ge.f32.partialorder %v206_v60, 0.0 }
 0x127   :  { %v211_v61 = vmul.f32 0.01, %v203_v57  ;;  %v212_v62 = vmul.f32 0.01, %v204_v58  ;;  %v213_v63 = vmul.f32 0.01, %v205_v59 }
 0x128   :  { %v214_v0 = vmul.f32 0.01, %v206_v60 }
 0x129   :  { %v215_v1 = vsel %vm207_vm0, %v203_v57, %v211_v61  ;;  %v216_v2 = vsel %vm208_vm1, %v204_v58, %v212_v62  ;;  %v217_v3 = vsel %vm209_vm2, %v205_v59, %v213_v63 }
 0x12a   :  { %v218_v4 = vsel %vm210_vm3, %v206_v60, %v214_v0  ;;  %v266_v5 = vpack.c.bf16 %v216_v2, %v215_v1 }
 0x12b   :  { %v271_v6 = vpack.c.bf16 %v218_v4, %v217_v3 }
 0x12c   :  { %267 = vst [vmem:[%s387_s4] sm:$0xff] %v266_v5  }
 0x12d   :  { %273 = vst [vmem:[%s387_s4 + $0x8] sm:$0xff] %v271_v6  }

// kernel: vae_forward.22
= control target key start
LH: loop header
LB: loop body
LE: loop exit
PB: predicated region body
PF: predicated region fallthrough
CT: control target
= control target key end

     0   :  { %s371_s1 = inlined_call_operand.vmem [shape: bf16[128,128], index: 1, kind: input, shape index: {}]   ;;  %s372_s0 = inlined_call_operand.vmem [shape: bf16[32,128], index: 0, kind: input, shape index: {}]   ;;  %s373_s2 = inlined_call_operand.vmem [shape: f32[1,128], index: 2, kind: input, shape index: {}]   ;;  %s374_s3 = inlined_call_operand.vmem [shape: f32[1,128], index: 3, kind: input, shape index: {}]   ;;  %s375_s4 = inlined_call_operand.vmem [shape: bf16[32,128], index: 4, kind: output, shape index: {}]  }
   0x1   :  { %v292_v0 = vld [vmem:[%s371_s1] sm:$0xff]   ;;  %v293_v1 = vld [vmem:[%s371_s1 + $0x8] sm:$0xff]   ;;  %v294_v2 = vld [vmem:[%s371_s1 + $0x10] sm:$0xff]  }
   0x2   :  { %272 = vmatprep.subr.bf16.mxu0 %v292_v0  ;;  %v295_v3 = vld [vmem:[%s371_s1 + $0x18] sm:$0xff]   ;;  %v300_v4 = vld [vmem:[%s372_s0] sm:$0xff]   ;;  %v297_v6 = vld [vmem:[%s371_s1 + $0x28] sm:$0xff]  }
   0x3   :  { %273 = vmatpush3.bf16.msra.mxu0 %v292_v0  ;;  %288 = vmatprep.mubr.bf16.mxu0 %v300_v4  ;;  %v296_v5 = vld [vmem:[%s371_s1 + $0x20] sm:$0xff]   ;;  %v298_v7 = vld [vmem:[%s371_s1 + $0x30] sm:$0xff]   ;;  %v299_v8 = vld [vmem:[%s371_s1 + $0x38] sm:$0xff]  }
   0x4   :  { %274 = vmatprep.subr.bf16.mxu0 %v293_v1  ;;  %v301_v9 = vld [vmem:[%s372_s0 + $0x8] sm:$0xff]   ;;  %v241_v47 = vld [vmem:[%s373_s2] ss:$0 sm:$0xff] }
   0x5   :  { %v242_v52 = vld [vmem:[%s374_s3] ss:$0 sm:$0xff] }
   0x7   :  { %275 = vmatpush3.bf16.msra.mxu0 %v293_v1 }
   0x8   :  { %276 = vmatprep.subr.bf16.mxu0 %v294_v2 }
   0xb   :  { %277 = vmatpush3.bf16.msra.mxu0 %v294_v2 }
   0xc   :  { %278 = vmatprep.subr.bf16.mxu0 %v295_v3 }
   0xf   :  { %279 = vmatpush3.bf16.msra.mxu0 %v295_v3 }
  0x10   :  { %280 = vmatprep.subr.bf16.mxu0 %v296_v5 }
  0x13   :  { %281 = vmatpush3.bf16.msra.mxu0 %v296_v5 }
  0x14   :  { %282 = vmatprep.subr.bf16.mxu0 %v297_v6 }
  0x17   :  { %283 = vmatpush3.bf16.msra.mxu0 %v297_v6 }
  0x18   :  { %284 = vmatprep.subr.bf16.mxu0 %v298_v7 }
  0x1b   :  { %285 = vmatpush3.bf16.msra.mxu0 %v298_v7 }
  0x1c   :  { %286 = vmatprep.subr.bf16.mxu0 %v299_v8 }
  0x1f   :  { %287 = vmatpush3.bf16.msra.mxu0 %v299_v8 }
  0x22   :  { %289 = vmatmul.mubr.bf16.vlgmr.msra.gmra.mrb[0].mxu0 %v301_v9 }
  0xf5   :  { %v290_v10 = vpop.f32.mrb[0].mxu0 }
  0xf6   :  { %v132_v11 = vpop.f32.mrb[1].mxu0  ;;  %v160_v17 = vmul.f32 %v290_v10, %v290_v10 }
  0xf7   :  { %v291_v12 = vpop.f32.mrb[2].mxu0  ;;  %v158_v14 = vmul.f32 %v132_v11, %v132_v11 }
  0xf8   :  { %v135_v13 = vpop.f32.mrb[3].mxu0  ;;  %v161_v20 = vmul.f32 %v291_v12, %v291_v12 }
  0xf9   :  { %v147_v15 = vadd.f32 %v135_v13, %v132_v11  ;;  %v159_v16 = vmul.f32 %v135_v13, %v135_v13 }
  0xfb   :  { %v148_v18 = vadd.f32 %v290_v10, %v147_v15  ;;  %v162_v19 = vadd.f32 %v159_v16, %v158_v14 }
  0xfd   :  { %v149_v21 = vadd.f32 %v291_v12, %v148_v18  ;;  %v163_v22 = vadd.f32 %v162_v19, %v160_v17 }
  0xff   :  { %v150_v23 = vrot.slane %v149_v21, 4  ;;  %v164_v24 = vadd.f32 %v163_v22, %v161_v20 }
 0x101   :  { %v151_v25 = vadd.f32 %v150_v23, %v149_v21  ;;  %v165_v26 = vrot.slane %v164_v24, 4 }
 0x103   :  { %v152_v27 = vrot.slane %v151_v25, 2  ;;  %v166_v28 = vadd.f32 %v165_v26, %v164_v24 }
 0x105   :  { %v153_v29 = vadd.f32 %v152_v27, %v151_v25  ;;  %v167_v30 = vrot.slane %v166_v28, 2 }
 0x107   :  { %v154_v31 = vrot.slane %v153_v29, 1  ;;  %v168_v32 = vadd.f32 %v167_v30, %v166_v28 }
 0x109   :  { %v155_v33 = vadd.f32 %v154_v31, %v153_v29  ;;  %v169_v34 = vrot.slane %v168_v32, 1 }
 0x10b   :  { %v157_v35 = vmul.f32 0.03125, %v155_v33  ;;  %v170_v36 = vadd.f32 %v169_v34, %v168_v32 }
 0x10d   :  { %v171_v37 = vmul.f32 0.03125, %v170_v36  ;;  %v172_v38 = vmul.f32 %v157_v35, %v157_v35  ;;  %v175_v39 = vsub.f32 %v132_v11, %v157_v35  ;;  %v176_v40 = vsub.f32 %v135_v13, %v157_v35 }
 0x10e   :  { %v177_v41 = vsub.f32 %v290_v10, %v157_v35  ;;  %v178_v42 = vsub.f32 %v291_v12, %v157_v35 }
 0x10f   :  { %v173_v43 = vsub.f32 %v171_v37, %v172_v38 }
 0x111   :  { %v174_v44 = vmax.f32 %v173_v43, 0.0 }
 0x113   :  { %v179_v45 = vadd.f32 1e-05, %v174_v44 }
 0x115   :  { %302 = vrsqrt.f32 %v179_v45 }
 0x11f   :  { %v303_v46 = vpop.eup %302 }
 0x120   :  { %v181_v48 = vmul.f32 %v303_v46, %v175_v39  ;;  %v182_v49 = vmul.f32 %v303_v46, %v176_v40  ;;  %v183_v50 = vmul.f32 %v303_v46, %v177_v41  ;;  %v184_v51 = vmul.f32 %v303_v46, %v178_v42 }
 0x122   :  { %v192_v53 = vmul.f32 %v241_v47, %v181_v48  ;;  %v193_v54 = vmul.f32 %v241_v47, %v182_v49  ;;  %v194_v55 = vmul.f32 %v241_v47, %v183_v50  ;;  %v195_v56 = vmul.f32 %v241_v47, %v184_v51 }
 0x124   :  { %v203_v57 = vadd.f32 %v242_v52, %v192_v53  ;;  %v204_v58 = vadd.f32 %v242_v52, %v193_v54  ;;  %v205_v59 = vadd.f32 %v242_v52, %v194_v55  ;;  %v206_v60 = vadd.f32 %v242_v52, %v195_v56 }
 0x126   :  { %v254_v61 = vpack.c.bf16 %v204_v58, %v203_v57  ;;  %v259_v62 = vpack.c.bf16 %v206_v60, %v205_v59 }
 0x128   :  { %255 = vst [vmem:[%s375_s4] sm:$0xff] %v254_v61   ;;  %261 = vst [vmem:[%s375_s4 + $0x8] sm:$0xff] %v259_v62  }

// kernel: vae_forward.23
= control target key start
LH: loop header
LB: loop body
LE: loop exit
PB: predicated region body
PF: predicated region fallthrough
CT: control target
= control target key end

     0   :  { %s556_s1 = inlined_call_operand.vmem [shape: bf16[256,128], index: 1, kind: input, shape index: {}]   ;;  %s557_s0 = inlined_call_operand.vmem [shape: bf16[32,256], index: 0, kind: input, shape index: {}]   ;;  %s558_s4 = inlined_call_operand.vmem [shape: bf16[32,128], index: 4, kind: input, shape index: {}]   ;;  %s559_s2 = inlined_call_operand.vmem [shape: f32[1,128], index: 2, kind: input, shape index: {}]   ;;  %s560_s3 = inlined_call_operand.vmem [shape: f32[1,128], index: 3, kind: input, shape index: {}]   ;;  %s561_s5 = inlined_call_operand.vmem [shape: bf16[32,128], index: 5, kind: output, shape index: {}]  }
   0x1   :  { %v424_v0 = vld [vmem:[%s556_s1 + $0x40] sm:$0xff]   ;;  %v426_v2 = vld [vmem:[%s556_s1 + $0x48] sm:$0xff]   ;;  %v428_v4 = vld [vmem:[%s556_s1 + $0x50] sm:$0xff]  }
   0x2   :  { %v425_v1 = vld [vmem:[%s556_s1] sm:$0xff]   ;;  %380 = vmatprep.subr.bf16.mxu0 %v424_v0  ;;  %408 = vmatprep.subr.bf16.mxu1 %v424_v0  ;;  %v427_v3 = vld [vmem:[%s556_s1 + $0x8] sm:$0xff]   ;;  %v429_v5 = vld [vmem:[%s556_s1 + $0x10] sm:$0xff]  }
   0x3   :  { %381 = vmatpush3.bf16.msra.mxu0 %v425_v1  ;;  %416 = vmatpush3.bf16.msra.mxu1 %v425_v1  ;;  %v430_v6 = vld [vmem:[%s556_s1 + $0x58] sm:$0xff]   ;;  %v432_v8 = vld [vmem:[%s556_s1 + $0x60] sm:$0xff]   ;;  %v434_v10 = vld [vmem:[%s556_s1 + $0x68] sm:$0xff]  }
   0x4   :  { %382 = vmatprep.subr.bf16.mxu0 %v426_v2  ;;  %409 = vmatprep.subr.bf16.mxu1 %v426_v2  ;;  %v431_v7 = vld [vmem:[%s556_s1 + $0x18] sm:$0xff]   ;;  %v433_v9 = vld [vmem:[%s556_s1 + $0x20] sm:$0xff]   ;;  %v435_v13 = vld [vmem:[%s556_s1 + $0x28] sm:$0xff]  }
   0x5   :  { %v442_v11 = vld [vmem:[%s557_s0 + $0x4] ss:$8 sps:$4 sm:$0xff]   ;;  %v445_v12 = vld [vmem:[%s557_s0 + $0x14] ss:$8 sps:$4 sm:$0xff]   ;;  %v440_v18 = vld [vmem:[%s557_s0] ss:$8 sps:$4 sm:$0xff]  }
   0x6   :  { %v436_v14 = vld [vmem:[%s556_s1 + $0x70] sm:$0xff]   ;;  %205 = vmatprep.mubr.bf16.mxu0 %v442_v11  ;;  %213 = vmatprep.mubr.bf16.mxu1 %v445_v12  ;;  %v438_v16 = vld [vmem:[%s556_s1 + $0x78] sm:$0xff]   ;;  %v361_v0 = vld [vmem:[%s558_s4] sm:$0xff]  }
   0x7   :  { %383 = vmatpush3.bf16.msra.mxu0 %v427_v3  ;;  %417 = vmatpush3.bf16.msra.mxu1 %v427_v3  ;;  %v437_v15 = vld [vmem:[%s556_s1 + $0x30] sm:$0xff]   ;;  %v439_v17 = vld [vmem:[%s556_s1 + $0x38] sm:$0xff]   ;;  %v378_v1 = vld [vmem:[%s558_s4 + $0x8] sm:$0xff]  }
   0x8   :  { %384 = vmatprep.subr.bf16.mxu0 %v428_v4  ;;  %410 = vmatprep.subr.bf16.mxu1 %v428_v4  ;;  %v443_v19 = vld [vmem:[%s557_s0 + $0x10] ss:$8 sps:$4 sm:$0xff]   ;;  %v350_v3 = vld [vmem:[%s559_s2] ss:$0 sm:$0xff]  ;;  %v366_v11 = vunpack.c.l.bf16 %v378_v1  ;;  %v367_v12 = vunpack.c.h.bf16 %v378_v1 }
   0xb   :  { %385 = vmatpush3.bf16.msra.mxu0 %v429_v5  ;;  %418 = vmatpush3.bf16.msra.mxu1 %v429_v5 }
   0xc   :  { %386 = vmatprep.subr.bf16.mxu0 %v430_v6  ;;  %411 = vmatprep.subr.bf16.mxu1 %v430_v6 }
   0xf   :  { %387 = vmatpush3.bf16.msra.mxu0 %v431_v7  ;;  %419 = vmatpush3.bf16.msra.mxu1 %v431_v7 }
  0x10   :  { %388 = vmatprep.subr.bf16.mxu0 %v432_v8  ;;  %412 = vmatprep.subr.bf16.mxu1 %v432_v8  ;;  %v351_v8 = vld [vmem:[%s560_s3] ss:$0 sm:$0xff] }
  0x13   :  { %389 = vmatpush3.bf16.msra.mxu0 %v433_v9  ;;  %420 = vmatpush3.bf16.msra.mxu1 %v433_v9  ;;  %v362_v9 = vunpack.c.l.bf16 %v361_v0 }
  0x14   :  { %390 = vmatprep.subr.bf16.mxu0 %v434_v10  ;;  %413 = vmatprep.subr.bf16.mxu1 %v434_v10  ;;  %v363_v10 = vunpack.c.h.bf16 %v361_v0 }
  0x17   :  { %391 = vmatpush3.bf16.msra.mxu0 %v435_v13  ;;  %421 = vmatpush3.bf16.msra.mxu1 %v435_v13 }
  0x18   :  { %392 = vmatprep.subr.bf16.mxu0 %v436_v14  ;;  %414 = vmatprep.subr.bf16.mxu1 %v436_v14 }
  0x1b   :  { %393 = vmatpush3.bf16.msra.mxu0 %v437_v15  ;;  %422 = vmatpush3.bf16.msra.mxu1 %v437_v15 }
  0x1c   :  { %394 = vmatprep.subr.bf16.mxu0 %v438_v16  ;;  %415 = vmatprep.subr.bf16.mxu1 %v438_v16 }
  0x1f   :  { %395 = vmatpush3.bf16.msra.mxu0 %v439_v17  ;;  %423 = vmatpush3.bf16.msra.mxu1 %v439_v17 }
  0x22   :  { %206 = vmatmul.mubr.bf16.vlgmr.msra.gmra.mrb[0].mxu0 %v440_v18  ;;  %214 = vmatmul.mubr.bf16.vlgmr.msra.gmra.mrb[0].mxu1 %v443_v19 }
  0xf5   :  { %v396_v20 = vpop.f32.mrb[0].mxu0  ;;  %v402_v21 = vpop.f32.mrb[0].mxu1 }
  0xf6   :  { %v397_v22 = vpop.f32.mrb[1].mxu0  ;;  %v403_v23 = vpop.f32.mrb[1].mxu1 }
  0xf7   :  { %v398_v24 = vadd.f32 %v397_v22, %v396_v20  ;;  %v399_v25 = vpop.f32.mrb[2].mxu0  ;;  %v404_v26 = vadd.f32 %v403_v23, %v402_v21  ;;  %v405_v27 = vpop.f32.mrb[2].mxu1 }
  0xf8   :  { %v400_v28 = vpop.f32.mrb[3].mxu0  ;;  %v406_v29 = vpop.f32.mrb[3].mxu1 }
  0xf9   :  { %v401_v30 = vadd.f32 %v400_v28, %v399_v25  ;;  %v407_v31 = vadd.f32 %v406_v29, %v405_v27  ;;  %v233_v32 = vmul.f32 %v398_v24, %v398_v24  ;;  %v235_v33 = vmul.f32 %v404_v26, %v404_v26 }
  0xfb   :  { %v222_v34 = vadd.f32 %v401_v30, %v398_v24  ;;  %v234_v35 = vmul.f32 %v401_v30, %v401_v30  ;;  %v236_v39 = vmul.f32 %v407_v31, %v407_v31 }
  0xfd   :  { %v237_v36 = vadd.f32 %v234_v35, %v233_v32  ;;  %v223_v37 = vadd.f32 %v404_v26, %v222_v34 }
  0xff   :  { %v224_v38 = vadd.f32 %v407_v31, %v223_v37  ;;  %v238_v40 = vadd.f32 %v237_v36, %v235_v33 }
 0x101   :  { %v225_v41 = vrot.slane %v224_v38, 4  ;;  %v239_v42 = vadd.f32 %v238_v40, %v236_v39 }
 0x103   :  { %v226_v43 = vadd.f32 %v225_v41, %v224_v38  ;;  %v240_v44 = vrot.slane %v239_v42, 4 }
 0x105   :  { %v227_v45 = vrot.slane %v226_v43, 2  ;;  %v241_v46 = vadd.f32 %v240_v44, %v239_v42 }
 0x107   :  { %v228_v47 = vadd.f32 %v227_v45, %v226_v43  ;;  %v242_v48 = vrot.slane %v241_v46, 2 }
 0x109   :  { %v229_v49 = vrot.slane %v228_v47, 1  ;;  %v243_v50 = vadd.f32 %v242_v48, %v241_v46 }
 0x10b   :  { %v230_v51 = vadd.f32 %v229_v49, %v228_v47  ;;  %v244_v52 = vrot.slane %v243_v50, 1 }
 0x10d   :  { %v232_v53 = vmul.f32 0.03125, %v230_v51  ;;  %v245_v54 = vadd.f32 %v244_v52, %v243_v50 }
 0x10f   :  { %v246_v55 = vmul.f32 0.03125, %v245_v54  ;;  %v247_v56 = vmul.f32 %v232_v53, %v232_v53  ;;  %v250_v57 = vsub.f32 %v398_v24, %v232_v53  ;;  %v251_v58 = vsub.f32 %v401_v30, %v232_v53 }
 0x110   :  { %v252_v59 = vsub.f32 %v404_v26, %v232_v53  ;;  %v253_v60 = vsub.f32 %v407_v31, %v232_v53 }
 0x111   :  { %v248_v61 = vsub.f32 %v246_v55, %v247_v56 }
 0x113   :  { %v249_v62 = vmax.f32 %v248_v61, 0.0 }
 0x115   :  { %v254_v63 = vadd.f32 1e-05, %v249_v62 }
 0x117   :  { %446 = vrsqrt.f32 %v254_v63 }
 0x121   :  { %v447_v2 = vpop.eup %446 }
 0x122   :  { %v256_v4 = vmul.f32 %v447_v2, %v250_v57  ;;  %v257_v5 = vmul.f32 %v447_v2, %v251_v58  ;;  %v258_v6 = vmul.f32 %v447_v2, %v252_v59  ;;  %v259_v7 = vmul.f32 %v447_v2, %v253_v60 }
 0x124   :  { %v267_v13 = vmul.f32 %v350_v3, %v256_v4  ;;  %v268_v14 = vmul.f32 %v350_v3, %v257_v5  ;;  %v269_v15 = vmul.f32 %v350_v3, %v258_v6  ;;  %v270_v16 = vmul.f32 %v350_v3, %v259_v7 }
 0x126   :  { %v278_v17 = vadd.f32 %v351_v8, %v267_v13  ;;  %v279_v18 = vadd.f32 %v351_v8, %v268_v14  ;;  %v280_v19 = vadd.f32 %v351_v8, %v269_v15  ;;  %v281_v20 = vadd.f32 %v351_v8, %v270_v16 }
 0x128   :  { %v290_v21 = vadd.f32 %v362_v9, %v278_v17  ;;  %v291_v22 = vadd.f32 %v363_v10, %v279_v18  ;;  %v292_v23 = vadd.f32 %v366_v11, %v280_v19  ;;  %v293_v24 = vadd.f32 %v367_v12, %v281_v20 }
 0x12a   :  { %vm294_vm0 = vcmp.ge.f32.partialorder %v290_v21, 0.0  ;;  %vm295_vm1 = vcmp.ge.f32.partialorder %v291_v22, 0.0  ;;  %vm296_vm2 = vcmp.ge.f32.partialorder %v292_v23, 0.0  ;;  %vm297_vm3 = vcmp.ge.f32.partialorder %v293_v24, 0.0 }
 0x12b   :  { %v298_v25 = vmul.f32 0.01, %v290_v21  ;;  %v299_v26 = vmul.f32 0.01, %v291_v22  ;;  %v300_v27 = vmul.f32 0.01, %v292_v23 }
 0x12c   :  { %v301_v28 = vmul.f32 0.01, %v293_v24 }
 0x12d   :  { %v302_v29 = vsel %vm294_vm0, %v290_v21, %v298_v25  ;;  %v303_v30 = vsel %vm295_vm1, %v291_v22, %v299_v26  ;;  %v304_v31 = vsel %vm296_vm2, %v292_v23, %v300_v27 }
 0x12e   :  { %v305_v32 = vsel %vm297_vm3, %v293_v24, %v301_v28  ;;  %v371_v33 = vpack.c.bf16 %v303_v30, %v302_v29 }
 0x12f   :  { %v376_v34 = vpack.c.bf16 %v305_v32, %v304_v31 }
 0x130   :  { %372 = vst [vmem:[%s561_s5] sm:$0xff] %v371_v33  }
 0x131   :  { %379 = vst [vmem:[%s561_s5 + $0x8] sm:$0xff] %v376_v34  }

// kernel: vae_forward.24
= control target key start
LH: loop header
LB: loop body
LE: loop exit
PB: predicated region body
PF: predicated region fallthrough
CT: control target
= control target key end

     0   :  { %s521_s1 = inlined_call_operand.vmem [shape: bf16[256,128], index: 1, kind: input, shape index: {}]   ;;  %s522_s0 = inlined_call_operand.vmem [shape: bf16[32,256], index: 0, kind: input, shape index: {}]   ;;  %s523_s2 = inlined_call_operand.vmem [shape: f32[1,128], index: 2, kind: input, shape index: {}]   ;;  %s524_s3 = inlined_call_operand.vmem [shape: f32[1,128], index: 3, kind: input, shape index: {}]   ;;  %s525_s4 = inlined_call_operand.vmem [shape: bf16[32,128], index: 4, kind: output, shape index: {}]  }
   0x1   :  { %v400_v0 = vld [vmem:[%s521_s1 + $0x40] sm:$0xff]   ;;  %v402_v2 = vld [vmem:[%s521_s1 + $0x48] sm:$0xff]   ;;  %v404_v4 = vld [vmem:[%s521_s1 + $0x50] sm:$0xff]  }
   0x2   :  { %v401_v1 = vld [vmem:[%s521_s1] sm:$0xff]   ;;  %356 = vmatprep.subr.bf16.mxu0 %v400_v0  ;;  %384 = vmatprep.subr.bf16.mxu1 %v400_v0  ;;  %v403_v3 = vld [vmem:[%s521_s1 + $0x8] sm:$0xff]   ;;  %v405_v5 = vld [vmem:[%s521_s1 + $0x10] sm:$0xff]  }
   0x3   :  { %357 = vmatpush3.bf16.msra.mxu0 %v401_v1  ;;  %392 = vmatpush3.bf16.msra.mxu1 %v401_v1  ;;  %v406_v6 = vld [vmem:[%s521_s1 + $0x58] sm:$0xff]   ;;  %v408_v8 = vld [vmem:[%s521_s1 + $0x60] sm:$0xff]   ;;  %v410_v10 = vld [vmem:[%s521_s1 + $0x68] sm:$0xff]  }
   0x4   :  { %358 = vmatprep.subr.bf16.mxu0 %v402_v2  ;;  %385 = vmatprep.subr.bf16.mxu1 %v402_v2  ;;  %v407_v7 = vld [vmem:[%s521_s1 + $0x18] sm:$0xff]   ;;  %v409_v9 = vld [vmem:[%s521_s1 + $0x20] sm:$0xff]   ;;  %v411_v13 = vld [vmem:[%s521_s1 + $0x28] sm:$0xff]  }
   0x5   :  { %v418_v11 = vld [vmem:[%s522_s0 + $0x4] ss:$8 sps:$4 sm:$0xff]   ;;  %v421_v12 = vld [vmem:[%s522_s0 + $0x14] ss:$8 sps:$4 sm:$0xff]   ;;  %v416_v18 = vld [vmem:[%s522_s0] ss:$8 sps:$4 sm:$0xff]  }
   0x6   :  { %v412_v14 = vld [vmem:[%s521_s1 + $0x70] sm:$0xff]   ;;  %202 = vmatprep.mubr.bf16.mxu0 %v418_v11  ;;  %210 = vmatprep.mubr.bf16.mxu1 %v421_v12  ;;  %v414_v16 = vld [vmem:[%s521_s1 + $0x78] sm:$0xff]   ;;  %v335_v1 = vld [vmem:[%s523_s2] ss:$0 sm:$0xff] }
   0x7   :  { %359 = vmatpush3.bf16.msra.mxu0 %v403_v3  ;;  %393 = vmatpush3.bf16.msra.mxu1 %v403_v3  ;;  %v413_v15 = vld [vmem:[%s521_s1 + $0x30] sm:$0xff]   ;;  %v415_v17 = vld [vmem:[%s521_s1 + $0x38] sm:$0xff]  }
   0x8   :  { %360 = vmatprep.subr.bf16.mxu0 %v404_v4  ;;  %386 = vmatprep.subr.bf16.mxu1 %v404_v4  ;;  %v419_v19 = vld [vmem:[%s522_s0 + $0x10] ss:$8 sps:$4 sm:$0xff]  }
   0xb   :  { %361 = vmatpush3.bf16.msra.mxu0 %v405_v5  ;;  %394 = vmatpush3.bf16.msra.mxu1 %v405_v5 }
   0xc   :  { %362 = vmatprep.subr.bf16.mxu0 %v406_v6  ;;  %387 = vmatprep.subr.bf16.mxu1 %v406_v6  ;;  %v336_v6 = vld [vmem:[%s524_s3] ss:$0 sm:$0xff] }
   0xf   :  { %363 = vmatpush3.bf16.msra.mxu0 %v407_v7  ;;  %395 = vmatpush3.bf16.msra.mxu1 %v407_v7 }
  0x10   :  { %364 = vmatprep.subr.bf16.mxu0 %v408_v8  ;;  %388 = vmatprep.subr.bf16.mxu1 %v408_v8 }
  0x13   :  { %365 = vmatpush3.bf16.msra.mxu0 %v409_v9  ;;  %396 = vmatpush3.bf16.msra.mxu1 %v409_v9 }
  0x14   :  { %366 = vmatprep.subr.bf16.mxu0 %v410_v10  ;;  %389 = vmatprep.subr.bf16.mxu1 %v410_v10 }
  0x17   :  { %367 = vmatpush3.bf16.msra.mxu0 %v411_v13  ;;  %397 = vmatpush3.bf16.msra.mxu1 %v411_v13 }
  0x18   :  { %368 = vmatprep.subr.bf16.mxu0 %v412_v14  ;;  %390 = vmatprep.subr.bf16.mxu1 %v412_v14 }
  0x1b   :  { %369 = vmatpush3.bf16.msra.mxu0 %v413_v15  ;;  %398 = vmatpush3.bf16.msra.mxu1 %v413_v15 }
  0x1c   :  { %370 = vmatprep.subr.bf16.mxu0 %v414_v16  ;;  %391 = vmatprep.subr.bf16.mxu1 %v414_v16 }
  0x1f   :  { %371 = vmatpush3.bf16.msra.mxu0 %v415_v17  ;;  %399 = vmatpush3.bf16.msra.mxu1 %v415_v17 }
  0x22   :  { %203 = vmatmul.mubr.bf16.vlgmr.msra.gmra.mrb[0].mxu0 %v416_v18  ;;  %211 = vmatmul.mubr.bf16.vlgmr.msra.gmra.mrb[0].mxu1 %v419_v19 }
  0xf5   :  { %v372_v20 = vpop.f32.mrb[0].mxu0  ;;  %v378_v21 = vpop.f32.mrb[0].mxu1 }
  0xf6   :  { %v373_v22 = vpop.f32.mrb[1].mxu0  ;;  %v379_v23 = vpop.f32.mrb[1].mxu1 }
  0xf7   :  { %v374_v24 = vadd.f32 %v373_v22, %v372_v20  ;;  %v375_v25 = vpop.f32.mrb[2].mxu0  ;;  %v380_v26 = vadd.f32 %v379_v23, %v378_v21  ;;  %v381_v27 = vpop.f32.mrb[2].mxu1 }
  0xf8   :  { %v376_v28 = vpop.f32.mrb[3].mxu0  ;;  %v382_v29 = vpop.f32.mrb[3].mxu1 }
  0xf9   :  { %v377_v30 = vadd.f32 %v376_v28, %v375_v25  ;;  %v383_v31 = vadd.f32 %v382_v29, %v381_v27  ;;  %v230_v32 = vmul.f32 %v374_v24, %v374_v24  ;;  %v232_v33 = vmul.f32 %v380_v26, %v380_v26 }
  0xfb   :  { %v219_v34 = vadd.f32 %v377_v30, %v374_v24  ;;  %v231_v35 = vmul.f32 %v377_v30, %v377_v30  ;;  %v233_v39 = vmul.f32 %v383_v31, %v383_v31 }
  0xfd   :  { %v234_v36 = vadd.f32 %v231_v35, %v230_v32  ;;  %v220_v37 = vadd.f32 %v380_v26, %v219_v34 }
  0xff   :  { %v221_v38 = vadd.f32 %v383_v31, %v220_v37  ;;  %v235_v40 = vadd.f32 %v234_v36, %v232_v33 }
 0x101   :  { %v222_v41 = vrot.slane %v221_v38, 4  ;;  %v236_v42 = vadd.f32 %v235_v40, %v233_v39 }
 0x103   :  { %v223_v43 = vadd.f32 %v222_v41, %v221_v38  ;;  %v237_v44 = vrot.slane %v236_v42, 4 }
 0x105   :  { %v224_v45 = vrot.slane %v223_v43, 2  ;;  %v238_v46 = vadd.f32 %v237_v44, %v236_v42 }
 0x107   :  { %v225_v47 = vadd.f32 %v224_v45, %v223_v43  ;;  %v239_v48 = vrot.slane %v238_v46, 2 }
 0x109   :  { %v226_v49 = vrot.slane %v225_v47, 1  ;;  %v240_v50 = vadd.f32 %v239_v48, %v238_v46 }
 0x10b   :  { %v227_v51 = vadd.f32 %v226_v49, %v225_v47  ;;  %v241_v52 = vrot.slane %v240_v50, 1 }
 0x10d   :  { %v229_v53 = vmul.f32 0.03125, %v227_v51  ;;  %v242_v54 = vadd.f32 %v241_v52, %v240_v50 }
 0x10f   :  { %v243_v55 = vmul.f32 0.03125, %v242_v54  ;;  %v244_v56 = vmul.f32 %v229_v53, %v229_v53  ;;  %v247_v57 = vsub.f32 %v374_v24, %v229_v53  ;;  %v248_v58 = vsub.f32 %v377_v30, %v229_v53 }
 0x110   :  { %v249_v59 = vsub.f32 %v380_v26, %v229_v53  ;;  %v250_v60 = vsub.f32 %v383_v31, %v229_v53 }
 0x111   :  { %v245_v61 = vsub.f32 %v243_v55, %v244_v56 }
 0x113   :  { %v246_v62 = vmax.f32 %v245_v61, 0.0 }
 0x115   :  { %v251_v63 = vadd.f32 1e-05, %v246_v62 }
 0x117   :  { %422 = vrsqrt.f32 %v251_v63 }
 0x121   :  { %v423_v0 = vpop.eup %422 }
 0x122   :  { %v253_v2 = vmul.f32 %v423_v0, %v247_v57  ;;  %v254_v3 = vmul.f32 %v423_v0, %v248_v58  ;;  %v255_v4 = vmul.f32 %v423_v0, %v249_v59  ;;  %v256_v5 = vmul.f32 %v423_v0, %v250_v60 }
 0x124   :  { %v264_v7 = vmul.f32 %v335_v1, %v253_v2  ;;  %v265_v8 = vmul.f32 %v335_v1, %v254_v3  ;;  %v266_v9 = vmul.f32 %v335_v1, %v255_v4  ;;  %v267_v10 = vmul.f32 %v335_v1, %v256_v5 }
 0x126   :  { %v275_v11 = vadd.f32 %v336_v6, %v264_v7  ;;  %v276_v12 = vadd.f32 %v336_v6, %v265_v8  ;;  %v277_v13 = vadd.f32 %v336_v6, %v266_v9  ;;  %v278_v14 = vadd.f32 %v336_v6, %v267_v10 }
 0x128   :  { %vm279_vm0 = vcmp.ge.f32.partialorder %v275_v11, 0.0  ;;  %vm280_vm1 = vcmp.ge.f32.partialorder %v276_v12, 0.0  ;;  %vm281_vm2 = vcmp.ge.f32.partialorder %v277_v13, 0.0  ;;  %vm282_vm3 = vcmp.ge.f32.partialorder %v278_v14, 0.0 }
 0x129   :  { %v283_v15 = vmul.f32 0.01, %v275_v11  ;;  %v284_v16 = vmul.f32 0.01, %v276_v12  ;;  %v285_v17 = vmul.f32 0.01, %v277_v13 }
 0x12a   :  { %v286_v18 = vmul.f32 0.01, %v278_v14 }
 0x12b   :  { %v287_v19 = vsel %vm279_vm0, %v275_v11, %v283_v15  ;;  %v288_v20 = vsel %vm280_vm1, %v276_v12, %v284_v16  ;;  %v289_v21 = vsel %vm281_vm2, %v277_v13, %v285_v17 }
 0x12c   :  { %v290_v22 = vsel %vm282_vm3, %v278_v14, %v286_v18  ;;  %v348_v23 = vpack.c.bf16 %v288_v20, %v287_v19 }
 0x12d   :  { %v353_v24 = vpack.c.bf16 %v290_v22, %v289_v21 }
 0x12e   :  { %349 = vst [vmem:[%s525_s4] sm:$0xff] %v348_v23  }
 0x12f   :  { %355 = vst [vmem:[%s525_s4 + $0x8] sm:$0xff] %v353_v24  }

// kernel: vae_forward.26
= control target key start
LH: loop header
LB: loop body
LE: loop exit
PB: predicated region body
PF: predicated region fallthrough
CT: control target
= control target key end

     0   :  { %s389_s1 = inlined_call_operand.vmem [shape: bf16[256,128], index: 1, kind: input, shape index: {}]   ;;  %s390_s0 = inlined_call_operand.vmem [shape: bf16[8,256], index: 0, kind: input, shape index: {}]   ;;  %s391_s2 = inlined_call_operand.vmem [shape: f32[1,128], index: 2, kind: input, shape index: {}]   ;;  %s392_s3 = inlined_call_operand.vmem [shape: f32[1,128], index: 3, kind: input, shape index: {}]   ;;  %s393_s4 = inlined_call_operand.vmem [shape: bf16[8,128], index: 4, kind: output, shape index: {}]  }
   0x1   :  { %v284_v0 = vld [vmem:[%s389_s1 + $0x40] sm:$0xff]   ;;  %v286_v2 = vld [vmem:[%s389_s1 + $0x48] sm:$0xff]   ;;  %v288_v4 = vld [vmem:[%s389_s1 + $0x50] sm:$0xff]  }
   0x2   :  { %v285_v1 = vld [vmem:[%s389_s1] sm:$0xff]   ;;  %262 = vmatprep.subr.bf16.mxu0 %v284_v0  ;;  %v287_v3 = vld [vmem:[%s389_s1 + $0x8] sm:$0xff]   ;;  %v289_v5 = vld [vmem:[%s389_s1 + $0x10] sm:$0xff]  }
   0x3   :  { %263 = vmatpush3.bf16.msra.mxu0 %v285_v1  ;;  %v290_v6 = vld [vmem:[%s389_s1 + $0x58] sm:$0xff]   ;;  %v292_v8 = vld [vmem:[%s389_s1 + $0x60] sm:$0xff]   ;;  %v294_v10 = vld [vmem:[%s389_s1 + $0x68] sm:$0xff]  }
   0x4   :  { %264 = vmatprep.subr.bf16.mxu0 %v286_v2  ;;  %v291_v7 = vld [vmem:[%s389_s1 + $0x18] sm:$0xff]   ;;  %v293_v9 = vld [vmem:[%s389_s1 + $0x20] sm:$0xff]   ;;  %v295_v13 = vld [vmem:[%s389_s1 + $0x28] sm:$0xff]  }
   0x5   :  { %v18_v11 = vld [vmem:[%s390_s0] sm:$0xff]  ;;  %v296_v14 = vld [vmem:[%s389_s1 + $0x70] sm:$0xff]   ;;  %v298_v16 = vld [vmem:[%s389_s1 + $0x78] sm:$0xff]  }
   0x6   :  { %v243_v12 = vcombine.high %v18_v11, %v18_v11  ;;  %v297_v15 = vld [vmem:[%s389_s1 + $0x30] sm:$0xff]   ;;  %v299_v17 = vld [vmem:[%s389_s1 + $0x38] sm:$0xff]   ;;  %v242_v18 = vcombine.low %v18_v11, %v18_v11  ;;  %v260_v45 = vld [vmem:[%s391_s2] ss:$0 sm:$0xff] }
   0x7   :  { %265 = vmatpush3.bf16.msra.mxu0 %v287_v3  ;;  %v261_v47 = vld [vmem:[%s392_s3] ss:$0 sm:$0xff] }
   0x8   :  { %266 = vmatprep.subr.bf16.mxu0 %v288_v4  ;;  %186 = vmatprep.mubr.bf16.mxu0 %v243_v12 }
   0xb   :  { %267 = vmatpush3.bf16.msra.mxu0 %v289_v5 }
   0xc   :  { %268 = vmatprep.subr.bf16.mxu0 %v290_v6 }
   0xf   :  { %269 = vmatpush3.bf16.msra.mxu0 %v291_v7 }
  0x10   :  { %270 = vmatprep.subr.bf16.mxu0 %v292_v8 }
  0x13   :  { %271 = vmatpush3.bf16.msra.mxu0 %v293_v9 }
  0x14   :  { %272 = vmatprep.subr.bf16.mxu0 %v294_v10 }
  0x17   :  { %273 = vmatpush3.bf16.msra.mxu0 %v295_v13 }
  0x18   :  { %274 = vmatprep.subr.bf16.mxu0 %v296_v14 }
  0x1b   :  { %275 = vmatpush3.bf16.msra.mxu0 %v297_v15 }
  0x1c   :  { %276 = vmatprep.subr.bf16.mxu0 %v298_v16 }
  0x1f   :  { %277 = vmatpush3.bf16.msra.mxu0 %v299_v17 }
  0x22   :  { %187 = vmatmul.mubr.bf16.vlgmr.msra.gmra.mrb[0].mxu0 %v242_v18 }
  0xf5   :  { %v278_v19 = vpop.f32.mrb[0].mxu0 }
  0xf6   :  { %v279_v20 = vpop.f32.mrb[1].mxu0 }
  0xf7   :  { %v280_v21 = vadd.f32 %v279_v20, %v278_v19  ;;  %v281_v22 = vpop.f32.mrb[2].mxu0 }
  0xf8   :  { %v282_v23 = vpop.f32.mrb[3].mxu0 }
  0xf9   :  { %v194_v24 = vrot.slane %v280_v21, 4  ;;  %v202_v25 = vmul.f32 %v280_v21, %v280_v21 }
  0xfb   :  { %v195_v26 = vadd.f32 %v280_v21, %v194_v24  ;;  %v203_v27 = vrot.slane %v202_v25, 4 }
  0xfd   :  { %v196_v28 = vrot.slane %v195_v26, 2  ;;  %v204_v29 = vadd.f32 %v203_v27, %v202_v25 }
  0xff   :  { %v197_v30 = vadd.f32 %v196_v28, %v195_v26  ;;  %v205_v31 = vrot.slane %v204_v29, 2 }
 0x101   :  { %v198_v32 = vrot.slane %v197_v30, 1  ;;  %v206_v33 = vadd.f32 %v205_v31, %v204_v29 }
 0x103   :  { %v199_v34 = vadd.f32 %v198_v32, %v197_v30  ;;  %v207_v35 = vrot.slane %v206_v33, 1 }
 0x105   :  { %v201_v36 = vmul.f32 0.125, %v199_v34  ;;  %v208_v37 = vadd.f32 %v207_v35, %v206_v33 }
 0x107   :  { %v209_v38 = vmul.f32 0.125, %v208_v37  ;;  %v210_v39 = vmul.f32 %v201_v36, %v201_v36  ;;  %v213_v43 = vsub.f32 %v280_v21, %v201_v36 }
 0x109   :  { %v211_v40 = vsub.f32 %v209_v38, %v210_v39 }
 0x10b   :  { %v212_v41 = vmax.f32 %v211_v40, 0.0 }
 0x10d   :  { %v214_v42 = vadd.f32 1e-05, %v212_v41 }
 0x10f   :  { %302 = vrsqrt.f32 %v214_v42 }
 0x119   :  { %v303_v44 = vpop.eup %302 }
 0x11a   :  { %v216_v46 = vmul.f32 %v303_v44, %v213_v43 }
 0x11c   :  { %v224_v48 = vmul.f32 %v260_v45, %v216_v46 }
 0x11e   :  { %v232_v49 = vadd.f32 %v261_v47, %v224_v48 }
 0x120   :  { %vm233_vm0 = vcmp.ge.f32.partialorder %v232_v49, 0.0  ;;  %v234_v50 = vmul.f32 0.01, %v232_v49 }
 0x122   :  { %v235_v51 = vsel %vm233_vm0, %v232_v49, %v234_v50 }
 0x123   :  { %v236_v52 = vpack.c.bf16 %v235_v51, %v235_v51 }
 0x125   :  { %237 = vst [vmem:[%s393_s4] sm:$0xf] %v236_v52 }

// kernel: vae_forward.28
= control target key start
LH: loop header
LB: loop body
LE: loop exit
PB: predicated region body
PF: predicated region fallthrough
CT: control target
= control target key end

     0   :  { %v468_v1 = vmov 0.0   ;;  %vm469_vm0 = vmmov 0   ;;  %s590_s1 = inlined_call_operand.vmem [shape: bf16[384,128], index: 1, kind: input, shape index: {}]   ;;  %s591_s0 = inlined_call_operand.vmem [shape: bf16[8,384], index: 0, kind: input, shape index: {}]   ;;  %s592_s2 = inlined_call_operand.vmem [shape: f32[1,128], index: 2, kind: input, shape index: {}]   ;;  %s593_s4 = inlined_call_operand.vmem [shape: bf16[8,128], index: 4, kind: input, shape index: {}]   ;;  %s594_s3 = inlined_call_operand.vmem [shape: f32[1,128], index: 3, kind: input, shape index: {}]   ;;  %s595_s5 = inlined_call_operand.vmem [shape: bf16[8,128], index: 5, kind: output, shape index: {}]  }
   0x1   :  { %v439_v0 = vld [vmem:[%s590_s1 + $0x40] sm:$0xff]   ;;  %417 = vmatprep.subr.bf16.mxu1 %v468_v1  ;;  %433 = vmatprep.mubr.msk.bf16.mxu1 %vm469_vm0, %v468_v1  ;;  %v442_v4 = vld [vmem:[%s590_s1 + $0x48] sm:$0xff]   ;;  %v445_v7 = vld [vmem:[%s590_s1 + $0x50] sm:$0xff]  }
   0x2   :  { %v440_v2 = vld [vmem:[%s590_s1] sm:$0xff]   ;;  %386 = vmatprep.subr.bf16.mxu0 %v439_v0  ;;  %v443_v5 = vld [vmem:[%s590_s1 + $0x8] sm:$0xff]   ;;  %v446_v8 = vld [vmem:[%s590_s1 + $0x10] sm:$0xff]  }
   0x3   :  { %v441_v3 = vld [vmem:[%s590_s1 + $0x80] sm:$0xff]   ;;  %387 = vmatpush3.bf16.msra.mxu0 %v440_v2  ;;  %v444_v6 = vld [vmem:[%s590_s1 + $0x88] sm:$0xff]   ;;  %v447_v9 = vld [vmem:[%s590_s1 + $0x90] sm:$0xff]  }
   0x4   :  { %418 = vmatpush3.bf16.msra.mxu1 %v441_v3  ;;  %388 = vmatprep.subr.bf16.mxu0 %v442_v4  ;;  %v448_v10 = vld [vmem:[%s590_s1 + $0x58] sm:$0xff]   ;;  %v451_v13 = vld [vmem:[%s590_s1 + $0x60] sm:$0xff]   ;;  %v454_v16 = vld [vmem:[%s590_s1 + $0x68] sm:$0xff]  }
   0x5   :  { %419 = vmatprep.subr.bf16.mxu1 %v468_v1  ;;  %v449_v11 = vld [vmem:[%s590_s1 + $0x18] sm:$0xff]   ;;  %v452_v14 = vld [vmem:[%s590_s1 + $0x20] sm:$0xff]   ;;  %v455_v17 = vld [vmem:[%s590_s1 + $0x28] sm:$0xff]  }
   0x6   :  { %v450_v12 = vld [vmem:[%s590_s1 + $0x98] sm:$0xff]   ;;  %v453_v15 = vld [vmem:[%s590_s1 + $0xa0] sm:$0xff]   ;;  %v456_v18 = vld [vmem:[%s590_s1 + $0xa8] sm:$0xff]  }
   0x7   :  { %389 = vmatpush3.bf16.msra.mxu0 %v443_v5  ;;  %v457_v19 = vld [vmem:[%s590_s1 + $0x70] sm:$0xff]   ;;  %v460_v22 = vld [vmem:[%s590_s1 + $0x78] sm:$0xff]   ;;  %v21_v23 = vld [vmem:[%s591_s0] sm:$0xff] }
   0x8   :  { %420 = vmatpush3.bf16.msra.mxu1 %v444_v6  ;;  %390 = vmatprep.subr.bf16.mxu0 %v445_v7  ;;  %v458_v20 = vld [vmem:[%s590_s1 + $0x30] sm:$0xff]   ;;  %v358_v24 = vcombine.high %v21_v23, %v21_v23  ;;  %v461_v25 = vld [vmem:[%s590_s1 + $0x38] sm:$0xff]   ;;  %v357_v27 = vcombine.low %v21_v23, %v21_v23  ;;  %v465_v28 = vld [vmem:[%s591_s0 + $0x8] ss:$0 sps:$4 sm:$0xff]  }
   0x9   :  { %421 = vmatprep.subr.bf16.mxu1 %v468_v1  ;;  %v459_v21 = vld [vmem:[%s590_s1 + $0xb0] sm:$0xff]   ;;  %v462_v26 = vld [vmem:[%s590_s1 + $0xb8] sm:$0xff]   ;;  %v384_v60 = vld [vmem:[%s592_s2] ss:$0 sm:$0xff] }
   0xa   :  { %258 = vmatprep.mubr.bf16.mxu0 %v358_v24  ;;  %v345_v61 = vld [vmem:[%s593_s4] sm:$0xf] }
   0xb   :  { %391 = vmatpush3.bf16.msra.mxu0 %v446_v8  ;;  %v385_v63 = vld [vmem:[%s594_s3] ss:$0 sm:$0xff] }
   0xc   :  { %422 = vmatpush3.bf16.msra.mxu1 %v447_v9  ;;  %392 = vmatprep.subr.bf16.mxu0 %v448_v10 }
   0xd   :  { %423 = vmatprep.subr.bf16.mxu1 %v468_v1 }
   0xf   :  { %393 = vmatpush3.bf16.msra.mxu0 %v449_v11 }
  0x10   :  { %424 = vmatpush3.bf16.msra.mxu1 %v450_v12  ;;  %394 = vmatprep.subr.bf16.mxu0 %v451_v13 }
  0x11   :  { %425 = vmatprep.subr.bf16.mxu1 %v468_v1 }
  0x13   :  { %395 = vmatpush3.bf16.msra.mxu0 %v452_v14 }
  0x14   :  { %426 = vmatpush3.bf16.msra.mxu1 %v453_v15  ;;  %396 = vmatprep.subr.bf16.mxu0 %v454_v16 }
  0x15   :  { %427 = vmatprep.subr.bf16.mxu1 %v468_v1 }
  0x17   :  { %397 = vmatpush3.bf16.msra.mxu0 %v455_v17 }
  0x18   :  { %428 = vmatpush3.bf16.msra.mxu1 %v456_v18  ;;  %398 = vmatprep.subr.bf16.mxu0 %v457_v19 }
  0x19   :  { %429 = vmatprep.subr.bf16.mxu1 %v468_v1 }
  0x1b   :  { %399 = vmatpush3.bf16.msra.mxu0 %v458_v20 }
  0x1c   :  { %430 = vmatpush3.bf16.msra.mxu1 %v459_v21  ;;  %400 = vmatprep.subr.bf16.mxu0 %v460_v22 }
  0x1d   :  { %431 = vmatprep.subr.bf16.mxu1 %v468_v1  ;;  %v346_v1 = vunpack.c.l.bf16 %v345_v61 }
  0x1f   :  { %401 = vmatpush3.bf16.msra.mxu0 %v461_v25 }
  0x20   :  { %432 = vmatpush3.bf16.msra.mxu1 %v462_v26 }
  0x22   :  { %259 = vmatmul.mubr.bf16.vlgmr.msra.gmra.mrb[0].mxu0 %v357_v27 }
  0x23   :  { %434 = vmatmul.mubr.bf16.vlgmr.msra.gmra.mrb[0].mxu1 %v465_v28 }
  0xf5   :  { %v402_v29 = vpop.f32.mrb[0].mxu0 }
  0xf6   :  { %v300_v30 = vpop.f32.mrb[0].mxu1  ;;  %v403_v31 = vpop.f32.mrb[1].mxu0 }
  0xf7   :  { %v404_v32 = vadd.f32 %v403_v31, %v402_v29  ;;  %v435_v33 = vpop.f32.mrb[1].mxu1  ;;  %v405_v34 = vpop.f32.mrb[2].mxu0 }
  0xf8   :  { %v303_v35 = vpop.f32.mrb[2].mxu1  ;;  %v406_v36 = vpop.f32.mrb[3].mxu0 }
  0xf9   :  { %v301_v37 = vadd.f32 %v404_v32, %v300_v30  ;;  %v436_v38 = vpop.f32.mrb[3].mxu1 }
  0xfb   :  { %v306_v39 = vrot.slane %v301_v37, 4  ;;  %v314_v40 = vmul.f32 %v301_v37, %v301_v37 }
  0xfd   :  { %v307_v41 = vadd.f32 %v306_v39, %v301_v37  ;;  %v315_v42 = vrot.slane %v314_v40, 4 }
  0xff   :  { %v308_v43 = vrot.slane %v307_v41, 2  ;;  %v316_v44 = vadd.f32 %v315_v42, %v314_v40 }
 0x101   :  { %v309_v45 = vadd.f32 %v308_v43, %v307_v41  ;;  %v317_v46 = vrot.slane %v316_v44, 2 }
 0x103   :  { %v310_v47 = vrot.slane %v309_v45, 1  ;;  %v318_v48 = vadd.f32 %v317_v46, %v316_v44 }
 0x105   :  { %v311_v49 = vadd.f32 %v310_v47, %v309_v45  ;;  %v319_v50 = vrot.slane %v318_v48, 1 }
 0x107   :  { %v313_v51 = vmul.f32 0.125, %v311_v49  ;;  %v320_v52 = vadd.f32 %v319_v50, %v318_v48 }
 0x109   :  { %v321_v53 = vmul.f32 0.125, %v320_v52  ;;  %v322_v54 = vmul.f32 %v313_v51, %v313_v51  ;;  %v325_v58 = vsub.f32 %v301_v37, %v313_v51 }
 0x10b   :  { %v323_v55 = vsub.f32 %v321_v53, %v322_v54 }
 0x10d   :  { %v324_v56 = vmax.f32 %v323_v55, 0.0 }
 0x10f   :  { %v326_v57 = vadd.f32 1e-05, %v324_v56 }
 0x111   :  { %466 = vrsqrt.f32 %v326_v57 }
 0x11b   :  { %v467_v59 = vpop.eup %466 }
 0x11c   :  { %v328_v62 = vmul.f32 %v467_v59, %v325_v58 }
 0x11e   :  { %v336_v0 = vmul.f32 %v384_v60, %v328_v62 }
 0x120   :  { %v344_v2 = vadd.f32 %v385_v63, %v336_v0 }
 0x122   :  { %v347_v3 = vadd.f32 %v346_v1, %v344_v2 }
 0x124   :  { %vm348_vm1 = vcmp.ge.f32.partialorder %v347_v3, 0.0  ;;  %v349_v4 = vmul.f32 0.01, %v347_v3 }
 0x126   :  { %v350_v5 = vsel %vm348_vm1, %v347_v3, %v349_v4 }
 0x127   :  { %v351_v6 = vpack.c.bf16 %v350_v5, %v350_v5 }
 0x129   :  { %352 = vst [vmem:[%s595_s5] sm:$0xf] %v351_v6 }

// kernel: vae_forward.27
= control target key start
LH: loop header
LB: loop body
LE: loop exit
PB: predicated region body
PF: predicated region fallthrough
CT: control target
= control target key end

     0   :  { %v219_v0 = vmov 0.0   ;;  %vm220_vm0 = vmmov 0   ;;  %s282_s1 = inlined_call_operand.vmem [shape: bf16[128,128], index: 1, kind: input, shape index: {}]   ;;  %s283_s0 = inlined_call_operand.vmem [shape: bf16[8,128], index: 0, kind: input, shape index: {}]   ;;  %s284_s2 = inlined_call_operand.vmem [shape: f32[1,128], index: 2, kind: input, shape index: {}]   ;;  %s285_s3 = inlined_call_operand.vmem [shape: f32[1,128], index: 3, kind: input, shape index: {}]   ;;  %s286_s4 = inlined_call_operand.vmem [shape: bf16[8,128], index: 4, kind: output, shape index: {}]  }
   0x1   :  { %187 = vmatprep.subr.bf16.mxu0 %v219_v0  ;;  %v209_v1 = vld [vmem:[%s282_s1] sm:$0xff]   ;;  %203 = vmatprep.mubr.msk.bf16.mxu0 %vm220_vm0, %v219_v0  ;;  %v210_v2 = vld [vmem:[%s282_s1 + $0x8] sm:$0xff]   ;;  %v211_v3 = vld [vmem:[%s282_s1 + $0x10] sm:$0xff]  }
   0x2   :  { %188 = vmatpush3.bf16.msra.mxu0 %v209_v1  ;;  %v212_v4 = vld [vmem:[%s282_s1 + $0x18] sm:$0xff]   ;;  %v213_v5 = vld [vmem:[%s282_s1 + $0x20] sm:$0xff]   ;;  %v214_v6 = vld [vmem:[%s282_s1 + $0x28] sm:$0xff]  }
   0x3   :  { %189 = vmatprep.subr.bf16.mxu0 %v219_v0  ;;  %v215_v7 = vld [vmem:[%s282_s1 + $0x30] sm:$0xff]   ;;  %v216_v8 = vld [vmem:[%s282_s1 + $0x38] sm:$0xff]   ;;  %v18_v9 = vld [vmem:[%s283_s0] sm:$0xf] }
   0x4   :  { %v176_v35 = vld [vmem:[%s284_s2] ss:$0 sm:$0xff] }
   0x5   :  { %v177_v37 = vld [vmem:[%s285_s3] ss:$0 sm:$0xff] }
   0x6   :  { %190 = vmatpush3.bf16.msra.mxu0 %v210_v2 }
   0x7   :  { %191 = vmatprep.subr.bf16.mxu0 %v219_v0 }
   0xa   :  { %192 = vmatpush3.bf16.msra.mxu0 %v211_v3 }
   0xb   :  { %193 = vmatprep.subr.bf16.mxu0 %v219_v0 }
   0xe   :  { %194 = vmatpush3.bf16.msra.mxu0 %v212_v4 }
   0xf   :  { %195 = vmatprep.subr.bf16.mxu0 %v219_v0 }
  0x12   :  { %196 = vmatpush3.bf16.msra.mxu0 %v213_v5 }
  0x13   :  { %197 = vmatprep.subr.bf16.mxu0 %v219_v0 }
  0x16   :  { %198 = vmatpush3.bf16.msra.mxu0 %v214_v6 }
  0x17   :  { %199 = vmatprep.subr.bf16.mxu0 %v219_v0 }
  0x1a   :  { %200 = vmatpush3.bf16.msra.mxu0 %v215_v7 }
  0x1b   :  { %201 = vmatprep.subr.bf16.mxu0 %v219_v0 }
  0x1e   :  { %202 = vmatpush3.bf16.msra.mxu0 %v216_v8 }
  0x21   :  { %204 = vmatmul.mubr.bf16.vlgmr.msra.gmra.mrb[0].mxu0 %v18_v9 }
  0xf4   :  { %v117_v10 = vpop.f32.mrb[0].mxu0 }
  0xf5   :  { %v123_v11 = vrot.slane %v117_v10, 4  ;;  %v131_v12 = vmul.f32 %v117_v10, %v117_v10  ;;  %v205_v13 = vpop.f32.mrb[1].mxu0 }
  0xf6   :  { %v120_v14 = vpop.f32.mrb[2].mxu0 }
  0xf7   :  { %v124_v15 = vadd.f32 %v123_v11, %v117_v10  ;;  %v132_v16 = vrot.slane %v131_v12, 4  ;;  %v206_v17 = vpop.f32.mrb[3].mxu0 }
  0xf9   :  { %v125_v18 = vrot.slane %v124_v15, 2  ;;  %v133_v19 = vadd.f32 %v132_v16, %v131_v12 }
  0xfb   :  { %v126_v20 = vadd.f32 %v125_v18, %v124_v15  ;;  %v134_v21 = vrot.slane %v133_v19, 2 }
  0xfd   :  { %v127_v22 = vrot.slane %v126_v20, 1  ;;  %v135_v23 = vadd.f32 %v134_v21, %v133_v19 }
  0xff   :  { %v128_v24 = vadd.f32 %v127_v22, %v126_v20  ;;  %v136_v25 = vrot.slane %v135_v23, 1 }
 0x101   :  { %v130_v26 = vmul.f32 0.125, %v128_v24  ;;  %v137_v27 = vadd.f32 %v136_v25, %v135_v23 }
 0x103   :  { %v138_v28 = vmul.f32 0.125, %v137_v27  ;;  %v139_v29 = vmul.f32 %v130_v26, %v130_v26  ;;  %v142_v33 = vsub.f32 %v117_v10, %v130_v26 }
 0x105   :  { %v140_v30 = vsub.f32 %v138_v28, %v139_v29 }
 0x107   :  { %v141_v31 = vmax.f32 %v140_v30, 0.0 }
 0x109   :  { %v143_v32 = vadd.f32 1e-05, %v141_v31 }
 0x10b   :  { %217 = vrsqrt.f32 %v143_v32 }
 0x115   :  { %v218_v34 = vpop.eup %217 }
 0x116   :  { %v145_v36 = vmul.f32 %v218_v34, %v142_v33 }
 0x118   :  { %v153_v38 = vmul.f32 %v176_v35, %v145_v36 }
 0x11a   :  { %v161_v39 = vadd.f32 %v177_v37, %v153_v38 }
 0x11c   :  { %v162_v40 = vpack.c.bf16 %v161_v39, %v161_v39 }
 0x11e   :  { %163 = vst [vmem:[%s286_s4] sm:$0xf] %v162_v40 }

// kernel: vae_forward.29
= control target key start
LH: loop header
LB: loop body
LE: loop exit
PB: predicated region body
PF: predicated region fallthrough
CT: control target
= control target key end

     0   :  { %v462_v1 = vmov 0.0   ;;  %vm463_vm0 = vmmov 0   ;;  %s576_s1 = inlined_call_operand.vmem [shape: bf16[384,128], index: 1, kind: input, shape index: {}]   ;;  %s577_s0 = inlined_call_operand.vmem [shape: bf16[8,384], index: 0, kind: input, shape index: {}]   ;;  %s578_s2 = inlined_call_operand.vmem [shape: f32[1,128], index: 2, kind: input, shape index: {}]   ;;  %s579_s3 = inlined_call_operand.vmem [shape: f32[1,128], index: 3, kind: input, shape index: {}]   ;;  %s580_s4 = inlined_call_operand.vmem [shape: bf16[8,128], index: 4, kind: output, shape index: {}]  }
   0x1   :  { %v433_v0 = vld [vmem:[%s576_s1 + $0x40] sm:$0xff]   ;;  %411 = vmatprep.subr.bf16.mxu1 %v462_v1  ;;  %427 = vmatprep.mubr.msk.bf16.mxu1 %vm463_vm0, %v462_v1  ;;  %v436_v4 = vld [vmem:[%s576_s1 + $0x48] sm:$0xff]   ;;  %v439_v7 = vld [vmem:[%s576_s1 + $0x50] sm:$0xff]  }
   0x2   :  { %v434_v2 = vld [vmem:[%s576_s1] sm:$0xff]   ;;  %380 = vmatprep.subr.bf16.mxu0 %v433_v0  ;;  %v437_v5 = vld [vmem:[%s576_s1 + $0x8] sm:$0xff]   ;;  %v440_v8 = vld [vmem:[%s576_s1 + $0x10] sm:$0xff]  }
   0x3   :  { %v435_v3 = vld [vmem:[%s576_s1 + $0x80] sm:$0xff]   ;;  %381 = vmatpush3.bf16.msra.mxu0 %v434_v2  ;;  %v438_v6 = vld [vmem:[%s576_s1 + $0x88] sm:$0xff]   ;;  %v441_v9 = vld [vmem:[%s576_s1 + $0x90] sm:$0xff]  }
   0x4   :  { %412 = vmatpush3.bf16.msra.mxu1 %v435_v3  ;;  %382 = vmatprep.subr.bf16.mxu0 %v436_v4  ;;  %v442_v10 = vld [vmem:[%s576_s1 + $0x58] sm:$0xff]   ;;  %v445_v13 = vld [vmem:[%s576_s1 + $0x60] sm:$0xff]   ;;  %v448_v16 = vld [vmem:[%s576_s1 + $0x68] sm:$0xff]  }
   0x5   :  { %413 = vmatprep.subr.bf16.mxu1 %v462_v1  ;;  %v443_v11 = vld [vmem:[%s576_s1 + $0x18] sm:$0xff]   ;;  %v446_v14 = vld [vmem:[%s576_s1 + $0x20] sm:$0xff]   ;;  %v449_v17 = vld [vmem:[%s576_s1 + $0x28] sm:$0xff]  }
   0x6   :  { %v444_v12 = vld [vmem:[%s576_s1 + $0x98] sm:$0xff]   ;;  %v447_v15 = vld [vmem:[%s576_s1 + $0xa0] sm:$0xff]   ;;  %v450_v18 = vld [vmem:[%s576_s1 + $0xa8] sm:$0xff]  }
   0x7   :  { %383 = vmatpush3.bf16.msra.mxu0 %v437_v5  ;;  %v451_v19 = vld [vmem:[%s576_s1 + $0x70] sm:$0xff]   ;;  %v454_v22 = vld [vmem:[%s576_s1 + $0x78] sm:$0xff]   ;;  %v18_v23 = vld [vmem:[%s577_s0] sm:$0xff] }
   0x8   :  { %414 = vmatpush3.bf16.msra.mxu1 %v438_v6  ;;  %384 = vmatprep.subr.bf16.mxu0 %v439_v7  ;;  %v452_v20 = vld [vmem:[%s576_s1 + $0x30] sm:$0xff]   ;;  %v352_v24 = vcombine.high %v18_v23, %v18_v23  ;;  %v455_v25 = vld [vmem:[%s576_s1 + $0x38] sm:$0xff]   ;;  %v351_v27 = vcombine.low %v18_v23, %v18_v23  ;;  %v459_v28 = vld [vmem:[%s577_s0 + $0x8] ss:$0 sps:$4 sm:$0xff]  }
   0x9   :  { %415 = vmatprep.subr.bf16.mxu1 %v462_v1  ;;  %v453_v21 = vld [vmem:[%s576_s1 + $0xb0] sm:$0xff]   ;;  %v456_v26 = vld [vmem:[%s576_s1 + $0xb8] sm:$0xff]   ;;  %v378_v60 = vld [vmem:[%s578_s2] ss:$0 sm:$0xff] }
   0xa   :  { %255 = vmatprep.mubr.bf16.mxu0 %v352_v24  ;;  %v379_v62 = vld [vmem:[%s579_s3] ss:$0 sm:$0xff] }
   0xb   :  { %385 = vmatpush3.bf16.msra.mxu0 %v440_v8 }
   0xc   :  { %416 = vmatpush3.bf16.msra.mxu1 %v441_v9  ;;  %386 = vmatprep.subr.bf16.mxu0 %v442_v10 }
   0xd   :  { %417 = vmatprep.subr.bf16.mxu1 %v462_v1 }
   0xf   :  { %387 = vmatpush3.bf16.msra.mxu0 %v443_v11 }
  0x10   :  { %418 = vmatpush3.bf16.msra.mxu1 %v444_v12  ;;  %388 = vmatprep.subr.bf16.mxu0 %v445_v13 }
  0x11   :  { %419 = vmatprep.subr.bf16.mxu1 %v462_v1 }
  0x13   :  { %389 = vmatpush3.bf16.msra.mxu0 %v446_v14 }
  0x14   :  { %420 = vmatpush3.bf16.msra.mxu1 %v447_v15  ;;  %390 = vmatprep.subr.bf16.mxu0 %v448_v16 }
  0x15   :  { %421 = vmatprep.subr.bf16.mxu1 %v462_v1 }
  0x17   :  { %391 = vmatpush3.bf16.msra.mxu0 %v449_v17 }
  0x18   :  { %422 = vmatpush3.bf16.msra.mxu1 %v450_v18  ;;  %392 = vmatprep.subr.bf16.mxu0 %v451_v19 }
  0x19   :  { %423 = vmatprep.subr.bf16.mxu1 %v462_v1 }
  0x1b   :  { %393 = vmatpush3.bf16.msra.mxu0 %v452_v20 }
  0x1c   :  { %424 = vmatpush3.bf16.msra.mxu1 %v453_v21  ;;  %394 = vmatprep.subr.bf16.mxu0 %v454_v22 }
  0x1d   :  { %425 = vmatprep.subr.bf16.mxu1 %v462_v1 }
  0x1f   :  { %395 = vmatpush3.bf16.msra.mxu0 %v455_v25 }
  0x20   :  { %426 = vmatpush3.bf16.msra.mxu1 %v456_v26 }
  0x22   :  { %256 = vmatmul.mubr.bf16.vlgmr.msra.gmra.mrb[0].mxu0 %v351_v27 }
  0x23   :  { %428 = vmatmul.mubr.bf16.vlgmr.msra.gmra.mrb[0].mxu1 %v459_v28 }
  0xf5   :  { %v396_v29 = vpop.f32.mrb[0].mxu0 }
  0xf6   :  { %v297_v30 = vpop.f32.mrb[0].mxu1  ;;  %v397_v31 = vpop.f32.mrb[1].mxu0 }
  0xf7   :  { %v398_v32 = vadd.f32 %v397_v31, %v396_v29  ;;  %v429_v33 = vpop.f32.mrb[1].mxu1  ;;  %v399_v34 = vpop.f32.mrb[2].mxu0 }
  0xf8   :  { %v300_v35 = vpop.f32.mrb[2].mxu1  ;;  %v400_v36 = vpop.f32.mrb[3].mxu0 }
  0xf9   :  { %v298_v37 = vadd.f32 %v398_v32, %v297_v30  ;;  %v430_v38 = vpop.f32.mrb[3].mxu1 }
  0xfb   :  { %v303_v39 = vrot.slane %v298_v37, 4  ;;  %v311_v40 = vmul.f32 %v298_v37, %v298_v37 }
  0xfd   :  { %v304_v41 = vadd.f32 %v303_v39, %v298_v37  ;;  %v312_v42 = vrot.slane %v311_v40, 4 }
  0xff   :  { %v305_v43 = vrot.slane %v304_v41, 2  ;;  %v313_v44 = vadd.f32 %v312_v42, %v311_v40 }
 0x101   :  { %v306_v45 = vadd.f32 %v305_v43, %v304_v41  ;;  %v314_v46 = vrot.slane %v313_v44, 2 }
 0x103   :  { %v307_v47 = vrot.slane %v306_v45, 1  ;;  %v315_v48 = vadd.f32 %v314_v46, %v313_v44 }
 0x105   :  { %v308_v49 = vadd.f32 %v307_v47, %v306_v45  ;;  %v316_v50 = vrot.slane %v315_v48, 1 }
 0x107   :  { %v310_v51 = vmul.f32 0.125, %v308_v49  ;;  %v317_v52 = vadd.f32 %v316_v50, %v315_v48 }
 0x109   :  { %v318_v53 = vmul.f32 0.125, %v317_v52  ;;  %v319_v54 = vmul.f32 %v310_v51, %v310_v51  ;;  %v322_v58 = vsub.f32 %v298_v37, %v310_v51 }
 0x10b   :  { %v320_v55 = vsub.f32 %v318_v53, %v319_v54 }
 0x10d   :  { %v321_v56 = vmax.f32 %v320_v55, 0.0 }
 0x10f   :  { %v323_v57 = vadd.f32 1e-05, %v321_v56 }
 0x111   :  { %460 = vrsqrt.f32 %v323_v57 }
 0x11b   :  { %v461_v59 = vpop.eup %460 }
 0x11c   :  { %v325_v61 = vmul.f32 %v461_v59, %v322_v58 }
 0x11e   :  { %v333_v63 = vmul.f32 %v378_v60, %v325_v61 }
 0x120   :  { %v341_v0 = vadd.f32 %v379_v62, %v333_v63 }
 0x122   :  { %vm342_vm1 = vcmp.ge.f32.partialorder %v341_v0, 0.0  ;;  %v343_v1 = vmul.f32 0.01, %v341_v0 }
 0x124   :  { %v344_v2 = vsel %vm342_vm1, %v341_v0, %v343_v1 }
 0x125   :  { %v345_v3 = vpack.c.bf16 %v344_v2, %v344_v2 }
 0x127   :  { %346 = vst [vmem:[%s580_s4] sm:$0xf] %v345_v3 }

// kernel: vae_forward.31
= control target key start
LH: loop header
LB: loop body
LE: loop exit
PB: predicated region body
PF: predicated region fallthrough
CT: control target
= control target key end

     0   :  { %s2198_s0 = inlined_call_operand.vmem [shape: bf16[2,128], index: 0, kind: input, shape index: {}]   ;;  %s2199_s1 = inlined_call_operand.vmem [shape: bf16[128,128], index: 1, kind: input, shape index: {}]   ;;  %s2200_s2 = inlined_call_operand.vmem [shape: f32[1,128], index: 2, kind: input, shape index: {}, may-alias: {2,10,13}]   ;;  %s2201_s3 = inlined_call_operand.vmem [shape: f32[1,128], index: 3, kind: input, shape index: {}, may-alias: {3,11,14}]   ;;  %s2202_s4 = inlined_call_operand.vmem [shape: bf16[128,128], index: 4, kind: input, shape index: {}]   ;;  %s2203_s5 = inlined_call_operand.vmem [shape: f32[1,128], index: 5, kind: input, shape index: {}]   ;;  %s2204_s6 = inlined_call_operand.vmem [shape: bf16[128,128], index: 6, kind: input, shape index: {}]   ;;  %s2205_s7 = inlined_call_operand.vmem [shape: f32[1,128], index: 7, kind: input, shape index: {}]   ;;  %s2206_s8 = inlined_call_operand.vmem [shape: f32[2,128], index: 8, kind: input, shape index: {}]   ;;  %s2207_s9 = inlined_call_operand.vmem [shape: bf16[128,128], index: 9, kind: input, shape index: {}]   ;;  %s2208_s10 = inlined_call_operand.vmem [shape: f32[1,128], index: 10, kind: input, shape index: {}, may-alias: {2,10,13}]   ;;  %s2209_s11 = inlined_call_operand.vmem [shape: f32[1,128], index: 11, kind: input, shape index: {}, may-alias: {3,11,14}]   ;;  %s2210_s12 = inlined_call_operand.vmem [shape: bf16[128,128], index: 12, kind: input, shape index: {}]   ;;  %s2211_s13 = inlined_call_operand.vmem [shape: f32[1,128], index: 13, kind: input, shape index: {}, may-alias: {2,10,13}]   ;;  %s2212_s14 = inlined_call_operand.vmem [shape: f32[1,128], index: 14, kind: input, shape index: {}, may-alias: {3,11,14}]   ;;  %s2213_s15 = inlined_call_operand.vmem [shape: bf16[128,256], index: 15, kind: input, shape index: {}]   ;;  %s2214_s16 = inlined_call_operand.vmem [shape: f32[1,256], index: 16, kind: input, shape index: {}]   ;;  %s2215_s17 = inlined_call_operand.vmem [shape: f32[1,256], index: 17, kind: input, shape index: {}]   ;;  %s2216_s18 = inlined_call_operand.vmem [shape: bf16[256,256], index: 18, kind: input, shape index: {}]   ;;  %s2217_s19 = inlined_call_operand.vmem [shape: f32[1,256], index: 19, kind: input, shape index: {}]   ;;  %s2218_s20 = inlined_call_operand.vmem [shape: f32[2,256], index: 20, kind: output, shape index: {0}]   ;;  %s2219_s21 = inlined_call_operand.hbm [shape: f32[2,128], index: 21, kind: output, shape index: {1}]   ;;  %s2220_s22 = inlined_call_operand.hbm [shape: f32[2,128], index: 22, kind: output, shape index: {2}]  }
   0x1   :  { %2224 = sst [smem:[#allocation8_spill]] %s2198_s0 }
   0x2   :  { %2225 = sst [smem:[#allocation9_spill]] %s2199_s1 }
   0x3   :  { %2226 = sst [smem:[#allocation10_spill]] %s2200_s2 }
   0x4   :  { %2227 = sst [smem:[#allocation11_spill]] %s2201_s3 }
   0x5   :  { %2228 = sst [smem:[#allocation12_spill]] %s2202_s4 }
   0x6   :  { %2229 = sst [smem:[#allocation13_spill]] %s2203_s5 }
   0x7   :  { %2230 = sst [smem:[#allocation14_spill]] %s2204_s6 }
   0x8   :  { %28 = vsyncpa [#allocation3], 0  ;;  %s2231_s29 = sld [smem:[#allocation9_spill]]  ;;  %v1678_v1 = vmov 0.0   ;;  %vm1679_vm0 = vmmov 0   ;;  %s2232_s0 = sld [smem:[#allocation8_spill]] }
   0x9   :  { %1401 = vmatprep.subr.bf16.mxu1 %v1678_v1  ;;  %1441 = vmatprep.subr.bf16.mxu0 %v1678_v1 }
   0xa   :  { %1417 = vmatprep.mubr.msk.bf16.mxu1 %vm1679_vm0, %v1678_v1  ;;  %1457 = vmatprep.mubr.msk.bf16.mxu0 %vm1679_vm0, %v1678_v1 }
   0xe   :  { %v1506_v0 = vld [vmem:[%s2231_s29] sm:$0xff]   ;;  %v1507_v2 = vld [vmem:[%s2231_s29 + $0x8] sm:$0xff]   ;;  %v1508_v3 = vld [vmem:[%s2231_s29 + $0x10] sm:$0xff]  }
   0xf   :  { %1402 = vmatpush3.bf16.msra.mxu1 %v1506_v0  ;;  %v1509_v4 = vld [vmem:[%s2231_s29 + $0x18] sm:$0xff]   ;;  %v1510_v5 = vld [vmem:[%s2231_s29 + $0x20] sm:$0xff]   ;;  %v1511_v6 = vld [vmem:[%s2231_s29 + $0x28] sm:$0xff]  }
  0x10   :  { %1403 = vmatprep.subr.bf16.mxu1 %v1678_v1  ;;  %v1512_v7 = vld [vmem:[%s2231_s29 + $0x30] sm:$0xff]   ;;  %v1513_v8 = vld [vmem:[%s2231_s29 + $0x38] sm:$0xff]   ;;  %v71_v9 = vld [vmem:[%s2232_s0] sm:$0x1] }
  0x13   :  { %1404 = vmatpush3.bf16.msra.mxu1 %v1507_v2 }
  0x14   :  { %1405 = vmatprep.subr.bf16.mxu1 %v1678_v1 }
  0x17   :  { %1406 = vmatpush3.bf16.msra.mxu1 %v1508_v3 }
  0x18   :  { %1407 = vmatprep.subr.bf16.mxu1 %v1678_v1 }
  0x1b   :  { %1408 = vmatpush3.bf16.msra.mxu1 %v1509_v4 }
  0x1c   :  { %1409 = vmatprep.subr.bf16.mxu1 %v1678_v1 }
  0x1f   :  { %1410 = vmatpush3.bf16.msra.mxu1 %v1510_v5 }
  0x20   :  { %1411 = vmatprep.subr.bf16.mxu1 %v1678_v1 }
  0x23   :  { %1412 = vmatpush3.bf16.msra.mxu1 %v1511_v6 }
  0x24   :  { %1413 = vmatprep.subr.bf16.mxu1 %v1678_v1 }
  0x27   :  { %1414 = vmatpush3.bf16.msra.mxu1 %v1512_v7 }
  0x28   :  { %1415 = vmatprep.subr.bf16.mxu1 %v1678_v1 }
  0x2b   :  { %1416 = vmatpush3.bf16.msra.mxu1 %v1513_v8 }
  0x2c   :  { %1421 = vmatprep.subr.bf16.mxu1 %v1678_v1 }
  0x2e   :  { %1418 = vmatmul.mubr.bf16.vlgmr.msra.gmra.mrb[0].mxu1 %v71_v9 }
  0x2f   :  { %1437 = vmatprep.mubr.msk.bf16.mxu1 %vm1679_vm0, %v1678_v1 }
  0x30   :  { %29 = vsyncpa [#allocation5], 0  ;;  %s2233_s5 = sld [smem:[#allocation12_spill]]  ;;  %s2234_s6 = sld [smem:[#allocation14_spill]]  ;;  %vm176_vm1 = vcmask 1041408   ;;  %v1530_v60 = vld [vmem:[%s2207_s9] sm:$0xff]  }
  0x31   :  { %s2235_s2 = sld [smem:[#allocation10_spill]]  ;;  %s2236_s28 = sld [smem:[#allocation11_spill]]  ;;  %v1531_v62 = vld [vmem:[%s2207_s9 + $0x8] sm:$0xff]   ;;  %v1532_v63 = vld [vmem:[%s2207_s9 + $0x10] sm:$0xff]   ;;  %v1533_v0 = vld [vmem:[%s2207_s9 + $0x18] sm:$0xff]  }
  0x32   :  { %v1534_v2 = vld [vmem:[%s2207_s9 + $0x20] sm:$0xff]   ;;  %v1535_v3 = vld [vmem:[%s2207_s9 + $0x28] sm:$0xff]   ;;  %v1536_v4 = vld [vmem:[%s2207_s9 + $0x30] sm:$0xff]   ;;  %s2237_s23 = sld [smem:[#allocation13_spill]]  ;;  %s1682_s4 = smov [#allocation4]  }
  0x33   :  { %v1537_v5 = vld [vmem:[%s2207_s9 + $0x38] sm:$0xff]   ;;  %v1278_v7 = vld [vmem:[%s2205_s7] ss:$0 sm:$0xff] }
  0x36   :  { %v1514_v10 = vld [vmem:[%s2233_s5] sm:$0xff]   ;;  %v1516_v12 = vld [vmem:[%s2233_s5 + $0x8] sm:$0xff]   ;;  %v1518_v14 = vld [vmem:[%s2233_s5 + $0x10] sm:$0xff]  }
  0x37   :  { %v1515_v11 = vld [vmem:[%s2234_s6] sm:$0xff]   ;;  %1422 = vmatpush3.bf16.msra.mxu1 %v1514_v10  ;;  %v1517_v13 = vld [vmem:[%s2234_s6 + $0x8] sm:$0xff]   ;;  %v1519_v15 = vld [vmem:[%s2234_s6 + $0x10] sm:$0xff]  }
  0x38   :  { %1442 = vmatpush3.bf16.msra.mxu0 %v1515_v11  ;;  %1423 = vmatprep.subr.bf16.mxu1 %v1678_v1  ;;  %v1520_v16 = vld [vmem:[%s2233_s5 + $0x18] sm:$0xff]   ;;  %v1522_v18 = vld [vmem:[%s2233_s5 + $0x20] sm:$0xff]   ;;  %v1524_v20 = vld [vmem:[%s2233_s5 + $0x28] sm:$0xff]  }
  0x39   :  { %1443 = vmatprep.subr.bf16.mxu0 %v1678_v1  ;;  %v1521_v17 = vld [vmem:[%s2234_s6 + $0x18] sm:$0xff]   ;;  %v1523_v19 = vld [vmem:[%s2234_s6 + $0x20] sm:$0xff]   ;;  %v1525_v21 = vld [vmem:[%s2234_s6 + $0x28] sm:$0xff]  }
  0x3a   :  { %v1526_v22 = vld [vmem:[%s2233_s5 + $0x30] sm:$0xff]   ;;  %v1528_v24 = vld [vmem:[%s2233_s5 + $0x38] sm:$0xff]   ;;  %v1267_v53 = vld [vmem:[%s2235_s2] ss:$0 sm:$0xff] }
  0x3b   :  { %1424 = vmatpush3.bf16.msra.mxu1 %v1516_v12  ;;  %v1527_v23 = vld [vmem:[%s2234_s6 + $0x30] sm:$0xff]   ;;  %v1529_v25 = vld [vmem:[%s2234_s6 + $0x38] sm:$0xff]   ;;  %v1268_v55 = vld [vmem:[%s2236_s28] ss:$0 sm:$0xff] }
  0x3c   :  { %1444 = vmatpush3.bf16.msra.mxu0 %v1517_v13  ;;  %1425 = vmatprep.subr.bf16.mxu1 %v1678_v1  ;;  %v1269_v6 = vld [vmem:[%s2237_s23] ss:$0 sm:$0xff] }
  0x3d   :  { %1445 = vmatprep.subr.bf16.mxu0 %v1678_v1 }
  0x3f   :  { %1426 = vmatpush3.bf16.msra.mxu1 %v1518_v14 }
  0x40   :  { %1446 = vmatpush3.bf16.msra.mxu0 %v1519_v15  ;;  %1427 = vmatprep.subr.bf16.mxu1 %v1678_v1 }
  0x41   :  { %1447 = vmatprep.subr.bf16.mxu0 %v1678_v1 }
  0x43   :  { %1428 = vmatpush3.bf16.msra.mxu1 %v1520_v16 }
  0x44   :  { %1448 = vmatpush3.bf16.msra.mxu0 %v1521_v17  ;;  %1429 = vmatprep.subr.bf16.mxu1 %v1678_v1 }
  0x45   :  { %1449 = vmatprep.subr.bf16.mxu0 %v1678_v1 }
  0x47   :  { %1430 = vmatpush3.bf16.msra.mxu1 %v1522_v18 }
  0x48   :  { %1450 = vmatpush3.bf16.msra.mxu0 %v1523_v19  ;;  %1431 = vmatprep.subr.bf16.mxu1 %v1678_v1 }
  0x49   :  { %1451 = vmatprep.subr.bf16.mxu0 %v1678_v1 }
  0x4b   :  { %1432 = vmatpush3.bf16.msra.mxu1 %v1524_v20  ;;  %v446_v20 = vld [vmem:[%s2206_s8] sm:$0x3] }
  0x4c   :  { %1452 = vmatpush3.bf16.msra.mxu0 %v1525_v21  ;;  %1433 = vmatprep.subr.bf16.mxu1 %v1678_v1 }
  0x4d   :  { %1453 = vmatprep.subr.bf16.mxu0 %v1678_v1 }
  0x4f   :  { %1434 = vmatpush3.bf16.msra.mxu1 %v1526_v22 }
  0x50   :  { %1454 = vmatpush3.bf16.msra.mxu0 %v1527_v23  ;;  %1435 = vmatprep.subr.bf16.mxu1 %v1678_v1 }
  0x51   :  { %1455 = vmatprep.subr.bf16.mxu0 %v1678_v1 }
  0x53   :  { %1436 = vmatpush3.bf16.msra.mxu1 %v1528_v24 }
  0x54   :  { %1456 = vmatpush3.bf16.msra.mxu0 %v1529_v25  ;;  %1461 = vmatprep.subr.bf16.mxu1 %v1678_v1  ;;  %v1538_v25 = vld [vmem:[%s2210_s12] sm:$0xff]  }
  0x55   :  { %1481 = vmatprep.subr.bf16.mxu0 %v1678_v1 }
 0x101   :  { %v170_v26 = vpop.f32.mrb[0].mxu1 }
 0x102   :  { %v177_v27 = vsel %vm176_vm1, %v170_v26, 0.0  ;;  %v186_v28 = vmul.f32 %v170_v26, %v170_v26  ;;  %v1419_v29 = vpop.f32.mrb[1].mxu1 }
 0x103   :  { %v178_v30 = vrot.slane %v177_v27, 4  ;;  %v173_v31 = vpop.f32.mrb[2].mxu1  ;;  %v1542_v29 = vld [vmem:[%s2210_s12 + $0x20] sm:$0xff]  }
 0x104   :  { %v187_v32 = vsel %vm176_vm1, %v186_v28, 0.0  ;;  %v1420_v33 = vpop.f32.mrb[3].mxu1  ;;  %v1541_v28 = vld [vmem:[%s2210_s12 + $0x18] sm:$0xff]   ;;  %v1544_v31 = vld [vmem:[%s2210_s12 + $0x30] sm:$0xff]  }
 0x105   :  { %v179_v34 = vadd.f32 %v178_v30, %v177_v27  ;;  %v188_v35 = vrot.slane %v187_v32, 4  ;;  %v1540_v27 = vld [vmem:[%s2210_s12 + $0x10] sm:$0xff]   ;;  %v1543_v30 = vld [vmem:[%s2210_s12 + $0x28] sm:$0xff]  }
 0x107   :  { %v180_v36 = vrot.slane %v179_v34, 2  ;;  %v189_v37 = vadd.f32 %v188_v35, %v187_v32  ;;  %v1545_v32 = vld [vmem:[%s2210_s12 + $0x38] sm:$0xff]  }
 0x109   :  { %v181_v38 = vadd.f32 %v180_v36, %v179_v34  ;;  %v190_v39 = vrot.slane %v189_v37, 2 }
 0x10b   :  { %v182_v40 = vrot.slane %v181_v38, 1  ;;  %v191_v41 = vadd.f32 %v190_v39, %v189_v37 }
 0x10d   :  { %v183_v42 = vadd.f32 %v182_v40, %v181_v38  ;;  %v192_v43 = vrot.slane %v191_v41, 1 }
 0x10f   :  { %v185_v44 = vmul.f32 0.5, %v183_v42  ;;  %v193_v45 = vadd.f32 %v192_v43, %v191_v41 }
 0x111   :  { %v194_v46 = vmul.f32 0.5, %v193_v45  ;;  %v195_v47 = vmul.f32 %v185_v44, %v185_v44  ;;  %v198_v51 = vsub.f32 %v170_v26, %v185_v44  ;;  %v1539_v26 = vld [vmem:[%s2210_s12 + $0x8] sm:$0xff]  }
 0x113   :  { %v196_v48 = vsub.f32 %v194_v46, %v195_v47 }
 0x115   :  { %v197_v49 = vmax.f32 %v196_v48, 0.0 }
 0x117   :  { %v199_v50 = vadd.f32 1e-05, %v197_v49 }
 0x119   :  { %1618 = vrsqrt.f32 %v199_v50 }
 0x123   :  { %v1619_v52 = vpop.eup %1618 }
 0x124   :  { %v201_v54 = vmul.f32 %v1619_v52, %v198_v51 }
 0x126   :  { %v209_v56 = vmul.f32 %v1267_v53, %v201_v54 }
 0x128   :  { %v217_v57 = vadd.f32 %v1268_v55, %v209_v56 }
 0x12a   :  { %vm218_vm2 = vcmp.ge.f32.partialorder %v217_v57, 0.0  ;;  %v219_v58 = vmul.f32 0.01, %v217_v57 }
 0x12c   :  { %v220_v59 = vsel %vm218_vm2, %v217_v57, %v219_v58 }
 0x12d   :  { %v221_v61 = vpack.c.bf16 %v220_v59, %v220_v59  ;;  %v1295_v59 = vld [vmem:[%s2208_s10] ss:$0 sm:$0xff] }
 0x12f   :  { %1438 = vmatmul.mubr.bf16.vlgmr.msra.gmra.mrb[4].mxu1 %v221_v61  ;;  %1458 = vmatmul.mubr.bf16.vlgmr.msra.gmra.mrb[0].mxu0 %v221_v61  ;;  %v1296_v61 = vld [vmem:[%s2209_s11] ss:$0 sm:$0xff] }
 0x130   :  { %1462 = vmatpush3.bf16.msra.mxu1 %v1530_v60  ;;  %1477 = vmatprep.mubr.msk.bf16.mxu1 %vm1679_vm0, %v1678_v1 }
 0x131   :  { %1463 = vmatprep.subr.bf16.mxu1 %v1678_v1  ;;  %1497 = vmatprep.mubr.msk.bf16.mxu0 %vm1679_vm0, %v1678_v1 }
 0x132   :  { %1482 = vmatpush3.bf16.msra.mxu0 %v1538_v25  ;;  %v1578_v25 = vld [vmem:[%s2216_s18 + $0x24] ss:$8 sps:$4 sm:$0xff]  }
 0x133   :  { %1483 = vmatprep.subr.bf16.mxu0 %v1678_v1 }
 0x134   :  { %1464 = vmatpush3.bf16.msra.mxu1 %v1531_v62 }
 0x135   :  { %1465 = vmatprep.subr.bf16.mxu1 %v1678_v1 }
 0x136   :  { %1484 = vmatpush3.bf16.msra.mxu0 %v1539_v26  ;;  %v1576_v26 = vld [vmem:[%s2216_s18 + $0x20] ss:$8 sps:$4 sm:$0xff]  }
 0x137   :  { %1485 = vmatprep.subr.bf16.mxu0 %v1678_v1 }
 0x138   :  { %1466 = vmatpush3.bf16.msra.mxu1 %v1532_v63 }
 0x139   :  { %1467 = vmatprep.subr.bf16.mxu1 %v1678_v1 }
 0x13a   :  { %1486 = vmatpush3.bf16.msra.mxu0 %v1540_v27  ;;  %v1581_v27 = vld [vmem:[%s2216_s18 + $0x34] ss:$8 sps:$4 sm:$0xff]  }
 0x13b   :  { %1487 = vmatprep.subr.bf16.mxu0 %v1678_v1 }
 0x13c   :  { %1468 = vmatpush3.bf16.msra.mxu1 %v1533_v0 }
 0x13d   :  { %1469 = vmatprep.subr.bf16.mxu1 %v1678_v1 }
 0x13e   :  { %1488 = vmatpush3.bf16.msra.mxu0 %v1541_v28  ;;  %v1579_v28 = vld [vmem:[%s2216_s18 + $0x30] ss:$8 sps:$4 sm:$0xff]  }
 0x13f   :  { %1489 = vmatprep.subr.bf16.mxu0 %v1678_v1 }
 0x140   :  { %1470 = vmatpush3.bf16.msra.mxu1 %v1534_v2 }
 0x141   :  { %1471 = vmatprep.subr.bf16.mxu1 %v1678_v1 }
 0x142   :  { %1490 = vmatpush3.bf16.msra.mxu0 %v1542_v29 }
 0x143   :  { %1491 = vmatprep.subr.bf16.mxu0 %v1678_v1 }
 0x144   :  { %1472 = vmatpush3.bf16.msra.mxu1 %v1535_v3 }
 0x145   :  { %1473 = vmatprep.subr.bf16.mxu1 %v1678_v1 }
 0x146   :  { %1492 = vmatpush3.bf16.msra.mxu0 %v1543_v30 }
 0x147   :  { %1493 = vmatprep.subr.bf16.mxu0 %v1678_v1 }
 0x148   :  { %1474 = vmatpush3.bf16.msra.mxu1 %v1536_v4  ;;  %v1548_v4 = vld [vmem:[%s2213_s15 + $0x4] ss:$8 sps:$4 sm:$0xff]  }
 0x149   :  { %1475 = vmatprep.subr.bf16.mxu1 %v1678_v1 }
 0x14a   :  { %1494 = vmatpush3.bf16.msra.mxu0 %v1544_v31 }
 0x14b   :  { %1495 = vmatprep.subr.bf16.mxu0 %v1678_v1 }
 0x14c   :  { %1476 = vmatpush3.bf16.msra.mxu1 %v1537_v5  ;;  %v1546_v5 = vld [vmem:[%s2213_s15] ss:$8 sps:$4 sm:$0xff]  }
 0x14d   :  { %845 = vmatprep.subr.bf16.mxu1 %v1548_v4  ;;  %v1590_v4 = vld [vmem:[%s2216_s18 + $0x64] ss:$8 sps:$4 sm:$0xff]  }
 0x14e   :  { %1496 = vmatpush3.bf16.msra.mxu0 %v1545_v32 }
 0x202   :  { %v327_v8 = vpop.f32.mrb[4].mxu1  ;;  %v438_v9 = vpop.f32.mrb[0].mxu0 }
 0x203   :  { %v328_v10 = vadd.f32 %v1269_v6, %v327_v8  ;;  %v439_v11 = vadd.f32 %v1278_v7, %v438_v9  ;;  %v1439_v12 = vpop.f32.mrb[5].mxu1  ;;  %v1459_v13 = vpop.f32.mrb[1].mxu0  ;;  %v1551_v6 = vld [vmem:[%s2213_s15 + $0x14] ss:$8 sps:$4 sm:$0xff]   ;;  %v1549_v7 = vld [vmem:[%s2213_s15 + $0x10] ss:$8 sps:$4 sm:$0xff]  }
 0x204   :  { %v330_v14 = vpop.f32.mrb[6].mxu1  ;;  %v441_v15 = vpop.f32.mrb[2].mxu0  ;;  %v1554_v8 = vld [vmem:[%s2213_s15 + $0x24] ss:$8 sps:$4 sm:$0xff]   ;;  %v1552_v9 = vld [vmem:[%s2213_s15 + $0x20] ss:$8 sps:$4 sm:$0xff]  }
 0x205   :  { %444 = vst [vmem:[#allocation2] sm:$0x3] %v328_v10  ;;  %v447_v16 = vmul.f32 0.5, %v439_v11  ;;  %445 = vst [vmem:[#allocation4] sm:$0x3] %v439_v11  ;;  %v1440_v17 = vpop.f32.mrb[7].mxu1 }
 0x206   :  { %v1460_v18 = vpop.f32.mrb[3].mxu0  ;;  %v1555_v11 = vld [vmem:[%s2213_s15 + $0x30] ss:$8 sps:$4 sm:$0xff]   ;;  %v1560_v12 = vld [vmem:[%s2213_s15 + $0x44] ss:$8 sps:$4 sm:$0xff]  }
 0x207   :  { %v448_v19 = vmul.f32 1.442695, %v447_v16  ;;  %v1558_v13 = vld [vmem:[%s2213_s15 + $0x40] ss:$8 sps:$4 sm:$0xff]   ;;  %v1563_v14 = vld [vmem:[%s2213_s15 + $0x54] ss:$8 sps:$4 sm:$0xff]  }
 0x208   :  { %v1561_v15 = vld [vmem:[%s2213_s15 + $0x50] ss:$8 sps:$4 sm:$0xff]   ;;  %v1566_v16 = vld [vmem:[%s2213_s15 + $0x64] ss:$8 sps:$4 sm:$0xff]   ;;  %v1564_v17 = vld [vmem:[%s2213_s15 + $0x60] ss:$8 sps:$4 sm:$0xff]  }
 0x209   :  { %1620 = vpow2.f32 %v448_v19  ;;  %v1567_v18 = vld [vmem:[%s2213_s15 + $0x70] ss:$8 sps:$4 sm:$0xff]   ;;  %v1569_v19 = vld [vmem:[%s2213_s15 + $0x74] ss:$8 sps:$4 sm:$0xff]  }
 0x213   :  { %v1621_v21 = vpop.eup %1620 }
 0x214   :  { %v450_v22 = vmul.f32 %v1621_v21, %v446_v20  ;;  %v1680_v20 = vmov 0   ;;  %v1570_v21 = vld [vmem:[%s2216_s18] ss:$8 sps:$4 sm:$0xff]  }
 0x216   :  { %v451_v23 = vadd.f32 %v450_v22, %v328_v10  ;;  %v1557_v10 = vld [vmem:[%s2213_s15 + $0x34] ss:$8 sps:$4 sm:$0xff]   ;;  %v1572_v22 = vld [vmem:[%s2216_s18 + $0x4] ss:$8 sps:$4 sm:$0xff]  }
 0x217   :  { %1174 = vmatprep.subr.bf16.mxu0 %v1572_v22  ;;  %v1617_v22 = vld [vmem:[%s2216_s18 + $0xf4] ss:$8 sps:$4 sm:$0xff]  }
 0x218   :  { %v452_v24 = vpack.c.bf16 %v451_v23, %v451_v23  ;;  %v1575_v23 = vld [vmem:[%s2216_s18 + $0x14] ss:$8 sps:$4 sm:$0xff]  }
 0x21a   :  { %1478 = vmatmul.mubr.bf16.vlgmr.msra.gmra.mrb[8].mxu1 %v452_v24  ;;  %v1573_v24 = vld [vmem:[%s2216_s18 + $0x10] ss:$8 sps:$4 sm:$0xff]  }
 0x21b   :  { %846 = vmatpush1.bf16.msra.mxu1 %v1546_v5  ;;  %877 = vmatprep.mubr.bf16.mxu1 %v1680_v20  ;;  %v1588_v5 = vld [vmem:[%s2216_s18 + $0x60] ss:$8 sps:$4 sm:$0xff]   ;;  %v1614_v20 = vld [vmem:[%s2216_s18 + $0xe4] ss:$8 sps:$4 sm:$0xff]  }
 0x21c   :  { %847 = vmatprep.subr.bf16.mxu1 %v1551_v6  ;;  %v1593_v6 = vld [vmem:[%s2216_s18 + $0x74] ss:$8 sps:$4 sm:$0xff]  }
 0x21f   :  { %848 = vmatpush1.bf16.msra.mxu1 %v1549_v7  ;;  %v1591_v7 = vld [vmem:[%s2216_s18 + $0x70] ss:$8 sps:$4 sm:$0xff]  }
 0x220   :  { %849 = vmatprep.subr.bf16.mxu1 %v1554_v8  ;;  %v1596_v8 = vld [vmem:[%s2216_s18 + $0x84] ss:$8 sps:$4 sm:$0xff]  }
 0x223   :  { %850 = vmatpush1.bf16.msra.mxu1 %v1552_v9  ;;  %v1594_v9 = vld [vmem:[%s2216_s18 + $0x80] ss:$8 sps:$4 sm:$0xff]  }
 0x224   :  { %851 = vmatprep.subr.bf16.mxu1 %v1557_v10  ;;  %v1599_v10 = vld [vmem:[%s2216_s18 + $0x94] ss:$8 sps:$4 sm:$0xff]  }
 0x227   :  { %852 = vmatpush1.bf16.msra.mxu1 %v1555_v11  ;;  %v1597_v11 = vld [vmem:[%s2216_s18 + $0x90] ss:$8 sps:$4 sm:$0xff]  }
 0x228   :  { %853 = vmatprep.subr.bf16.mxu1 %v1560_v12  ;;  %v1602_v12 = vld [vmem:[%s2216_s18 + $0xa4] ss:$8 sps:$4 sm:$0xff]  }
 0x22b   :  { %854 = vmatpush1.bf16.msra.mxu1 %v1558_v13  ;;  %v1600_v13 = vld [vmem:[%s2216_s18 + $0xa0] ss:$8 sps:$4 sm:$0xff]  }
 0x22c   :  { %855 = vmatprep.subr.bf16.mxu1 %v1563_v14  ;;  %v1605_v14 = vld [vmem:[%s2216_s18 + $0xb4] ss:$8 sps:$4 sm:$0xff]  }
 0x22f   :  { %856 = vmatpush1.bf16.msra.mxu1 %v1561_v15  ;;  %v1603_v15 = vld [vmem:[%s2216_s18 + $0xb0] ss:$8 sps:$4 sm:$0xff]  }
 0x230   :  { %857 = vmatprep.subr.bf16.mxu1 %v1566_v16  ;;  %v1608_v16 = vld [vmem:[%s2216_s18 + $0xc4] ss:$8 sps:$4 sm:$0xff]  }
 0x233   :  { %858 = vmatpush1.bf16.msra.mxu1 %v1564_v17  ;;  %v1606_v17 = vld [vmem:[%s2216_s18 + $0xc0] ss:$8 sps:$4 sm:$0xff]  }
 0x234   :  { %859 = vmatprep.subr.bf16.mxu1 %v1569_v19  ;;  %v1609_v19 = vld [vmem:[%s2216_s18 + $0xd0] ss:$8 sps:$4 sm:$0xff]  }
 0x237   :  { %860 = vmatpush1.bf16.msra.mxu1 %v1567_v18  ;;  %v1611_v18 = vld [vmem:[%s2216_s18 + $0xd4] ss:$8 sps:$4 sm:$0xff]  }
 0x2ed   :  { %v551_v33 = vpop.f32.mrb[8].mxu1 }
 0x2ee   :  { %v557_v34 = vsel %vm176_vm1, %v551_v33, 0.0  ;;  %v565_v35 = vmul.f32 %v551_v33, %v551_v33  ;;  %v1479_v36 = vpop.f32.mrb[9].mxu1 }
 0x2ef   :  { %v558_v37 = vrot.slane %v557_v34, 4  ;;  %v554_v38 = vpop.f32.mrb[10].mxu1 }
 0x2f0   :  { %v566_v39 = vsel %vm176_vm1, %v565_v35, 0.0  ;;  %v1480_v40 = vpop.f32.mrb[11].mxu1 }
 0x2f1   :  { %v559_v41 = vadd.f32 %v558_v37, %v557_v34  ;;  %v567_v42 = vrot.slane %v566_v39, 4 }
 0x2f3   :  { %v560_v43 = vrot.slane %v559_v41, 2  ;;  %v568_v44 = vadd.f32 %v567_v42, %v566_v39 }
 0x2f5   :  { %v561_v45 = vadd.f32 %v560_v43, %v559_v41  ;;  %v569_v46 = vrot.slane %v568_v44, 2 }
 0x2f7   :  { %v562_v47 = vrot.slane %v561_v45, 1  ;;  %v570_v48 = vadd.f32 %v569_v46, %v568_v44 }
 0x2f9   :  { %v563_v1 = vadd.f32 %v562_v47, %v561_v45  ;;  %v571_v49 = vrot.slane %v570_v48, 1 }
 0x2fb   :  { %v564_v50 = vmul.f32 0.5, %v563_v1  ;;  %v572_v51 = vadd.f32 %v571_v49, %v570_v48 }
 0x2fd   :  { %v573_v52 = vmul.f32 0.5, %v572_v51  ;;  %v574_v53 = vmul.f32 %v564_v50, %v564_v50  ;;  %v577_v57 = vsub.f32 %v551_v33, %v564_v50 }
 0x2ff   :  { %v575_v54 = vsub.f32 %v573_v52, %v574_v53 }
 0x301   :  { %v576_v55 = vmax.f32 %v575_v54, 0.0 }
 0x303   :  { %v578_v56 = vadd.f32 1e-05, %v576_v55  ;;  %v1305_v55 = vld [vmem:[%s2211_s13] ss:$0 sm:$0xff]  ;;  %s1245_s13 = sshll.u32 %s1682_s4, 4  ;;  %s1246_s13 = int_to_ptr.vmem [resolvable:$true] %s1245_s13 }
 0x305   :  { %1622 = vrsqrt.f32 %v578_v56 }
 0x30f   :  { %v1623_v58 = vpop.eup %1622 }
 0x310   :  { %v580_v60 = vmul.f32 %v1623_v58, %v577_v57  ;;  %v1306_v57 = vld [vmem:[%s2212_s14] ss:$0 sm:$0xff] }
 0x312   :  { %v588_v62 = vmul.f32 %v1295_v59, %v580_v60 }
 0x314   :  { %v596_v63 = vadd.f32 %v1296_v61, %v588_v62 }
 0x316   :  { %vm597_vm3 = vcmp.ge.f32.partialorder %v596_v63, 0.0  ;;  %v598_v0 = vmul.f32 0.01, %v596_v63 }
 0x318   :  { %v599_v2 = vsel %vm597_vm3, %v596_v63, %v598_v0  ;;  %v1584_v63 = vld [vmem:[%s2216_s18 + $0x44] ss:$8 sps:$4 sm:$0xff]   ;;  %v1582_v0 = vld [vmem:[%s2216_s18 + $0x40] ss:$8 sps:$4 sm:$0xff]  }
 0x319   :  { %v600_v3 = vpack.c.bf16 %v599_v2, %v599_v2  ;;  %v1587_v2 = vld [vmem:[%s2216_s18 + $0x54] ss:$8 sps:$4 sm:$0xff]  }
 0x31b   :  { %1498 = vmatmul.mubr.bf16.vlgmr.msra.gmra.mrb[4].mxu0 %v600_v3  ;;  %v1585_v3 = vld [vmem:[%s2216_s18 + $0x50] ss:$8 sps:$4 sm:$0xff]  }
 0x31c   :  { %1175 = vmatpush1.bf16.msra.mxu0 %v1570_v21  ;;  %v1612_v21 = vld [vmem:[%s2216_s18 + $0xe0] ss:$8 sps:$4 sm:$0xff]  }
 0x31d   :  { %1176 = vmatprep.subr.bf16.mxu0 %v1575_v23  ;;  %v1615_v23 = vld [vmem:[%s2216_s18 + $0xf0] ss:$8 sps:$4 sm:$0xff]  }
 0x320   :  { %1177 = vmatpush1.bf16.msra.mxu0 %v1573_v24 }
 0x321   :  { %1178 = vmatprep.subr.bf16.mxu0 %v1578_v25 }
 0x324   :  { %1179 = vmatpush1.bf16.msra.mxu0 %v1576_v26 }
 0x325   :  { %1180 = vmatprep.subr.bf16.mxu0 %v1581_v27 }
 0x328   :  { %1181 = vmatpush1.bf16.msra.mxu0 %v1579_v28 }
 0x329   :  { %1182 = vmatprep.subr.bf16.mxu0 %v1584_v63 }
 0x32c   :  { %1183 = vmatpush1.bf16.msra.mxu0 %v1582_v0 }
 0x32d   :  { %1184 = vmatprep.subr.bf16.mxu0 %v1587_v2 }
 0x330   :  { %1185 = vmatpush1.bf16.msra.mxu0 %v1585_v3  ;;  %v936_v3 = vlaneseq }
 0x331   :  { %1186 = vmatprep.subr.bf16.mxu0 %v1590_v4 }
 0x334   :  { %1187 = vmatpush1.bf16.msra.mxu0 %v1588_v5 }
 0x335   :  { %1188 = vmatprep.subr.bf16.mxu0 %v1593_v6 }
 0x338   :  { %1189 = vmatpush1.bf16.msra.mxu0 %v1591_v7  ;;  %v937_v7 = vshrl.u32 %v936_v3, 7 }
 0x339   :  { %1190 = vmatprep.subr.bf16.mxu0 %v1596_v8 }
 0x33a   :  { %v2152_v8 = vsub.s32 0, %v937_v7 }
 0x33c   :  { %1191 = vmatpush1.bf16.msra.mxu0 %v1594_v9  ;;  %v934_v9 = vld [vmem:[%s2214_s16] sm:$0x3]  ;;  %s1681_s16 = smov [#allocation2]  }
 0x33d   :  { %1192 = vmatprep.subr.bf16.mxu0 %v1599_v10  ;;  %v2157_v10 = vsub.s32 1, %v937_v7 }
 0x340   :  { %1193 = vmatpush1.bf16.msra.mxu0 %v1597_v11  ;;  %v948_v11 = vld [vmem:[%s2215_s17] sm:$0x3]  ;;  %s1235_s17 = sshll.u32 %s1681_s16, 4  ;;  %s1236_s17 = int_to_ptr.vmem [resolvable:$true] %s1235_s17 }
 0x341   :  { %1194 = vmatprep.subr.bf16.mxu0 %v1602_v12  ;;  %s1630_s0 = scalar_lea.vmem %s1236_s17, 32  ;;  %p1635_p1 = scmp.lt.s32.totalorder %s1236_s17, %s1236_s17 }
 0x342   :  { %p1631_p0 = scmp.ne.s32.totalorder %s1236_s17, %s1630_s0  ;;  %p1636_p2 = scmp.lt.s32.totalorder %s1630_s0, %s1630_s0 }
 0x344   :  { %1195 = vmatpush1.bf16.msra.mxu0 %v1600_v13  ;;  %v939_v13 = vrot.slane %v934_v9, %v2152_v8  ;;  %p1637_p3 = por %p1636_p2, %p1635_p1 }
 0x345   :  { %1196 = vmatprep.subr.bf16.mxu0 %v1605_v14 }
 0x346   :  { %p1638_p4 = pnand %p1637_p3, %p1631_p0 }
 0x348   :  { %1197 = vmatpush1.bf16.msra.mxu0 %v1603_v15 }
 0x349   :  { %1198 = vmatprep.subr.bf16.mxu0 %v1608_v16  ;;  %v943_v16 = vrot.slane %v934_v9, %v2157_v10 }
 0x34c   :  { %1199 = vmatpush1.bf16.msra.mxu0 %v1606_v17 }
 0x34d   :  { %1200 = vmatprep.subr.bf16.mxu0 %v1611_v18 }
 0x350   :  { %1201 = vmatpush1.bf16.msra.mxu0 %v1609_v19  ;;  %v953_v19 = vrot.slane %v948_v11, %v2152_v8 }
 0x351   :  { %1202 = vmatprep.subr.bf16.mxu0 %v1614_v20 }
 0x354   :  { %1203 = vmatpush1.bf16.msra.mxu0 %v1612_v21  ;;  %v957_v21 = vrot.slane %v948_v11, %v2157_v10 }
 0x355   :  { %1204 = vmatprep.subr.bf16.mxu0 %v1617_v22 }
 0x358   :  { %1205 = vmatpush1.bf16.msra.mxu0 %v1615_v23 }
 0x3ee   :  { %v699_v29 = vpop.f32.mrb[4].mxu0 }
 0x3ef   :  { %v705_v30 = vsel %vm176_vm1, %v699_v29, 0.0  ;;  %v713_v31 = vmul.f32 %v699_v29, %v699_v29  ;;  %v1499_v32 = vpop.f32.mrb[5].mxu0 }
 0x3f0   :  { %v706_v33 = vrot.slane %v705_v30, 4  ;;  %v702_v34 = vpop.f32.mrb[6].mxu0 }
 0x3f1   :  { %v714_v35 = vsel %vm176_vm1, %v713_v31, 0.0  ;;  %v1500_v36 = vpop.f32.mrb[7].mxu0 }
 0x3f2   :  { %v707_v37 = vadd.f32 %v706_v33, %v705_v30  ;;  %v715_v38 = vrot.slane %v714_v35, 4 }
 0x3f4   :  { %v708_v39 = vrot.slane %v707_v37, 2  ;;  %v716_v40 = vadd.f32 %v715_v38, %v714_v35 }
 0x3f6   :  { %v709_v41 = vadd.f32 %v708_v39, %v707_v37  ;;  %v717_v42 = vrot.slane %v716_v40, 2 }
 0x3f8   :  { %v710_v43 = vrot.slane %v709_v41, 1  ;;  %v718_v44 = vadd.f32 %v717_v42, %v716_v40 }
 0x3fa   :  { %v711_v45 = vadd.f32 %v710_v43, %v709_v41  ;;  %v719_v46 = vrot.slane %v718_v44, 1 }
 0x3fc   :  { %v712_v47 = vmul.f32 0.5, %v711_v45  ;;  %v720_v48 = vadd.f32 %v719_v46, %v718_v44 }
 0x3fe   :  { %v721_v1 = vmul.f32 0.5, %v720_v48  ;;  %v722_v49 = vmul.f32 %v712_v47, %v712_v47  ;;  %v725_v53 = vsub.f32 %v699_v29, %v712_v47 }
 0x400   :  { %v723_v50 = vsub.f32 %v721_v1, %v722_v49 }
 0x402   :  { %v724_v51 = vmax.f32 %v723_v50, 0.0 }
 0x404   :  { %v726_v52 = vadd.f32 1e-05, %v724_v51 }
 0x406   :  { %1624 = vrsqrt.f32 %v726_v52 }
 0x410   :  { %v1625_v54 = vpop.eup %1624 }
 0x411   :  { %v728_v56 = vmul.f32 %v1625_v54, %v725_v53 }
 0x413   :  { %v736_v58 = vmul.f32 %v1305_v55, %v728_v56 }
 0x415   :  { %v744_v59 = vadd.f32 %v1306_v57, %v736_v58 }
 0x417   :  { %vm745_vm4 = vcmp.ge.f32.partialorder %v744_v59, 0.0  ;;  %v746_v60 = vmul.f32 0.01, %v744_v59 }
 0x419   :  { %v747_v61 = vsel %vm745_vm4, %v744_v59, %v746_v60 }
 0x41a   :  { %v748_v62 = vpack.c.bf16 %v747_v61, %v747_v61 }
 0x41c   :  { %878 = vmatmul.mubr.bf16.vlgmr.msra.gmra.mrb[12].mxu1 %v748_v62 }
 0x4ef   :  { %v879_v24 = vpop.f32.mrb[12].mxu1 }
 0x4f0   :  { %v886_v25 = vsel %vm176_vm1, %v879_v24, 0.0  ;;  %v902_v26 = vmul.f32 %v879_v24, %v879_v24  ;;  %v881_v27 = vpop.f32.mrb[13].mxu1 }
 0x4f1   :  { %v887_v28 = vrot.slane %v886_v25, 4  ;;  %v893_v29 = vsel %vm176_vm1, %v881_v27, 0.0  ;;  %v903_v30 = vmul.f32 %v881_v27, %v881_v27  ;;  %v883_v31 = vpop.f32.mrb[14].mxu1 }
 0x4f2   :  { %v904_v32 = vsel %vm176_vm1, %v902_v26, 0.0  ;;  %v894_v33 = vrot.slane %v893_v29, 4  ;;  %v884_v34 = vpop.f32.mrb[15].mxu1 }
 0x4f3   :  { %v888_v35 = vadd.f32 %v887_v28, %v886_v25  ;;  %v905_v36 = vrot.slane %v904_v32, 4  ;;  %v911_v37 = vsel %vm176_vm1, %v903_v30, 0.0 }
 0x4f4   :  { %v895_v38 = vadd.f32 %v894_v33, %v893_v29  ;;  %v912_v39 = vrot.slane %v911_v37, 4 }
 0x4f5   :  { %v889_v40 = vrot.slane %v888_v35, 2  ;;  %v906_v41 = vadd.f32 %v905_v36, %v904_v32 }
 0x4f6   :  { %v896_v42 = vrot.slane %v895_v38, 2  ;;  %v913_v43 = vadd.f32 %v912_v39, %v911_v37 }
 0x4f7   :  { %v890_v44 = vadd.f32 %v889_v40, %v888_v35  ;;  %v907_v45 = vrot.slane %v906_v41, 2 }
 0x4f8   :  { %v897_v46 = vadd.f32 %v896_v42, %v895_v38  ;;  %v914_v47 = vrot.slane %v913_v43, 2 }
 0x4f9   :  { %v891_v48 = vrot.slane %v890_v44, 1  ;;  %v908_v1 = vadd.f32 %v907_v45, %v906_v41 }
 0x4fa   :  { %v898_v49 = vrot.slane %v897_v46, 1  ;;  %v915_v50 = vadd.f32 %v914_v47, %v913_v43 }
 0x4fb   :  { %v892_v51 = vadd.f32 %v891_v48, %v890_v44  ;;  %v909_v52 = vrot.slane %v908_v1, 1 }
 0x4fc   :  { %v899_v53 = vadd.f32 %v898_v49, %v897_v46  ;;  %v916_v54 = vrot.slane %v915_v50, 1 }
 0x4fd   :  { %v900_v55 = vmul.f32 0.5, %v892_v51  ;;  %v910_v56 = vadd.f32 %v909_v52, %v908_v1 }
 0x4fe   :  { %v901_v57 = vmul.f32 0.5, %v899_v53  ;;  %v917_v58 = vadd.f32 %v916_v54, %v915_v50 }
 0x4ff   :  { %v918_v59 = vmul.f32 0.5, %v910_v56  ;;  %v920_v60 = vmul.f32 %v900_v55, %v900_v55  ;;  %v926_v12 = vsub.f32 %v879_v24, %v900_v55 }
 0x500   :  { %v919_v61 = vmul.f32 0.5, %v917_v58  ;;  %v921_v62 = vmul.f32 %v901_v57, %v901_v57  ;;  %v927_v15 = vsub.f32 %v881_v27, %v901_v57 }
 0x501   :  { %v922_v63 = vsub.f32 %v918_v59, %v920_v60 }
 0x502   :  { %v923_v0 = vsub.f32 %v919_v61, %v921_v62 }
 0x503   :  { %v924_v2 = vmax.f32 %v922_v63, 0.0 }
 0x504   :  { %v925_v4 = vmax.f32 %v923_v0, 0.0 }
 0x505   :  { %v928_v5 = vadd.f32 1e-05, %v924_v2 }
 0x506   :  { %v929_v6 = vadd.f32 1e-05, %v925_v4 }
 0x507   :  { %1626 = vrsqrt.f32 %v928_v5 }
 0x508   :  { %1628 = vrsqrt.f32 %v929_v6 }
 0x511   :  { %v1627_v14 = vpop.eup %1626 }
 0x512   :  { %v1629_v17 = vpop.eup %1628  ;;  %v932_v18 = vmul.f32 %v1627_v14, %v926_v12 }
 0x513   :  { %v933_v20 = vmul.f32 %v1629_v17, %v927_v15 }
 0x514   :  { %v946_v22 = vmul.f32 %v939_v13, %v932_v18 }
 0x515   :  { %v947_v23 = vmul.f32 %v943_v16, %v933_v20 }
 0x516   :  { %v960_v25 = vadd.f32 %v953_v19, %v946_v22 }
 0x517   :  { %v961_v26 = vadd.f32 %v957_v21, %v947_v23 }
 0x518   :  { %vm962_vm5 = vcmp.ge.f32.partialorder %v960_v25, 0.0  ;;  %v964_v28 = vmul.f32 0.01, %v960_v25 }
 0x519   :  { %vm963_vm6 = vcmp.ge.f32.partialorder %v961_v26, 0.0  ;;  %v965_v24 = vmul.f32 0.01, %v961_v26 }
 0x51a   :  { %v966_v29 = vsel %vm962_vm5, %v960_v25, %v964_v28 }
 0x51b   :  { %v967_v30 = vsel %vm963_vm6, %v961_v26, %v965_v24  ;;  %v968_v31 = vpack.c.bf16 %v966_v29, %v966_v29 }
 0x51c   :  { %v969_v27 = vpack.c.bf16 %v967_v30, %v967_v30 }
 0x51e   :  { %1206 = vmatprep.mubr.bf16.mxu0 %v969_v27 }
 0x51f   :  { %1207 = vmatmul.mubr.bf16.vlgmr.msra.gmra.mrb[8].mxu0 %v968_v31 }
 0x520   :  { %1641 = shalt.err (!%p1638_p4)
}
 0x521   :  { %s1642_s1 = scalar_lea.hbm %s2219_s21, 32 }
 0x522   :  { %p1643_p5 = scmp.ne.s32.totalorder %s2219_s21, %s1642_s1  ;;  %p1646_p6 = scmp.lt.u32.totalorder %s1642_s1, %s2219_s21 }
 0x524   :  { %p1648_p7 = pnand %p1646_p6, %p1643_p5 }
 0x526   :  { %1651 = shalt.err (!%p1648_p7)
}
 0x527   :  { %1238 = dma.vmem_to_hbm [thread:$0]  %s1236_s17, 32, %s2219_s21, [#allocation3]  }
 0x528   :  { %s1652_s25 = scalar_lea.vmem %s1246_s13, 32  ;;  %p1657_p9 = scmp.lt.s32.totalorder %s1246_s13, %s1246_s13 }
 0x529   :  { %p1653_p8 = scmp.ne.s32.totalorder %s1246_s13, %s1652_s25  ;;  %p1658_p10 = scmp.lt.s32.totalorder %s1652_s25, %s1652_s25 }
 0x52b   :  { %p1659_p11 = por %p1658_p10, %p1657_p9 }
 0x52d   :  { %p1660_p12 = pnand %p1659_p11, %p1653_p8 }
 0x52f   :  { %1663 = shalt.err (!%p1660_p12)
}
 0x530   :  { %s1664_s8 = scalar_lea.hbm %s2220_s22, 32 }
 0x531   :  { %p1665_p13 = scmp.ne.s32.totalorder %s2220_s22, %s1664_s8  ;;  %p1668_p0 = scmp.lt.u32.totalorder %s1664_s8, %s2220_s22 }
 0x533   :  { %p1670_p1 = pnand %p1668_p0, %p1665_p13 }
 0x535   :  { %1673 = shalt.err (!%p1670_p1)
}
 0x536   :  { %1248 = dma.vmem_to_hbm [thread:$0]  %s1246_s13, 32, %s2220_s22, [#allocation5]   ;;  %v1002_v32 = vld [vmem:[%s2217_s19] sm:$0x3] }
 0x537   :  { %v1007_v33 = vrot.slane %v1002_v32, %v2152_v8  ;;  %v1011_v34 = vrot.slane %v1002_v32, %v2157_v10 }
 0x5f2   :  { %v1208_v35 = vpop.f32.mrb[8].mxu0 }
 0x5f3   :  { %v1209_v36 = vadd.f32 %v1208_v35, %v1007_v33  ;;  %v1210_v37 = vpop.f32.mrb[9].mxu0 }
 0x5f4   :  { %v1211_v38 = vadd.f32 %v1210_v37, %v1011_v34  ;;  %v1212_v39 = vpop.f32.mrb[10].mxu0 }
 0x5f5   :  { %v1213_v40 = vpop.f32.mrb[11].mxu0 }
 0x5f6   :  { %v1217_v41 = vcombine.low %v1209_v36, %v1211_v38 }
 0x5f8   :  { %1355 = vst.sshfl [vmem:[%s2218_s20] sm:$0x33 pattern:$0x76325410] %v1217_v41 }
 0x5f9   :  { %1674 = dma.done.wait [#allocation3], 32  }
 0x5fa   :  { %1675 = vsyncadd [#allocation3], 4294967264 }
 0x5fb   :  { %1676 = dma.done.wait [#allocation5], 32  }
 0x5fc   :  { %1677 = vsyncadd [#allocation5], 4294967264 }
 0x5fd   :  { %1257 = vsyncpa [#allocation3], 1 }
 0x5fe   :  { %1258 = vsyncpa [#allocation5], 1 }

</bundles_post_ra>
